<compile_context>
chip_gen: v6e
topology: v6e:2x2x1
jax: 0.10.0
libtpu: 0.0.40
codegen_flags: <defaults>
</compile_context>

<pallas_src>
import jax
import jax.numpy as jnp
from jax.experimental import pallas as pl
from jax.experimental.pallas import tpu as pltpu

# ----------------------------------------------------------------------------
# Module hyper-parameters (from Classifier.__init__ / marlin_vit_base config)
# ----------------------------------------------------------------------------
SEQ_TOKENS = 1568      # Conv1d in_channels (ViT tubelet tokens: 8 * 14 * 14)
CONV_OUT   = 16        # Conv1d out_channels
EMBED_DIM  = 768       # marlin_vit_base encoder_embed_dim (Conv1d "length" axis)
N_CLS1     = 1         # classifier1 out features
N_CLS2     = 7         # classifier2 out features
N_HEADS    = N_CLS1 + N_CLS2   # fused head width (= 8)


def _classifier_kernel(feat_ref, wconv_ref, wheads_ref, beff_ref, out_ref):
    """One grid step == Bt batch elements.

    feat_ref   : (Bt, SEQ_TOKENS, EMBED_DIM)  VMEM, bf16 or f32
    wconv_ref  : (CONV_OUT, SEQ_TOKENS)       Conv1d weight (kernel_size=1 squeezed), feat dtype
    wheads_ref : (EMBED_DIM, N_HEADS)         [classifier1.T | classifier2.T] fused, f32
    beff_ref   : (CONV_OUT, N_HEADS)          fused bias (conv bias folded in), f32
    out_ref    : (Bt, CONV_OUT, N_HEADS)      fused scores, f32
    """
    bt = feat_ref.shape[0]
    wconv = wconv_ref[...]
    wheads = wheads_ref[...]
    beff = beff_ref[...]
    for b in range(bt):                      # static unroll, Bt is small (<= 4)
        # Conv1d(kernel_size=1): (16, 1568) @ (1568, 768) -> (16, 768), f32 acc.
        y = jnp.dot(wconv, feat_ref[b], preferred_element_type=jnp.float32)
        # Fused classifier heads: (16, 768) @ (768, 8) + fused bias -> (16, 8).
        s = jnp.dot(y, wheads, preferred_element_type=jnp.float32) + beff
        out_ref[b] = s.astype(out_ref.dtype)


def _pick_batch_tile(batch, max_bt=4):
    """Largest batch tile (<= max_bt) dividing `batch`, preferring >= 2 grid steps
    so the parallel batch axis can be sharded across v7x's two TensorCores."""
    divisors = [d for d in range(1, min(batch, max_bt) + 1) if batch % d == 0]
    for d in reversed(divisors):
        if batch // d >= 2:
            return d
    return divisors[-1]


def classifier_forward(feat, w_conv, b_conv, w1, b1, w2, b2):
    """feat: (B, 1568, 768) bf16 or f32 (PyTorch Conv1d NCL layout).
       Weights in PyTorch conventions:
       w_conv (16, 1568, 1), b_conv (16,), w1 (1, 768), b1 (1,), w2 (7, 768), b2 (7,)."""
    B = feat.shape[0]
    assert feat.shape == (B, SEQ_TOKENS, EMBED_DIM)

    bt = _pick_batch_tile(B)
    grid = (B // bt,)

    # --- parameter glue (tiny, done once in XLA) -----------------------------
    wconv2d = w_conv[:, :, 0].astype(feat.dtype)                          # (16, 1568)
    w_heads = jnp.concatenate(
        [w1.T.astype(jnp.float32), w2.T.astype(jnp.float32)], axis=1)     # (768, 8)
    b_heads = jnp.concatenate([b1, b2]).astype(jnp.float32)               # (8,)
    # Fold the Conv1d bias into the head bias:
    #   s[o,n] = sum_d (conv[o,d] + b_conv[o]) * Wh[d,n] + b_heads[n]
    #          = sum_d conv[o,d] * Wh[d,n] + (b_heads[n] + b_conv[o] * sum_d Wh[d,n])
    b_eff = (b_heads[None, :]
             + b_conv.astype(jnp.float32)[:, None] * w_heads.sum(axis=0)[None, :])  # (16, 8)

    full2d = lambda i: (0, 0)

    cost = pl.CostEstimate(
        flops=2 * B * (CONV_OUT * SEQ_TOKENS * EMBED_DIM
                       + CONV_OUT * EMBED_DIM * N_HEADS),
        transcendentals=0,
        bytes_accessed=(feat.size * feat.dtype.itemsize
                        + wconv2d.size * wconv2d.dtype.itemsize
                        + w_heads.size * 4 + b_eff.size * 4
                        + B * CONV_OUT * N_HEADS * 4),
    )

    scores = pl.pallas_call(
        _classifier_kernel,
        out_shape=jax.ShapeDtypeStruct((B, CONV_OUT, N_HEADS), jnp.float32),
        grid_spec=pltpu.PrefetchScalarGridSpec(
            num_scalar_prefetch=0,
            grid=grid,
            in_specs=[
                pl.BlockSpec((bt, SEQ_TOKENS, EMBED_DIM), lambda i: (i, 0, 0)),
                pl.BlockSpec((CONV_OUT, SEQ_TOKENS), full2d),
                pl.BlockSpec((EMBED_DIM, N_HEADS), full2d),
                pl.BlockSpec((CONV_OUT, N_HEADS), full2d),
            ],
            out_specs=pl.BlockSpec((bt, CONV_OUT, N_HEADS), lambda i: (i, 0, 0)),
        ),
        compiler_params=pltpu.CompilerParams(
            dimension_semantics=("parallel",),
            # 48 MiB: enough for bt<=4 double-buffered feat (+weights), but well
            # below v7x's 64 MiB physical VMEM so the compiler keeps headroom.
            vmem_limit_bytes=48 << 20,
        ),
        cost_estimate=cost,
    )(feat, wconv2d, w_heads, b_eff)

    # Split the fused head output (cheap XLA slices outside the kernel).
    score1 = scores[..., :N_CLS1]     # (B, 16, 1)
    score2 = scores[..., N_CLS1:]     # (B, 16, 7)
    return score1, score2


def _reference(feat, w_conv, b_conv, w1, b1, w2, b2):
    """Pure-JAX f32 reference mirroring the PyTorch forward."""
    y = jnp.einsum("oc,bcl->bol", w_conv[:, :, 0], feat) + b_conv[None, :, None]
    s1 = jnp.einsum("bol,nl->bon", y, w1) + b1
    s2 = jnp.einsum("bol,nl->bon", y, w2) + b2
    return s1, s2


if __name__ == "__main__":
    B = 2
    key = jax.random.PRNGKey(0)
    k_feat, k_wc, k_bc, k_w1, k_b1, k_w2, k_b2 = jax.random.split(key, 7)

    # Synthetic "extracted features" (the model-is-None path of forward).
    feat_f32 = jax.random.normal(k_feat, (B, SEQ_TOKENS, EMBED_DIM), dtype=jnp.float32)
    # Stream the (large) feature tensor as bf16: the kernel is HBM-bandwidth
    # bound, so halving feat bytes is a ~2x win; accumulation stays in f32.
    feat = feat_f32.astype(jnp.bfloat16)

    # Deterministic parameter init (shapes from Classifier.__init__).
    w_conv = 0.02 * jax.random.normal(k_wc, (CONV_OUT, SEQ_TOKENS, 1), dtype=jnp.float32)
    b_conv = 0.02 * jax.random.normal(k_bc, (CONV_OUT,), dtype=jnp.float32)
    w1 = 0.02 * jax.random.normal(k_w1, (N_CLS1, EMBED_DIM), dtype=jnp.float32)
    b1 = 0.02 * jax.random.normal(k_b1, (N_CLS1,), dtype=jnp.float32)
    w2 = 0.02 * jax.random.normal(k_w2, (N_CLS2, EMBED_DIM), dtype=jnp.float32)
    b2 = 0.02 * jax.random.normal(k_b2, (N_CLS2,), dtype=jnp.float32)

    score1, score2 = classifier_forward(feat, w_conv, b_conv, w1, b1, w2, b2)
    jax.block_until_ready((score1, score2))

    # Reference: exact f32 module math on the same (bf16-rounded) features.
    ref1, ref2 = _reference(feat.astype(jnp.float32), w_conv, b_conv, w1, b1, w2, b2)
    assert score1.shape == (B, CONV_OUT, N_CLS1)
    assert score2.shape == (B, CONV_OUT, N_CLS2)
    assert jnp.allclose(score1, ref1, atol=2e-2, rtol=2e-2)
    assert jnp.allclose(score2, ref2, atol=2e-2, rtol=2e-2)

    print("KERNEL_OK")
</pallas_src>

<mosaic_0001>
module attributes {stable_mosaic.version = 11 : i64} {
  func.func @_classifier_kernel(%arg0: i32, %arg1: memref<1x1568x768xbf16, #tpu.memory_space<vmem>>, %arg2: memref<16x1568xbf16, #tpu.memory_space<vmem>>, %arg3: memref<768x8xf32, #tpu.memory_space<vmem>>, %arg4: memref<16x8xf32, #tpu.memory_space<vmem>>, %arg5: memref<1x16x8xf32, #tpu.memory_space<vmem>>) attributes {dimension_semantics = [#tpu.dimension_semantics<parallel>], iteration_bounds = array<i64: 2>, scalar_prefetch = 0 : i64, scratch_operands = 0 : i64, tpu.core_type = #tpu.core_type<tc>, window_params = [{transform_indices = @transform_0, window_bounds = array<i64: 1, 1568, 768>}, {pipeline_mode = #tpu.pipeline_mode<synchronous>, transform_indices = @transform_1, window_bounds = array<i64: 16, 1568>}, {pipeline_mode = #tpu.pipeline_mode<synchronous>, transform_indices = @transform_2, window_bounds = array<i64: 768, 8>}, {pipeline_mode = #tpu.pipeline_mode<synchronous>, transform_indices = @transform_3, window_bounds = array<i64: 16, 8>}, {transform_indices = @transform_4, window_bounds = array<i64: 1, 16, 8>}]} {
    %c0 = arith.constant 0 : index
    %c0_0 = arith.constant 0 : index
    %0 = vector.load %arg2[%c0, %c0_0] : memref<16x1568xbf16, #tpu.memory_space<vmem>>, vector<16x1568xbf16>
    %c0_1 = arith.constant 0 : index
    %c0_2 = arith.constant 0 : index
    %1 = vector.load %arg3[%c0_1, %c0_2] : memref<768x8xf32, #tpu.memory_space<vmem>>, vector<768x8xf32>
    %c0_3 = arith.constant 0 : index
    %c0_4 = arith.constant 0 : index
    %2 = vector.load %arg4[%c0_3, %c0_4] : memref<16x8xf32, #tpu.memory_space<vmem>>, vector<16x8xf32>
    %c0_5 = arith.constant 0 : index
    %c0_6 = arith.constant 0 : index
    %c0_7 = arith.constant 0 : index
    %3 = vector.load %arg1[%c0_5, %c0_6, %c0_7] : memref<1x1568x768xbf16, #tpu.memory_space<vmem>>, vector<1x1568x768xbf16>
    %4 = vector.shape_cast %3 : vector<1x1568x768xbf16> to vector<1568x768xbf16>
    %cst = arith.constant dense<0.000000e+00> : vector<16x768xf32>
    %5 = tpu.matmul %0, %4, %cst {dimension_numbers = #tpu.dot_dimension_numbers<[1], [0], [0], [1], [0, 0, 1, 1], [], []>} : vector<16x1568xbf16>, vector<1568x768xbf16>, vector<16x768xf32> -> vector<16x768xf32>
    %cst_8 = arith.constant dense<0.000000e+00> : vector<16x8xf32>
    %6 = tpu.matmul %5, %1, %cst_8 {dimension_numbers = #tpu.dot_dimension_numbers<[1], [0], [0], [1], [0, 0, 1, 1], [], []>} : vector<16x768xf32>, vector<768x8xf32>, vector<16x8xf32> -> vector<16x8xf32>
    %7 = arith.addf %6, %2 : vector<16x8xf32>
    %c0_9 = arith.constant 0 : index
    %c0_10 = arith.constant 0 : index
    %c0_11 = arith.constant 0 : index
    %8 = vector.load %arg5[%c0_9, %c0_10, %c0_11] : memref<1x16x8xf32, #tpu.memory_space<vmem>>, vector<1x16x8xf32>
    %9 = vector.shape_cast %8 : vector<1x16x8xf32> to vector<16x8xf32>
    %10 = vector.shape_cast %7 : vector<16x8xf32> to vector<1x16x8xf32>
    tpu.vector_store %arg5[%c0_9, %c0_10, %c0_11], %10 {strides = array<i32>} : memref<1x16x8xf32, #tpu.memory_space<vmem>>, vector<1x16x8xf32>,
    return
  }
  func.func @transform_0(%arg0: i32) -> (i32, i32, i32) {
    %c0_i32 = arith.constant 0 : i32
    %c0_i32_0 = arith.constant 0 : i32
    %c0_i32_1 = arith.constant 0 : i32
    return %arg0, %c0_i32, %c0_i32_0 : i32, i32, i32
  }
  func.func @transform_1(%arg0: i32) -> (i32, i32) {
    %c0_i32 = arith.constant 0 : i32
    %c0_i32_0 = arith.constant 0 : i32
    %c0_i32_1 = arith.constant 0 : i32
    return %c0_i32, %c0_i32_0 : i32, i32
  }
  func.func @transform_2(%arg0: i32) -> (i32, i32) {
    %c0_i32 = arith.constant 0 : i32
    %c0_i32_0 = arith.constant 0 : i32
    %c0_i32_1 = arith.constant 0 : i32
    return %c0_i32, %c0_i32_0 : i32, i32
  }
  func.func @transform_3(%arg0: i32) -> (i32, i32) {
    %c0_i32 = arith.constant 0 : i32
    %c0_i32_0 = arith.constant 0 : i32
    %c0_i32_1 = arith.constant 0 : i32
    return %c0_i32, %c0_i32_0 : i32, i32
  }
  func.func @transform_4(%arg0: i32) -> (i32, i32, i32) {
    %c0_i32 = arith.constant 0 : i32
    %c0_i32_0 = arith.constant 0 : i32
    %c0_i32_1 = arith.constant 0 : i32
    return %arg0, %c0_i32, %c0_i32_0 : i32, i32, i32
  }
}

</mosaic_0001>

<bundles_post_ra>
// kernel: tpu_custom_call.1
= control target key start
LH: loop header
LB: loop body
LE: loop exit
PB: predicated region body
PF: predicated region fallthrough
CT: control target
= control target key end

     0   :  { %9 = vsyncpa [#allocation3], 0  ;;  %s8164_s0 = inlined_call_operand.hbm [shape: bf16[2,1568,768], index: 0, kind: input, shape index: {}]   ;;  %s8165_s1 = inlined_call_operand.hbm [shape: bf16[16,1568], index: 1, kind: input, shape index: {}]   ;;  %s8166_s2 = inlined_call_operand.vmem [shape: f32[768,8], index: 2, kind: input, shape index: {}]   ;;  %s8167_s3 = inlined_call_operand.vmem [shape: f32[16,8], index: 3, kind: input, shape index: {}]   ;;  %s8168_s4 = inlined_call_operand.vmem [shape: f32[2,16,8], index: 4, kind: output, shape index: {}]  }
   0x1   :  { %11 = vsyncpa [#allocation3 + $0x1], 0 }
   0x2   :  { %12 = vsyncpa [#allocation5], 0  ;;  %s6987_s15 = smov 0   ;;  %s6989_s16 = smov 0  }
   0x3   :  { %s6991_s17 = smov 0   ;;  %s6993_s18 = smov 0  }
   0x4 LB: > { %s7006_s19 = sadd.s32 4294967295, %s6953_s18   ;;  %p38_p0 = scmp.ne.s32.totalorder %s6945_s16, %s6941_s15  ;;  %s6953_s18 = sphi %s6993_s18, %s8183_s18   ;;  %s6949_s17 = sphi %s6991_s17, %s8182_s17   ;;  %s6945_s16 = sphi %s6989_s16, %s8181_s16   ;;  %s6941_s15 = sphi %s6987_s15, %s8180_s15  }
   0x5   : > { %p8169_p1 = scmp.eq.s32.totalorder %s7006_s19, 0  ;;  %p5152_p2 = scmp.ge.s32.totalorder %s6953_s18, 1 }
   0x6   : > { %p138_p3 = scmp.lt.s32.totalorder %s6953_s18, 3  ;;  %s6955_s22 = smov [#allocation4]  }
   0x7   : > { %p7014_p4 = por %p8169_p1, %p38_p0  ;;  %s150_s23 = sshll.u32 %s6955_s22, 4  ;;  %s151_s23 = int_to_ptr.vmem [resolvable:$true] %s150_s23 }
   0x8   : > { %p7018_p5 = pnand %p5152_p2, %p138_p3  ;;  %s7031_s25 = sadd.s32 1, %s6953_s18  }
   0x9   : > { %s8172_s20 = scalar_select %p7014_p4, 1, 0 }
   0xa   : > { %s8173_s21 = scalar_select %p7018_p5, 1, 0 }
   0xb   : > { %p5890_p6 = pneg %p7018_p5  ;;  %s25_s26 = sadd.s32 1, %s6949_s17 }
   0xc   : > { %s22_s27 = ssub.s32 %s6953_s18, %s7031_s25  ;;  %s6872_s28 = scalar_lea.vmem %s151_s23, 1664 }
   0xd   : > { %p7026_p7 = pnand %p5890_p6, %p8169_p1  ;;  %p6873_p9 = scmp.ne.s32.totalorder %s151_s23, %s6872_s28 }
   0xe   : > { %p6880_p12 = scmp.lt.s32.totalorder %s151_s23, %s151_s23  ;;  %p6881_p13 = scmp.lt.s32.totalorder %s6872_s28, %s6872_s28 }
   0xf   : > { %p6863_p8 = pneg %p7026_p7 }
  0x10   : > { %p6882_p0 = por %p6881_p13, %p6880_p12 }
  0x11   : > { %p6875_p10 = pnand %p6873_p9, %p6863_p8 }
  0x13   : > { %p6876_p11 = pneg %p6875_p10 }
  0x15   : > { %p6883_p2 = pnand %p6882_p0, %p6876_p11 }
  0x17   : > { %6886 = shalt.err (!%p6883_p2)
}
  0x18   : > { %s6956_s29 = smov 832   ;;  %s6957_s30 = smov 52  }
  0x19   : > { %5893 = dma.hbm_to_vmem [thread:$0]  (!%p7026_p7), %s8165_s1, 1664, %s151_s23, [#allocation5], %s6956_s29, %s6956_s29, %s6957_s30  }
  0x1a   : > { %p23_p3 = scmp.eq.s32.totalorder %s22_s27, 0  ;;  %p32_p6 = scmp.ne.s32.totalorder %s6949_s17, %s6945_s16 }
  0x1b   : > { %p33_p8 = scmp.eq.s32.totalorder %s6953_s18, 0  ;;  %p5899_p9 = scmp.lt.s32.totalorder %s6953_s18, 2 }
  0x1c   : > { %s7048_s7 = scalar_select %p23_p3, %s6949_s17, %s25_s26  }
  0x1d   : > { %p34_p10 = por %p33_p8, %p32_p6  ;;  %s170_s8 = sand.u32 1, %s6949_s17  }
  0x1e   : > { %s5881_s9 = smul.u32 4704, %s170_s8  ;;  %s7063_s23 = scalar_lea.sflag [#allocation3], %s170_s8 }
  0x1f   : > { %s5882_s10 = smul.u32 75264, %s6953_s18  ;;  %p7052_p11 = pnand %p5899_p9, %p34_p10 }
  0x20   : > { %s174_s15 = scalar_lea.vmem [#allocation2], %s5881_s9  ;;  %s6892_s27 = scalar_lea.hbm %s8164_s0, 150528 }
  0x21   : > { %s7059_s14 = scalar_lea.hbm %s8164_s0, %s5882_s10  ;;  %s181_s22 = sshll.u32 %s174_s15, 4  ;;  %s7061_s22 = int_to_ptr.vmem [resolvable:$true] %s181_s22 }
  0x22   : > { %s6887_s18 = scalar_lea.hbm %s7059_s14, 75264  ;;  %p6889_p12 = pneg %p7052_p11 }
  0x23   : > { %p6888_p7 = scmp.ne.s32.totalorder %s7059_s14, %s6887_s18  ;;  %p6893_p2 = scmp.lt.s32.totalorder %s7059_s14, %s8164_s0 }
  0x24   : > { %p6894_p3 = scmp.lt.s32.totalorder %s6892_s27, %s6887_s18 }
  0x25   : > { %p6890_p13 = pnand %p6889_p12, %p6888_p7 }
  0x26   : > { %p6895_p6 = por %p6894_p3, %p6893_p2 }
  0x27   : > { %p6891_p0 = pneg %p6890_p13 }
  0x29   : > { %p6896_p8 = pnand %p6895_p6, %p6891_p0 }
  0x2b   : > { %6899 = shalt.err (!%p6896_p8)
}
  0x2c   : > { %s6900_s30 = scalar_lea.vmem %s7061_s22, 75264  ;;  %s6958_s5 = smov [#allocation2]  }
  0x2d   : > { %p6901_p9 = scmp.ne.s32.totalorder %s7061_s22, %s6900_s30  ;;  %s6905_s6 = sshll.u32 %s6958_s5, 4  ;;  %s6906_s6 = int_to_ptr.vmem [resolvable:$false] %s6905_s6 }
  0x2e   : > { %s6907_s8 = scalar_lea.vmem %s6906_s6, 150528  ;;  %p6908_p13 = scmp.lt.s32.totalorder %s7061_s22, %s6906_s6 }
  0x2f   : > { %p6903_p10 = pnand %p6901_p9, %p6889_p12  ;;  %p6909_p1 = scmp.lt.s32.totalorder %s6907_s8, %s6900_s30 }
  0x31   : > { %p6904_p7 = pneg %p6903_p10  ;;  %p6910_p4 = por %p6909_p1, %p6908_p13 }
  0x33   : > { %p6911_p5 = pnand %p6910_p4, %p6904_p7 }
  0x35   : > { %6914 = shalt.err (!%p6911_p5)
}
  0x36   : > { %s6959_s9 = smov 384   ;;  %s6960_s10 = smov 24  }
  0x37   : > { %5897 = dma.hbm_to_vmem [thread:$0]  (!%p7052_p11), %s7059_s14, 75264, %s7061_s22, %s7063_s23, %s6959_s9, %s6959_s9, %s6960_s10  }
  0x38   : > { %p8176_p12 = scmp.ne.s32.totalorder %s8173_s21, 0 }
  0x39   : > { %s195_s12 = sand.u32 (!%p8176_p12), 1, %s6945_s16   ;;  %p8177_p1 = scmp.ne.s32.totalorder (!%p8176_p12), %s8172_s20, 0 }
  0x3a   : > { %193 = sbr.rel (%p8176_p12) target bundleno = 1070 (0x42e), region = 36  ;;  %s196_s15 = scalar_lea.sflag (!%p8176_p12), [#allocation3], %s195_s12 }
  0x3b   : > { %s5883_s13 = smul.u32 (!%p8176_p12), 4704, %s195_s12 }
  0x3d   : > { %s7087_s18 = scalar_lea.vmem (!%p8176_p12), [#allocation2], %s5883_s13 }
  0x3f   : > { %6932 = dma.done.wait (%p8177_p1), %s196_s15, 75264  }
  0x40   : > { %6934 = vsyncadd (%p8177_p1), %s196_s15, 4294892032  ;;  %p8178_p4 = scmp.eq.s32.totalorder %s7006_s19, 0 }
  0x42   : > { %6936 = dma.done.wait (%p8178_p4), [#allocation5], 1664   ;;  %p8179_p5 = pmov %p8178_p4 }
  0x43   : > { %v5939_v0 = vld [vmem:[%s7087_s18 + $0x154] ss:$24 sps:$4 sm:$0xff]   ;;  %v5943_v2 = vld [vmem:[%s7087_s18 + $0x150] ss:$24 sps:$4 sm:$0xff]   ;;  %v5945_v4 = vld [vmem:[%s7087_s18 + $0x124] ss:$24 sps:$4 sm:$0xff]  }
  0x44   : > { %6938 = vsyncadd (%p8179_p5), [#allocation5], 4294965632  ;;  %v5941_v1 = vld [vmem:[%s7087_s18 + $0x454] ss:$24 sps:$4 sm:$0xff]   ;;  %3943 = vmatprep.subr.bf16.mxu0 %v5939_v0  ;;  %v5944_v3 = vld [vmem:[%s7087_s18 + $0x450] ss:$24 sps:$4 sm:$0xff]  }
  0x45   : > { %3986 = vmatprep.subr.bf16.mxu1 %v5941_v1  ;;  %3944 = vmatpush1.bf16.msra.mxu0 %v5943_v2  ;;  %v5947_v5 = vld [vmem:[%s7087_s18 + $0x424] ss:$24 sps:$4 sm:$0xff]   ;;  %v5949_v6 = vld [vmem:[%s7087_s18 + $0x120] ss:$24 sps:$4 sm:$0xff]   ;;  %v5951_v8 = vld [vmem:[%s7087_s18 + $0xf4] ss:$24 sps:$4 sm:$0xff]  }
  0x46   : > { %3987 = vmatpush1.bf16.msra.mxu1 %v5944_v3  ;;  %3945 = vmatprep.subr.bf16.mxu0 %v5945_v4  ;;  %v5950_v7 = vld [vmem:[%s7087_s18 + $0x420] ss:$24 sps:$4 sm:$0xff]   ;;  %v5953_v9 = vld [vmem:[%s7087_s18 + $0x3f4] ss:$24 sps:$4 sm:$0xff]   ;;  %v5955_v10 = vld [vmem:[%s7087_s18 + $0xf0] ss:$24 sps:$4 sm:$0xff]  }
  0x47   : > { %3988 = vmatprep.subr.bf16.mxu1 %v5947_v5  ;;  %v5956_v11 = vld [vmem:[%s7087_s18 + $0x3f0] ss:$24 sps:$4 sm:$0xff]   ;;  %v5957_v12 = vld [vmem:[%s7087_s18 + $0xc4] ss:$24 sps:$4 sm:$0xff]   ;;  %v5961_v14 = vld [vmem:[%s7087_s18 + $0xc0] ss:$24 sps:$4 sm:$0xff]  }
  0x48   : > { %v5959_v13 = vld [vmem:[%s7087_s18 + $0x3c4] ss:$24 sps:$4 sm:$0xff]   ;;  %v5962_v15 = vld [vmem:[%s7087_s18 + $0x3c0] ss:$24 sps:$4 sm:$0xff]   ;;  %v5963_v16 = vld [vmem:[%s7087_s18 + $0x94] ss:$24 sps:$4 sm:$0xff]  }
  0x49   : > { %3946 = vmatpush1.bf16.msra.mxu0 %v5949_v6  ;;  %v5965_v17 = vld [vmem:[%s7087_s18 + $0x394] ss:$24 sps:$4 sm:$0xff]   ;;  %v5967_v18 = vld [vmem:[%s7087_s18 + $0x90] ss:$24 sps:$4 sm:$0xff]   ;;  %v5969_v20 = vld [vmem:[%s7087_s18 + $0x64] ss:$24 sps:$4 sm:$0xff]  }
  0x4a   : > { %3989 = vmatpush1.bf16.msra.mxu1 %v5950_v7  ;;  %3947 = vmatprep.subr.bf16.mxu0 %v5951_v8  ;;  %v5968_v19 = vld [vmem:[%s7087_s18 + $0x390] ss:$24 sps:$4 sm:$0xff]   ;;  %v5971_v21 = vld [vmem:[%s7087_s18 + $0x364] ss:$24 sps:$4 sm:$0xff]   ;;  %v5973_v22 = vld [vmem:[%s7087_s18 + $0x60] ss:$24 sps:$4 sm:$0xff]  }
  0x4b   : > { %3990 = vmatprep.subr.bf16.mxu1 %v5953_v9  ;;  %v5974_v23 = vld [vmem:[%s7087_s18 + $0x360] ss:$24 sps:$4 sm:$0xff]   ;;  %v5975_v24 = vld [vmem:[%s7087_s18 + $0x34] ss:$24 sps:$4 sm:$0xff]   ;;  %v5979_v26 = vld [vmem:[%s7087_s18 + $0x30] ss:$24 sps:$4 sm:$0xff]  }
  0x4c   : > { %v5977_v25 = vld [vmem:[%s7087_s18 + $0x334] ss:$24 sps:$4 sm:$0xff]   ;;  %v5980_v27 = vld [vmem:[%s7087_s18 + $0x330] ss:$24 sps:$4 sm:$0xff]   ;;  %v5981_v28 = vld [vmem:[%s7087_s18 + $0x4] ss:$24 sps:$4 sm:$0xff]  }
  0x4d   : > { %3948 = vmatpush1.bf16.msra.mxu0 %v5955_v10  ;;  %v5983_v29 = vld [vmem:[%s7087_s18 + $0x304] ss:$24 sps:$4 sm:$0xff]   ;;  %v5985_v30 = vld [vmem:[%s7087_s18] ss:$24 sps:$4 sm:$0xff]   ;;  %v5987_v32 = vld [vmem:[%s7087_s18 + $0x2d4] ss:$24 sps:$4 sm:$0xff]  }
  0x4e   : > { %3991 = vmatpush1.bf16.msra.mxu1 %v5956_v11  ;;  %3949 = vmatprep.subr.bf16.mxu0 %v5957_v12  ;;  %v5986_v31 = vld [vmem:[%s7087_s18 + $0x300] ss:$24 sps:$4 sm:$0xff]   ;;  %v5989_v33 = vld [vmem:[%s7087_s18 + $0x5d4] ss:$24 sps:$4 sm:$0xff]   ;;  %v5991_v34 = vld [vmem:[%s7087_s18 + $0x2d0] ss:$24 sps:$4 sm:$0xff]  }
  0x4f   : > { %3992 = vmatprep.subr.bf16.mxu1 %v5959_v13  ;;  %v5992_v35 = vld [vmem:[%s7087_s18 + $0x5d0] ss:$24 sps:$4 sm:$0xff]   ;;  %v5993_v36 = vld [vmem:[%s7087_s18 + $0x2a4] ss:$24 sps:$4 sm:$0xff]   ;;  %v5997_v38 = vld [vmem:[%s7087_s18 + $0x2a0] ss:$24 sps:$4 sm:$0xff]  }
  0x50   : > { %v5995_v37 = vld [vmem:[%s7087_s18 + $0x5a4] ss:$24 sps:$4 sm:$0xff]   ;;  %v5998_v39 = vld [vmem:[%s7087_s18 + $0x5a0] ss:$24 sps:$4 sm:$0xff]   ;;  %v5999_v40 = vld [vmem:[%s7087_s18 + $0x274] ss:$24 sps:$4 sm:$0xff]  }
  0x51   : > { %3950 = vmatpush1.bf16.msra.mxu0 %v5961_v14  ;;  %v6001_v41 = vld [vmem:[%s7087_s18 + $0x574] ss:$24 sps:$4 sm:$0xff]   ;;  %v6003_v42 = vld [vmem:[%s7087_s18 + $0x270] ss:$24 sps:$4 sm:$0xff]   ;;  %v6005_v44 = vld [vmem:[%s7087_s18 + $0x244] ss:$24 sps:$4 sm:$0xff]  }
  0x52   : > { %3993 = vmatpush1.bf16.msra.mxu1 %v5962_v15  ;;  %3951 = vmatprep.subr.bf16.mxu0 %v5963_v16  ;;  %v6004_v43 = vld [vmem:[%s7087_s18 + $0x570] ss:$24 sps:$4 sm:$0xff]   ;;  %v6007_v45 = vld [vmem:[%s7087_s18 + $0x544] ss:$24 sps:$4 sm:$0xff]   ;;  %v6009_v46 = vld [vmem:[%s7087_s18 + $0x240] ss:$24 sps:$4 sm:$0xff]  }
  0x53   : > { %3994 = vmatprep.subr.bf16.mxu1 %v5965_v17  ;;  %v6010_v47 = vld [vmem:[%s7087_s18 + $0x540] ss:$24 sps:$4 sm:$0xff]   ;;  %v6011_v49 = vld [vmem:[%s7087_s18 + $0x214] ss:$24 sps:$4 sm:$0xff]   ;;  %v6015_v52 = vld [vmem:[%s7087_s18 + $0x210] ss:$24 sps:$4 sm:$0xff]  }
  0x54   : > { %v6035_v48 = vld [vmem:[#allocation4 + $0x4] ss:$52 sps:$4 sm:$0xff]   ;;  %v6037_v50 = vld [vmem:[#allocation4 + $0xc] ss:$52 sps:$4 sm:$0xff]   ;;  %v6016_v53 = vld [vmem:[%s7087_s18 + $0x510] ss:$24 sps:$4 sm:$0xff]  }
  0x55   : > { %3952 = vmatpush1.bf16.msra.mxu0 %v5967_v18  ;;  %v6013_v51 = vld [vmem:[%s7087_s18 + $0x514] ss:$24 sps:$4 sm:$0xff]   ;;  %3975 = vmatprep.mubr.bf16.mxu0 %v6035_v48  ;;  %v6017_v54 = vld [vmem:[%s7087_s18 + $0x1e4] ss:$24 sps:$4 sm:$0xff]   ;;  %v6021_v56 = vld [vmem:[%s7087_s18 + $0x1e0] ss:$24 sps:$4 sm:$0xff]  }
  0x56   : > { %3995 = vmatpush1.bf16.msra.mxu1 %v5968_v19  ;;  %3953 = vmatprep.subr.bf16.mxu0 %v5969_v20  ;;  %v6019_v55 = vld [vmem:[%s7087_s18 + $0x4e4] ss:$24 sps:$4 sm:$0xff]   ;;  %v6022_v57 = vld [vmem:[%s7087_s18 + $0x4e0] ss:$24 sps:$4 sm:$0xff]   ;;  %v6023_v58 = vld [vmem:[%s7087_s18 + $0x1b4] ss:$24 sps:$4 sm:$0xff]  }
  0x57   : > { %3996 = vmatprep.subr.bf16.mxu1 %v5971_v21  ;;  %4018 = vmatprep.mubr.bf16.mxu1 %v6037_v50  ;;  %v6025_v59 = vld [vmem:[%s7087_s18 + $0x4b4] ss:$24 sps:$4 sm:$0xff]   ;;  %v6027_v60 = vld [vmem:[%s7087_s18 + $0x1b0] ss:$24 sps:$4 sm:$0xff]   ;;  %v6029_v62 = vld [vmem:[%s7087_s18 + $0x184] ss:$24 sps:$4 sm:$0xff]  }
  0x58   : > { %v6028_v61 = vld [vmem:[%s7087_s18 + $0x4b0] ss:$24 sps:$4 sm:$0xff]   ;;  %v6031_v63 = vld [vmem:[%s7087_s18 + $0x484] ss:$24 sps:$4 sm:$0xff]   ;;  %v6033_v0 = vld [vmem:[%s7087_s18 + $0x180] ss:$24 sps:$4 sm:$0xff]  }
  0x59   : > { %3954 = vmatpush1.bf16.msra.mxu0 %v5973_v22  ;;  %v6034_v1 = vld [vmem:[%s7087_s18 + $0x480] ss:$24 sps:$4 sm:$0xff]   ;;  %v6043_v2 = vld [vmem:[%s7087_s18 + $0x754] ss:$24 sps:$4 sm:$0xff]   ;;  %v6040_v5 = vld [vmem:[#allocation4 + $0x8] ss:$52 sps:$4 sm:$0xff]  }
  0x5a   : > { %3997 = vmatpush1.bf16.msra.mxu1 %v5974_v23  ;;  %3955 = vmatprep.subr.bf16.mxu0 %v5975_v24  ;;  %v6046_v3 = vld [vmem:[%s7087_s18 + $0xa54] ss:$24 sps:$4 sm:$0xff]   ;;  %v6041_v6 = vld [vmem:[%s7087_s18 + $0x750] ss:$24 sps:$4 sm:$0xff]   ;;  %v6049_v8 = vld [vmem:[%s7087_s18 + $0x724] ss:$24 sps:$4 sm:$0xff]  }
  0x5b   : > { %3998 = vmatprep.subr.bf16.mxu1 %v5977_v25  ;;  %v6039_v4 = vld [vmem:[#allocation4] ss:$52 sps:$4 sm:$0xff]   ;;  %v6044_v7 = vld [vmem:[%s7087_s18 + $0xa50] ss:$24 sps:$4 sm:$0xff]   ;;  %v6052_v9 = vld [vmem:[%s7087_s18 + $0xa24] ss:$24 sps:$4 sm:$0xff]  }
  0x5c   : > { %v6047_v10 = vld [vmem:[%s7087_s18 + $0x720] ss:$24 sps:$4 sm:$0xff]   ;;  %v6055_v12 = vld [vmem:[%s7087_s18 + $0x6f4] ss:$24 sps:$4 sm:$0xff]   ;;  %v6053_v14 = vld [vmem:[%s7087_s18 + $0x6f0] ss:$24 sps:$4 sm:$0xff]  }
  0x5d   : > { %3956 = vmatpush1.bf16.msra.mxu0 %v5979_v26  ;;  %v6050_v11 = vld [vmem:[%s7087_s18 + $0xa20] ss:$24 sps:$4 sm:$0xff]   ;;  %v6058_v13 = vld [vmem:[%s7087_s18 + $0x9f4] ss:$24 sps:$4 sm:$0xff]   ;;  %v6056_v15 = vld [vmem:[%s7087_s18 + $0x9f0] ss:$24 sps:$4 sm:$0xff]  }
  0x5e   : > { %3999 = vmatpush1.bf16.msra.mxu1 %v5980_v27  ;;  %3957 = vmatprep.subr.bf16.mxu0 %v5981_v28  ;;  %v6061_v16 = vld [vmem:[%s7087_s18 + $0x6c4] ss:$24 sps:$4 sm:$0xff]   ;;  %v6059_v18 = vld [vmem:[%s7087_s18 + $0x6c0] ss:$24 sps:$4 sm:$0xff]   ;;  %v6067_v20 = vld [vmem:[%s7087_s18 + $0x694] ss:$24 sps:$4 sm:$0xff]  }
  0x5f   : > { %4000 = vmatprep.subr.bf16.mxu1 %v5983_v29  ;;  %v6064_v17 = vld [vmem:[%s7087_s18 + $0x9c4] ss:$24 sps:$4 sm:$0xff]   ;;  %v6062_v19 = vld [vmem:[%s7087_s18 + $0x9c0] ss:$24 sps:$4 sm:$0xff]   ;;  %v6070_v21 = vld [vmem:[%s7087_s18 + $0x994] ss:$24 sps:$4 sm:$0xff]  }
  0x60   : > { %v6065_v22 = vld [vmem:[%s7087_s18 + $0x690] ss:$24 sps:$4 sm:$0xff]   ;;  %v6073_v24 = vld [vmem:[%s7087_s18 + $0x664] ss:$24 sps:$4 sm:$0xff]   ;;  %v6071_v26 = vld [vmem:[%s7087_s18 + $0x660] ss:$24 sps:$4 sm:$0xff]  }
  0x61   : > { %3958 = vmatpush1.bf16.msra.mxu0 %v5985_v30  ;;  %v6068_v23 = vld [vmem:[%s7087_s18 + $0x990] ss:$24 sps:$4 sm:$0xff]   ;;  %v6076_v25 = vld [vmem:[%s7087_s18 + $0x964] ss:$24 sps:$4 sm:$0xff]   ;;  %v6074_v27 = vld [vmem:[%s7087_s18 + $0x960] ss:$24 sps:$4 sm:$0xff]  }
  0x62   : > { %4001 = vmatpush1.bf16.msra.mxu1 %v5986_v31  ;;  %3959 = vmatprep.subr.bf16.mxu0 %v5987_v32  ;;  %v6079_v28 = vld [vmem:[%s7087_s18 + $0x634] ss:$24 sps:$4 sm:$0xff]   ;;  %v6077_v30 = vld [vmem:[%s7087_s18 + $0x630] ss:$24 sps:$4 sm:$0xff]   ;;  %v6085_v32 = vld [vmem:[%s7087_s18 + $0x604] ss:$24 sps:$4 sm:$0xff]  }
  0x63   : > { %4002 = vmatprep.subr.bf16.mxu1 %v5989_v33  ;;  %v6082_v29 = vld [vmem:[%s7087_s18 + $0x934] ss:$24 sps:$4 sm:$0xff]   ;;  %v6080_v31 = vld [vmem:[%s7087_s18 + $0x930] ss:$24 sps:$4 sm:$0xff]   ;;  %v6088_v33 = vld [vmem:[%s7087_s18 + $0x904] ss:$24 sps:$4 sm:$0xff]  }
  0x64   : > { %v6101_v48 = vld [vmem:[%s7087_s18 + $0x870] ss:$24 sps:$4 sm:$0xff]   ;;  %v6109_v50 = vld [vmem:[%s7087_s18 + $0x844] ss:$24 sps:$4 sm:$0xff]   ;;  %vm3939_vm0 = vcmask 261120   ;;  %p228_p11 = scmp.lt.s32.totalorder %s7006_s19, 1 }
  0x65   : > { %3960 = vmatpush2.bf16.msra.mxu0 %v5991_v34  ;;  %v6139_v34 = vld [vmem:[#allocation4 + $0x14] ss:$52 sps:$4 sm:$0xff]   ;;  %vm5071_vm1 = vcmask 64512  }
  0x66   : > { %4003 = vmatpush2.bf16.msra.mxu1 %v5992_v35  ;;  %3961 = vmatprep.subr.bf16.mxu0 %v5993_v36  ;;  %v6142_v35 = vld [vmem:[#allocation4 + $0x1c] ss:$52 sps:$4 sm:$0xff]   ;;  %v6083_v36 = vld [vmem:[%s7087_s18 + $0x600] ss:$24 sps:$4 sm:$0xff]   ;;  %s8185_s19 = smov (!%p228_p11, %s7006_s19), 1 }
  0x67   : > { %4004 = vmatprep.subr.bf16.mxu1 %v5995_v37  ;;  %v6086_v37 = vld [vmem:[%s7087_s18 + $0x900] ss:$24 sps:$4 sm:$0xff]   ;;  %s5766_s24 = sshll.u32 %s8185_s19, 4 }
  0x68   : > { %s232_s30 = scalar_lea.vmem %s8168_s4, %s5766_s24 }
  0x69   : > { %3962 = vmatpush2.bf16.msra.mxu0 %v5997_v38  ;;  %v6091_v38 = vld [vmem:[%s7087_s18 + $0x8d4] ss:$24 sps:$4 sm:$0xff]  }
  0x6a   : > { %4005 = vmatpush2.bf16.msra.mxu1 %v5998_v39  ;;  %3963 = vmatprep.subr.bf16.mxu0 %v5999_v40  ;;  %v6094_v39 = vld [vmem:[%s7087_s18 + $0xbd4] ss:$24 sps:$4 sm:$0xff]   ;;  %v6089_v40 = vld [vmem:[%s7087_s18 + $0x8d0] ss:$24 sps:$4 sm:$0xff]  }
  0x6b   : > { %4006 = vmatprep.subr.bf16.mxu1 %v6001_v41  ;;  %v6092_v41 = vld [vmem:[%s7087_s18 + $0xbd0] ss:$24 sps:$4 sm:$0xff]  }
  0x6d   : > { %3964 = vmatpush2.bf16.msra.mxu0 %v6003_v42  ;;  %v6097_v42 = vld [vmem:[%s7087_s18 + $0x8a4] ss:$24 sps:$4 sm:$0xff]  }
  0x6e   : > { %4007 = vmatpush2.bf16.msra.mxu1 %v6004_v43  ;;  %3965 = vmatprep.subr.bf16.mxu0 %v6005_v44  ;;  %v6100_v43 = vld [vmem:[%s7087_s18 + $0xba4] ss:$24 sps:$4 sm:$0xff]   ;;  %v6095_v44 = vld [vmem:[%s7087_s18 + $0x8a0] ss:$24 sps:$4 sm:$0xff]  }
  0x6f   : > { %4008 = vmatprep.subr.bf16.mxu1 %v6007_v45  ;;  %v6098_v45 = vld [vmem:[%s7087_s18 + $0xba0] ss:$24 sps:$4 sm:$0xff]  }
  0x71   : > { %3966 = vmatpush2.bf16.msra.mxu0 %v6009_v46  ;;  %v6103_v46 = vld [vmem:[%s7087_s18 + $0x874] ss:$24 sps:$4 sm:$0xff]  }
  0x72   : > { %4009 = vmatpush2.bf16.msra.mxu1 %v6010_v47  ;;  %3967 = vmatprep.subr.bf16.mxu0 %v6011_v49  ;;  %v6106_v47 = vld [vmem:[%s7087_s18 + $0xb74] ss:$24 sps:$4 sm:$0xff]   ;;  %v6104_v49 = vld [vmem:[%s7087_s18 + $0xb70] ss:$24 sps:$4 sm:$0xff]  }
  0x73   : > { %4010 = vmatprep.subr.bf16.mxu1 %v6013_v51  ;;  %v6112_v51 = vld [vmem:[%s7087_s18 + $0xb44] ss:$24 sps:$4 sm:$0xff]  }
  0x75   : > { %3968 = vmatpush2.bf16.msra.mxu0 %v6015_v52  ;;  %v6107_v52 = vld [vmem:[%s7087_s18 + $0x840] ss:$24 sps:$4 sm:$0xff]  }
  0x76   : > { %4011 = vmatpush2.bf16.msra.mxu1 %v6016_v53  ;;  %3969 = vmatprep.subr.bf16.mxu0 %v6017_v54  ;;  %v6110_v53 = vld [vmem:[%s7087_s18 + $0xb40] ss:$24 sps:$4 sm:$0xff]   ;;  %v6115_v54 = vld [vmem:[%s7087_s18 + $0x814] ss:$24 sps:$4 sm:$0xff]  }
  0x77   : > { %4012 = vmatprep.subr.bf16.mxu1 %v6019_v55  ;;  %v6118_v55 = vld [vmem:[%s7087_s18 + $0xb14] ss:$24 sps:$4 sm:$0xff]  }
  0x79   : > { %3970 = vmatpush2.bf16.msra.mxu0 %v6021_v56  ;;  %v6113_v56 = vld [vmem:[%s7087_s18 + $0x810] ss:$24 sps:$4 sm:$0xff]  }
  0x7a   : > { %4013 = vmatpush2.bf16.msra.mxu1 %v6022_v57  ;;  %3971 = vmatprep.subr.bf16.mxu0 %v6023_v58  ;;  %v6116_v57 = vld [vmem:[%s7087_s18 + $0xb10] ss:$24 sps:$4 sm:$0xff]   ;;  %v6121_v58 = vld [vmem:[%s7087_s18 + $0x7e4] ss:$24 sps:$4 sm:$0xff]  }
  0x7b   : > { %4014 = vmatprep.subr.bf16.mxu1 %v6025_v59  ;;  %v6124_v59 = vld [vmem:[%s7087_s18 + $0xae4] ss:$24 sps:$4 sm:$0xff]  }
  0x7d   : > { %3972 = vmatpush2.bf16.msra.mxu0 %v6027_v60  ;;  %v6119_v60 = vld [vmem:[%s7087_s18 + $0x7e0] ss:$24 sps:$4 sm:$0xff]  }
  0x7e   : > { %4015 = vmatpush2.bf16.msra.mxu1 %v6028_v61  ;;  %3973 = vmatprep.subr.bf16.mxu0 %v6029_v62  ;;  %v6122_v61 = vld [vmem:[%s7087_s18 + $0xae0] ss:$24 sps:$4 sm:$0xff]   ;;  %v6127_v62 = vld [vmem:[%s7087_s18 + $0x7b4] ss:$24 sps:$4 sm:$0xff]  }
  0x7f   : > { %4016 = vmatprep.subr.bf16.mxu1 %v6031_v63  ;;  %v6130_v63 = vld [vmem:[%s7087_s18 + $0xab4] ss:$24 sps:$4 sm:$0xff]  }
  0x81   : > { %3974 = vmatpush2.bf16.msra.mxu0 %v6033_v0  ;;  %v6125_v0 = vld [vmem:[%s7087_s18 + $0x7b0] ss:$24 sps:$4 sm:$0xff]  }
  0x82   : > { %4017 = vmatpush2.bf16.msra.mxu1 %v6034_v1  ;;  %4029 = vmatprep.subr.bf16.mxu0 %v6043_v2  ;;  %v6128_v1 = vld [vmem:[%s7087_s18 + $0xab0] ss:$24 sps:$4 sm:$0xff]   ;;  %v6133_v2 = vld [vmem:[%s7087_s18 + $0x784] ss:$24 sps:$4 sm:$0xff]  }
  0x83   : > { %4072 = vmatprep.subr.bf16.mxu1 %v6046_v3  ;;  %v6136_v3 = vld [vmem:[%s7087_s18 + $0xa84] ss:$24 sps:$4 sm:$0xff]  }
  0x84   : > { %3976 = vmatmul.mubr.bf16.vlgmr.msra.gmra.mxu0 %v6039_v4  ;;  %v6131_v4 = vld [vmem:[%s7087_s18 + $0x780] ss:$24 sps:$4 sm:$0xff]  }
  0x85   : > { %4019 = vmatmul.mubr.bf16.vlgmr.msra.gmra.mxu1 %v6040_v5  ;;  %4030 = vmatpush1.bf16.msra.mxu0 %v6041_v6  ;;  %v6134_v5 = vld [vmem:[%s7087_s18 + $0xa80] ss:$24 sps:$4 sm:$0xff]   ;;  %v6145_v6 = vld [vmem:[%s7087_s18 + $0xd54] ss:$24 sps:$4 sm:$0xff]  }
  0x86   : > { %4073 = vmatpush1.bf16.msra.mxu1 %v6044_v7  ;;  %4031 = vmatprep.subr.bf16.mxu0 %v6049_v8  ;;  %v6148_v7 = vld [vmem:[%s7087_s18 + $0x1054] ss:$24 sps:$4 sm:$0xff]   ;;  %v6137_v8 = vld [vmem:[#allocation4 + $0x10] ss:$52 sps:$4 sm:$0xff]  }
  0x87   : > { %4074 = vmatprep.subr.bf16.mxu1 %v6052_v9  ;;  %4061 = vmatprep.mubr.bf16.mxu0 %v6139_v34  ;;  %v6140_v9 = vld [vmem:[#allocation4 + $0x18] ss:$52 sps:$4 sm:$0xff]  }
  0x88   : > { %4104 = vmatprep.mubr.bf16.mxu1 %v6142_v35  ;;  %v6181_v34 = vld [vmem:[%s7087_s18 + $0xc34] ss:$24 sps:$4 sm:$0xff]  }
  0x89   : > { %4032 = vmatpush1.bf16.msra.mxu0 %v6047_v10  ;;  %v6143_v10 = vld [vmem:[%s7087_s18 + $0xd50] ss:$24 sps:$4 sm:$0xff]   ;;  %v6184_v35 = vld [vmem:[%s7087_s18 + $0xf34] ss:$24 sps:$4 sm:$0xff]  }
  0x8a   : > { %4075 = vmatpush1.bf16.msra.mxu1 %v6050_v11  ;;  %4033 = vmatprep.subr.bf16.mxu0 %v6055_v12  ;;  %v6146_v11 = vld [vmem:[%s7087_s18 + $0x1050] ss:$24 sps:$4 sm:$0xff]   ;;  %v6151_v12 = vld [vmem:[%s7087_s18 + $0xd24] ss:$24 sps:$4 sm:$0xff]  }
  0x8b   : > { %4076 = vmatprep.subr.bf16.mxu1 %v6058_v13  ;;  %v6154_v13 = vld [vmem:[%s7087_s18 + $0x1024] ss:$24 sps:$4 sm:$0xff]  }
  0x8d   : > { %4034 = vmatpush1.bf16.msra.mxu0 %v6053_v14  ;;  %v6149_v14 = vld [vmem:[%s7087_s18 + $0xd20] ss:$24 sps:$4 sm:$0xff]  }
  0x8e   : > { %4077 = vmatpush1.bf16.msra.mxu1 %v6056_v15  ;;  %4035 = vmatprep.subr.bf16.mxu0 %v6061_v16  ;;  %v6152_v15 = vld [vmem:[%s7087_s18 + $0x1020] ss:$24 sps:$4 sm:$0xff]   ;;  %v6157_v16 = vld [vmem:[%s7087_s18 + $0xcf4] ss:$24 sps:$4 sm:$0xff]  }
  0x8f   : > { %4078 = vmatprep.subr.bf16.mxu1 %v6064_v17  ;;  %v6160_v17 = vld [vmem:[%s7087_s18 + $0xff4] ss:$24 sps:$4 sm:$0xff]  }
  0x91   : > { %4036 = vmatpush1.bf16.msra.mxu0 %v6059_v18  ;;  %v6155_v18 = vld [vmem:[%s7087_s18 + $0xcf0] ss:$24 sps:$4 sm:$0xff]  }
  0x92   : > { %4079 = vmatpush1.bf16.msra.mxu1 %v6062_v19  ;;  %4037 = vmatprep.subr.bf16.mxu0 %v6067_v20  ;;  %v6241_v19 = vld [vmem:[#allocation4 + $0x24] ss:$52 sps:$4 sm:$0xff]   ;;  %v6158_v20 = vld [vmem:[%s7087_s18 + $0xff0] ss:$24 sps:$4 sm:$0xff]  }
  0x93   : > { %4080 = vmatprep.subr.bf16.mxu1 %v6070_v21  ;;  %v6244_v21 = vld [vmem:[#allocation4 + $0x2c] ss:$52 sps:$4 sm:$0xff]  }
  0x95   : > { %4038 = vmatpush1.bf16.msra.mxu0 %v6065_v22  ;;  %v6163_v22 = vld [vmem:[%s7087_s18 + $0xcc4] ss:$24 sps:$4 sm:$0xff]  }
  0x96   : > { %4081 = vmatpush1.bf16.msra.mxu1 %v6068_v23  ;;  %4039 = vmatprep.subr.bf16.mxu0 %v6073_v24  ;;  %v6166_v23 = vld [vmem:[%s7087_s18 + $0xfc4] ss:$24 sps:$4 sm:$0xff]   ;;  %v6161_v24 = vld [vmem:[%s7087_s18 + $0xcc0] ss:$24 sps:$4 sm:$0xff]  }
  0x97   : > { %4082 = vmatprep.subr.bf16.mxu1 %v6076_v25  ;;  %v6164_v25 = vld [vmem:[%s7087_s18 + $0xfc0] ss:$24 sps:$4 sm:$0xff]  }
  0x99   : > { %4040 = vmatpush1.bf16.msra.mxu0 %v6071_v26  ;;  %v6169_v26 = vld [vmem:[%s7087_s18 + $0xc94] ss:$24 sps:$4 sm:$0xff]  }
  0x9a   : > { %4083 = vmatpush1.bf16.msra.mxu1 %v6074_v27  ;;  %4041 = vmatprep.subr.bf16.mxu0 %v6079_v28  ;;  %v6172_v27 = vld [vmem:[%s7087_s18 + $0xf94] ss:$24 sps:$4 sm:$0xff]   ;;  %v6167_v28 = vld [vmem:[%s7087_s18 + $0xc90] ss:$24 sps:$4 sm:$0xff]  }
  0x9b   : > { %4084 = vmatprep.subr.bf16.mxu1 %v6082_v29  ;;  %v6170_v29 = vld [vmem:[%s7087_s18 + $0xf90] ss:$24 sps:$4 sm:$0xff]  }
  0x9d   : > { %4042 = vmatpush1.bf16.msra.mxu0 %v6077_v30  ;;  %v6175_v30 = vld [vmem:[%s7087_s18 + $0xc64] ss:$24 sps:$4 sm:$0xff]  }
  0x9e   : > { %4085 = vmatpush1.bf16.msra.mxu1 %v6080_v31  ;;  %4043 = vmatprep.subr.bf16.mxu0 %v6085_v32  ;;  %v6178_v31 = vld [vmem:[%s7087_s18 + $0xf64] ss:$24 sps:$4 sm:$0xff]   ;;  %v6173_v32 = vld [vmem:[%s7087_s18 + $0xc60] ss:$24 sps:$4 sm:$0xff]  }
  0x9f   : > { %4086 = vmatprep.subr.bf16.mxu1 %v6088_v33  ;;  %v6176_v33 = vld [vmem:[%s7087_s18 + $0xf60] ss:$24 sps:$4 sm:$0xff]  }
  0xa1   : > { %4044 = vmatpush1.bf16.msra.mxu0 %v6083_v36  ;;  %v6179_v36 = vld [vmem:[%s7087_s18 + $0xc30] ss:$24 sps:$4 sm:$0xff]  }
  0xa2   : > { %4087 = vmatpush1.bf16.msra.mxu1 %v6086_v37  ;;  %4045 = vmatprep.subr.bf16.mxu0 %v6091_v38  ;;  %v6182_v37 = vld [vmem:[%s7087_s18 + $0xf30] ss:$24 sps:$4 sm:$0xff]   ;;  %v6187_v38 = vld [vmem:[%s7087_s18 + $0xc04] ss:$24 sps:$4 sm:$0xff]  }
  0xa3   : > { %4088 = vmatprep.subr.bf16.mxu1 %v6094_v39  ;;  %v6190_v39 = vld [vmem:[%s7087_s18 + $0xf04] ss:$24 sps:$4 sm:$0xff]  }
  0xa5   : > { %4046 = vmatpush2.bf16.msra.mxu0 %v6089_v40  ;;  %v6185_v40 = vld [vmem:[%s7087_s18 + $0xc00] ss:$24 sps:$4 sm:$0xff]  }
  0xa6   : > { %4089 = vmatpush2.bf16.msra.mxu1 %v6092_v41  ;;  %4047 = vmatprep.subr.bf16.mxu0 %v6097_v42  ;;  %v6188_v41 = vld [vmem:[%s7087_s18 + $0xf00] ss:$24 sps:$4 sm:$0xff]   ;;  %v6193_v42 = vld [vmem:[%s7087_s18 + $0xed4] ss:$24 sps:$4 sm:$0xff]  }
  0xa7   : > { %4090 = vmatprep.subr.bf16.mxu1 %v6100_v43  ;;  %v6196_v43 = vld [vmem:[%s7087_s18 + $0x11d4] ss:$24 sps:$4 sm:$0xff]  }
  0xa9   : > { %4048 = vmatpush2.bf16.msra.mxu0 %v6095_v44  ;;  %v6191_v44 = vld [vmem:[%s7087_s18 + $0xed0] ss:$24 sps:$4 sm:$0xff]  }
  0xaa   : > { %4091 = vmatpush2.bf16.msra.mxu1 %v6098_v45  ;;  %4049 = vmatprep.subr.bf16.mxu0 %v6103_v46  ;;  %v6194_v45 = vld [vmem:[%s7087_s18 + $0x11d0] ss:$24 sps:$4 sm:$0xff]   ;;  %v6199_v46 = vld [vmem:[%s7087_s18 + $0xea4] ss:$24 sps:$4 sm:$0xff]  }
  0xab   : > { %4092 = vmatprep.subr.bf16.mxu1 %v6106_v47  ;;  %v6202_v47 = vld [vmem:[%s7087_s18 + $0x11a4] ss:$24 sps:$4 sm:$0xff]  }
  0xad   : > { %4050 = vmatpush2.bf16.msra.mxu0 %v6101_v48  ;;  %v6197_v48 = vld [vmem:[%s7087_s18 + $0xea0] ss:$24 sps:$4 sm:$0xff]  }
  0xae   : > { %4093 = vmatpush2.bf16.msra.mxu1 %v6104_v49  ;;  %4051 = vmatprep.subr.bf16.mxu0 %v6109_v50  ;;  %v6200_v49 = vld [vmem:[%s7087_s18 + $0x11a0] ss:$24 sps:$4 sm:$0xff]   ;;  %v6205_v50 = vld [vmem:[%s7087_s18 + $0xe74] ss:$24 sps:$4 sm:$0xff]  }
  0xaf   : > { %4094 = vmatprep.subr.bf16.mxu1 %v6112_v51  ;;  %v6208_v51 = vld [vmem:[%s7087_s18 + $0x1174] ss:$24 sps:$4 sm:$0xff]  }
  0xb1   : > { %4052 = vmatpush2.bf16.msra.mxu0 %v6107_v52  ;;  %v6203_v52 = vld [vmem:[%s7087_s18 + $0xe70] ss:$24 sps:$4 sm:$0xff]  }
  0xb2   : > { %4095 = vmatpush2.bf16.msra.mxu1 %v6110_v53  ;;  %4053 = vmatprep.subr.bf16.mxu0 %v6115_v54  ;;  %v6206_v53 = vld [vmem:[%s7087_s18 + $0x1170] ss:$24 sps:$4 sm:$0xff]   ;;  %v6211_v54 = vld [vmem:[%s7087_s18 + $0xe44] ss:$24 sps:$4 sm:$0xff]  }
  0xb3   : > { %4096 = vmatprep.subr.bf16.mxu1 %v6118_v55  ;;  %v6214_v55 = vld [vmem:[%s7087_s18 + $0x1144] ss:$24 sps:$4 sm:$0xff]  }
  0xb5   : > { %4054 = vmatpush2.bf16.msra.mxu0 %v6113_v56  ;;  %v6209_v56 = vld [vmem:[%s7087_s18 + $0xe40] ss:$24 sps:$4 sm:$0xff]  }
  0xb6   : > { %4097 = vmatpush2.bf16.msra.mxu1 %v6116_v57  ;;  %4055 = vmatprep.subr.bf16.mxu0 %v6121_v58  ;;  %v6212_v57 = vld [vmem:[%s7087_s18 + $0x1140] ss:$24 sps:$4 sm:$0xff]   ;;  %v6217_v58 = vld [vmem:[%s7087_s18 + $0xe14] ss:$24 sps:$4 sm:$0xff]  }
  0xb7   : > { %4098 = vmatprep.subr.bf16.mxu1 %v6124_v59  ;;  %v6220_v59 = vld [vmem:[%s7087_s18 + $0x1114] ss:$24 sps:$4 sm:$0xff]  }
  0xb9   : > { %4056 = vmatpush2.bf16.msra.mxu0 %v6119_v60  ;;  %v6215_v60 = vld [vmem:[%s7087_s18 + $0xe10] ss:$24 sps:$4 sm:$0xff]  }
  0xba   : > { %4099 = vmatpush2.bf16.msra.mxu1 %v6122_v61  ;;  %4057 = vmatprep.subr.bf16.mxu0 %v6127_v62  ;;  %v6218_v61 = vld [vmem:[%s7087_s18 + $0x1110] ss:$24 sps:$4 sm:$0xff]   ;;  %v6223_v62 = vld [vmem:[%s7087_s18 + $0xde4] ss:$24 sps:$4 sm:$0xff]  }
  0xbb   : > { %4100 = vmatprep.subr.bf16.mxu1 %v6130_v63  ;;  %v6226_v63 = vld [vmem:[%s7087_s18 + $0x10e4] ss:$24 sps:$4 sm:$0xff]  }
  0xbd   : > { %4058 = vmatpush2.bf16.msra.mxu0 %v6125_v0  ;;  %v6221_v0 = vld [vmem:[%s7087_s18 + $0xde0] ss:$24 sps:$4 sm:$0xff]  }
  0xbe   : > { %4101 = vmatpush2.bf16.msra.mxu1 %v6128_v1  ;;  %4059 = vmatprep.subr.bf16.mxu0 %v6133_v2  ;;  %v6224_v1 = vld [vmem:[%s7087_s18 + $0x10e0] ss:$24 sps:$4 sm:$0xff]   ;;  %v6229_v2 = vld [vmem:[%s7087_s18 + $0xdb4] ss:$24 sps:$4 sm:$0xff]  }
  0xbf   : > { %4102 = vmatprep.subr.bf16.mxu1 %v6136_v3  ;;  %v6232_v3 = vld [vmem:[%s7087_s18 + $0x10b4] ss:$24 sps:$4 sm:$0xff]  }
  0xc1   : > { %4060 = vmatpush2.bf16.msra.mxu0 %v6131_v4  ;;  %v6227_v4 = vld [vmem:[%s7087_s18 + $0xdb0] ss:$24 sps:$4 sm:$0xff]  }
  0xc2   : > { %4103 = vmatpush2.bf16.msra.mxu1 %v6134_v5  ;;  %4115 = vmatprep.subr.bf16.mxu0 %v6145_v6  ;;  %v6230_v5 = vld [vmem:[%s7087_s18 + $0x10b0] ss:$24 sps:$4 sm:$0xff]   ;;  %v6235_v6 = vld [vmem:[%s7087_s18 + $0xd84] ss:$24 sps:$4 sm:$0xff]  }
  0xc3   : > { %4158 = vmatprep.subr.bf16.mxu1 %v6148_v7  ;;  %v6238_v7 = vld [vmem:[%s7087_s18 + $0x1084] ss:$24 sps:$4 sm:$0xff]  }
  0xc4   : > { %4062 = vmatmul.mubr.bf16.vlgmr.msra.gmra.mxu0 %v6137_v8  ;;  %v6233_v8 = vld [vmem:[%s7087_s18 + $0xd80] ss:$24 sps:$4 sm:$0xff]  }
  0xc5   : > { %4105 = vmatmul.mubr.bf16.vlgmr.msra.gmra.mxu1 %v6140_v9  ;;  %4116 = vmatpush1.bf16.msra.mxu0 %v6143_v10  ;;  %v6236_v9 = vld [vmem:[%s7087_s18 + $0x1080] ss:$24 sps:$4 sm:$0xff]   ;;  %v6247_v10 = vld [vmem:[%s7087_s18 + $0x1234] ss:$24 sps:$4 sm:$0xff]  }
  0xc6   : > { %4159 = vmatpush1.bf16.msra.mxu1 %v6146_v11  ;;  %4117 = vmatprep.subr.bf16.mxu0 %v6151_v12  ;;  %v6250_v11 = vld [vmem:[%s7087_s18 + $0x15c] ss:$24 sps:$4 sm:$0xff]  }
  0xc7   : > { %4160 = vmatprep.subr.bf16.mxu1 %v6154_v13  ;;  %4147 = vmatprep.mubr.bf16.mxu0 %v6241_v19  ;;  %v6239_v12 = vld [vmem:[#allocation4 + $0x20] ss:$52 sps:$4 sm:$0xff]   ;;  %v6242_v13 = vld [vmem:[#allocation4 + $0x28] ss:$52 sps:$4 sm:$0xff]  }
  0xc8   : > { %4190 = vmatprep.mubr.bf16.mxu1 %v6244_v21  ;;  %v6254_v19 = vld [vmem:[%s7087_s18 + $0x128] ss:$24 sps:$4 sm:$0xff]   ;;  %v6263_v21 = vld [vmem:[%s7087_s18 + $0x45c] ss:$24 sps:$4 sm:$0xff]  }
  0xc9   : > { %4118 = vmatpush1.bf16.msra.mxu0 %v6149_v14  ;;  %v6245_v14 = vld [vmem:[%s7087_s18 + $0x1230] ss:$24 sps:$4 sm:$0xff]  }
  0xca   : > { %4161 = vmatpush1.bf16.msra.mxu1 %v6152_v15  ;;  %4119 = vmatprep.subr.bf16.mxu0 %v6157_v16  ;;  %v6248_v15 = vld [vmem:[%s7087_s18 + $0x158] ss:$24 sps:$4 sm:$0xff]   ;;  %v6253_v16 = vld [vmem:[%s7087_s18 + $0x1204] ss:$24 sps:$4 sm:$0xff]  }
  0xcb   : > { %4162 = vmatprep.subr.bf16.mxu1 %v6160_v17  ;;  %v6256_v17 = vld [vmem:[%s7087_s18 + $0x12c] ss:$24 sps:$4 sm:$0xff]  }
  0xcd   : > { %4120 = vmatpush1.bf16.msra.mxu0 %v6155_v18  ;;  %v6251_v18 = vld [vmem:[%s7087_s18 + $0x1200] ss:$24 sps:$4 sm:$0xff]  }
  0xce   : > { %4163 = vmatpush1.bf16.msra.mxu1 %v6158_v20  ;;  %4121 = vmatprep.subr.bf16.mxu0 %v6163_v22  ;;  %v6260_v20 = vld [vmem:[%s7087_s18 + $0xfc] ss:$24 sps:$4 sm:$0xff]   ;;  %v6961_v22 = vmov 0  }
  0xcf   : > { %4164 = vmatprep.subr.bf16.mxu1 %v6166_v23  ;;  %v6840_v23 = vld [vmem:[#allocation4 + $0x4] ss:$52 sps:$4 sm:$0xff]  }
  0xd1   : > { %4122 = vmatpush1.bf16.msra.mxu0 %v6161_v24  ;;  %v6257_v24 = vld [vmem:[#allocation4 + $0x30] ss:$52 sps:$4 sm:$0xff]  }
  0xd2   : > { %4165 = vmatpush1.bf16.msra.mxu1 %v6164_v25  ;;  %4123 = vmatprep.subr.bf16.mxu0 %v6169_v26  ;;  %v6258_v25 = vld [vmem:[%s7087_s18 + $0xf8] ss:$24 sps:$4 sm:$0xff]  }
  0xd3   : > { %4166 = vmatprep.subr.bf16.mxu1 %v6172_v27  ;;  %v6261_v26 = vld [vmem:[%s7087_s18 + $0x458] ss:$24 sps:$4 sm:$0xff]   ;;  %v6266_v27 = vld [vmem:[%s7087_s18 + $0xcc] ss:$24 sps:$4 sm:$0xff]  }
  0xd5   : > { %4124 = vmatpush1.bf16.msra.mxu0 %v6167_v28  ;;  %v6269_v28 = vld [vmem:[%s7087_s18 + $0x42c] ss:$24 sps:$4 sm:$0xff]  }
  0xd6   : > { %4167 = vmatpush1.bf16.msra.mxu1 %v6170_v29  ;;  %4125 = vmatprep.subr.bf16.mxu0 %v6175_v30  ;;  %v6264_v29 = vld [vmem:[%s7087_s18 + $0xc8] ss:$24 sps:$4 sm:$0xff]  }
  0xd7   : > { %4168 = vmatprep.subr.bf16.mxu1 %v6178_v31  ;;  %v6267_v30 = vld [vmem:[%s7087_s18 + $0x428] ss:$24 sps:$4 sm:$0xff]   ;;  %v6272_v31 = vld [vmem:[%s7087_s18 + $0x9c] ss:$24 sps:$4 sm:$0xff]  }
  0xd9   : > { %4126 = vmatpush1.bf16.msra.mxu0 %v6173_v32  ;;  %v6275_v32 = vld [vmem:[%s7087_s18 + $0x3fc] ss:$24 sps:$4 sm:$0xff]  }
  0xda   : > { %4169 = vmatpush1.bf16.msra.mxu1 %v6176_v33  ;;  %4127 = vmatprep.subr.bf16.mxu0 %v6181_v34  ;;  %v6841_v33 = vld [vmem:[#allocation4 + $0xc] ss:$52 sps:$4 sm:$0xff]   ;;  %v6270_v34 = vld [vmem:[%s7087_s18 + $0x98] ss:$24 sps:$4 sm:$0xff]  }
  0xdb   : > { %4170 = vmatprep.subr.bf16.mxu1 %v6184_v35  ;;  %v6273_v35 = vld [vmem:[%s7087_s18 + $0x3f8] ss:$24 sps:$4 sm:$0xff]  }
  0xdd   : > { %4128 = vmatpush1.bf16.msra.mxu0 %v6179_v36  ;;  %v6278_v36 = vld [vmem:[%s7087_s18 + $0x6c] ss:$24 sps:$4 sm:$0xff]  }
  0xde   : > { %4171 = vmatpush1.bf16.msra.mxu1 %v6182_v37  ;;  %4129 = vmatprep.subr.bf16.mxu0 %v6187_v38  ;;  %v6281_v37 = vld [vmem:[%s7087_s18 + $0x3cc] ss:$24 sps:$4 sm:$0xff]   ;;  %v6276_v38 = vld [vmem:[%s7087_s18 + $0x68] ss:$24 sps:$4 sm:$0xff]  }
  0xdf   : > { %4172 = vmatprep.subr.bf16.mxu1 %v6190_v39  ;;  %v6279_v39 = vld [vmem:[%s7087_s18 + $0x3c8] ss:$24 sps:$4 sm:$0xff]  }
  0xe1   : > { %4130 = vmatpush1.bf16.msra.mxu0 %v6185_v40  ;;  %v6284_v40 = vld [vmem:[%s7087_s18 + $0x3c] ss:$24 sps:$4 sm:$0xff]  }
  0xe2   : > { %4173 = vmatpush1.bf16.msra.mxu1 %v6188_v41  ;;  %4131 = vmatprep.subr.bf16.mxu0 %v6193_v42  ;;  %v6287_v41 = vld [vmem:[%s7087_s18 + $0x39c] ss:$24 sps:$4 sm:$0xff]   ;;  %v6282_v42 = vld [vmem:[%s7087_s18 + $0x38] ss:$24 sps:$4 sm:$0xff]  }
  0xe3   : > { %4174 = vmatprep.subr.bf16.mxu1 %v6196_v43  ;;  %v6285_v43 = vld [vmem:[%s7087_s18 + $0x398] ss:$24 sps:$4 sm:$0xff]  }
  0xe5   : > { %4132 = vmatpush2.bf16.msra.mxu0 %v6191_v44  ;;  %v6290_v44 = vld [vmem:[%s7087_s18 + $0xc] ss:$24 sps:$4 sm:$0xff]  }
  0xe6   : > { %4175 = vmatpush2.bf16.msra.mxu1 %v6194_v45  ;;  %4133 = vmatprep.subr.bf16.mxu0 %v6199_v46  ;;  %v6293_v45 = vld [vmem:[%s7087_s18 + $0x36c] ss:$24 sps:$4 sm:$0xff]   ;;  %v6288_v46 = vld [vmem:[%s7087_s18 + $0x8] ss:$24 sps:$4 sm:$0xff]  }
  0xe7   : > { %4176 = vmatprep.subr.bf16.mxu1 %v6202_v47  ;;  %v6291_v47 = vld [vmem:[%s7087_s18 + $0x368] ss:$24 sps:$4 sm:$0xff]  }
  0xe9   : > { %4134 = vmatpush2.bf16.msra.mxu0 %v6197_v48  ;;  %v6296_v48 = vld [vmem:[%s7087_s18 + $0x2dc] ss:$24 sps:$4 sm:$0xff]  }
  0xea   : > { %4177 = vmatpush2.bf16.msra.mxu1 %v6200_v49  ;;  %4135 = vmatprep.subr.bf16.mxu0 %v6205_v50  ;;  %v6299_v49 = vld [vmem:[%s7087_s18 + $0x33c] ss:$24 sps:$4 sm:$0xff]   ;;  %v6294_v50 = vld [vmem:[%s7087_s18 + $0x2d8] ss:$24 sps:$4 sm:$0xff]  }
  0xeb   : > { %4178 = vmatprep.subr.bf16.mxu1 %v6208_v51  ;;  %v6297_v51 = vld [vmem:[%s7087_s18 + $0x338] ss:$24 sps:$4 sm:$0xff]  }
  0xed   : > { %4136 = vmatpush2.bf16.msra.mxu0 %v6203_v52  ;;  %v6302_v52 = vld [vmem:[%s7087_s18 + $0x2ac] ss:$24 sps:$4 sm:$0xff]  }
  0xee   : > { %4179 = vmatpush2.bf16.msra.mxu1 %v6206_v53  ;;  %4137 = vmatprep.subr.bf16.mxu0 %v6211_v54  ;;  %v6305_v53 = vld [vmem:[%s7087_s18 + $0x30c] ss:$24 sps:$4 sm:$0xff]   ;;  %v6300_v54 = vld [vmem:[%s7087_s18 + $0x2a8] ss:$24 sps:$4 sm:$0xff]  }
  0xef   : > { %4180 = vmatprep.subr.bf16.mxu1 %v6214_v55  ;;  %v6303_v55 = vld [vmem:[%s7087_s18 + $0x308] ss:$24 sps:$4 sm:$0xff]  }
  0xf1   : > { %4138 = vmatpush2.bf16.msra.mxu0 %v6209_v56  ;;  %v6308_v56 = vld [vmem:[%s7087_s18 + $0x27c] ss:$24 sps:$4 sm:$0xff]  }
  0xf2   : > { %4181 = vmatpush2.bf16.msra.mxu1 %v6212_v57  ;;  %4139 = vmatprep.subr.bf16.mxu0 %v6217_v58  ;;  %v6311_v57 = vld [vmem:[%s7087_s18 + $0x5dc] ss:$24 sps:$4 sm:$0xff]   ;;  %v6306_v58 = vld [vmem:[%s7087_s18 + $0x278] ss:$24 sps:$4 sm:$0xff]  }
  0xf3   : > { %4182 = vmatprep.subr.bf16.mxu1 %v6220_v59  ;;  %v6309_v59 = vld [vmem:[%s7087_s18 + $0x5d8] ss:$24 sps:$4 sm:$0xff]  }
  0xf5   : > { %4140 = vmatpush2.bf16.msra.mxu0 %v6215_v60  ;;  %v6314_v60 = vld [vmem:[%s7087_s18 + $0x24c] ss:$24 sps:$4 sm:$0xff]  }
  0xf6   : > { %4183 = vmatpush2.bf16.msra.mxu1 %v6218_v61  ;;  %4141 = vmatprep.subr.bf16.mxu0 %v6223_v62  ;;  %v6317_v61 = vld [vmem:[%s7087_s18 + $0x5ac] ss:$24 sps:$4 sm:$0xff]   ;;  %v6312_v62 = vld [vmem:[%s7087_s18 + $0x248] ss:$24 sps:$4 sm:$0xff]  }
  0xf7   : > { %4184 = vmatprep.subr.bf16.mxu1 %v6226_v63  ;;  %v6315_v63 = vld [vmem:[%s7087_s18 + $0x5a8] ss:$24 sps:$4 sm:$0xff]  }
  0xf9   : > { %4142 = vmatpush2.bf16.msra.mxu0 %v6221_v0  ;;  %v6320_v0 = vld [vmem:[%s7087_s18 + $0x21c] ss:$24 sps:$4 sm:$0xff]  }
  0xfa   : > { %4185 = vmatpush2.bf16.msra.mxu1 %v6224_v1  ;;  %4143 = vmatprep.subr.bf16.mxu0 %v6229_v2  ;;  %v6323_v1 = vld [vmem:[%s7087_s18 + $0x57c] ss:$24 sps:$4 sm:$0xff]   ;;  %v6318_v2 = vld [vmem:[%s7087_s18 + $0x218] ss:$24 sps:$4 sm:$0xff]  }
  0xfb   : > { %4186 = vmatprep.subr.bf16.mxu1 %v6232_v3  ;;  %v6321_v3 = vld [vmem:[%s7087_s18 + $0x578] ss:$24 sps:$4 sm:$0xff]  }
  0xfd   : > { %4144 = vmatpush2.bf16.msra.mxu0 %v6227_v4  ;;  %v6326_v4 = vld [vmem:[%s7087_s18 + $0x1ec] ss:$24 sps:$4 sm:$0xff]  }
  0xfe   : > { %4187 = vmatpush2.bf16.msra.mxu1 %v6230_v5  ;;  %4145 = vmatprep.subr.bf16.mxu0 %v6235_v6  ;;  %v6329_v5 = vld [vmem:[%s7087_s18 + $0x54c] ss:$24 sps:$4 sm:$0xff]   ;;  %v6324_v6 = vld [vmem:[%s7087_s18 + $0x1e8] ss:$24 sps:$4 sm:$0xff]  }
  0xff   : > { %4188 = vmatprep.subr.bf16.mxu1 %v6238_v7  ;;  %v6327_v7 = vld [vmem:[%s7087_s18 + $0x548] ss:$24 sps:$4 sm:$0xff]  }
 0x101   : > { %4146 = vmatpush2.bf16.msra.mxu0 %v6233_v8  ;;  %v6332_v8 = vld [vmem:[%s7087_s18 + $0x1bc] ss:$24 sps:$4 sm:$0xff]  }
 0x102   : > { %4189 = vmatpush2.bf16.msra.mxu1 %v6236_v9  ;;  %4213 = vmatprep.subr.bf16.mxu0 %v6247_v10  ;;  %v6335_v9 = vld [vmem:[%s7087_s18 + $0x51c] ss:$24 sps:$4 sm:$0xff]   ;;  %v6330_v10 = vld [vmem:[%s7087_s18 + $0x1b8] ss:$24 sps:$4 sm:$0xff]  }
 0x103   : > { %4244 = vmatprep.subr.bf16.mxu1 %v6250_v11  ;;  %v6333_v11 = vld [vmem:[%s7087_s18 + $0x518] ss:$24 sps:$4 sm:$0xff]  }
 0x104   : > { %4148 = vmatmul.mubr.bf16.vlgmr.msra.gmra.mxu0 %v6239_v12  ;;  %v6338_v12 = vld [vmem:[%s7087_s18 + $0x18c] ss:$24 sps:$4 sm:$0xff]  }
 0x105   : > { %4191 = vmatmul.mubr.bf16.vlgmr.msra.gmra.mxu1 %v6242_v13  ;;  %4214 = vmatpush1.bf16.msra.mxu0 %v6245_v14  ;;  %v6341_v13 = vld [vmem:[%s7087_s18 + $0x4ec] ss:$24 sps:$4 sm:$0xff]   ;;  %v6336_v14 = vld [vmem:[%s7087_s18 + $0x188] ss:$24 sps:$4 sm:$0xff]  }
 0x106   : > { %4245 = vmatpush1.bf16.msra.mxu1 %v6248_v15  ;;  %4215 = vmatprep.subr.bf16.mxu0 %v6253_v16  ;;  %v6339_v15 = vld [vmem:[%s7087_s18 + $0x4e8] ss:$24 sps:$4 sm:$0xff]   ;;  %v6344_v16 = vld [vmem:[%s7087_s18 + $0x4bc] ss:$24 sps:$4 sm:$0xff]  }
 0x107   : > { %4246 = vmatprep.subr.bf16.mxu1 %v6256_v17  ;;  %4233 = vmatprep.mubr.bf16.mxu0 %v6961_v22  ;;  %v6347_v17 = vld [vmem:[%s7087_s18 + $0x75c] ss:$24 sps:$4 sm:$0xff]  }
 0x108   : > { %4276 = vmatprep.mubr.bf16.mxu1 %v6840_v23  ;;  %v6842_v23 = vld [vmem:[#allocation4] ss:$52 sps:$4 sm:$0xff]  }
 0x109   : > { %4216 = vmatpush1.bf16.msra.mxu0 %v6251_v18  ;;  %v6342_v18 = vld [vmem:[%s7087_s18 + $0x4b8] ss:$24 sps:$4 sm:$0xff]  }
 0x10a   : > { %4247 = vmatpush1.bf16.msra.mxu1 %v6254_v19  ;;  %4287 = vmatprep.subr.bf16.mxu0 %v6263_v21  ;;  %v6345_v19 = vld [vmem:[%s7087_s18 + $0x758] ss:$24 sps:$4 sm:$0xff]   ;;  %v6353_v21 = vld [vmem:[%s7087_s18 + $0x72c] ss:$24 sps:$4 sm:$0xff]  }
 0x10b   : > { %4248 = vmatprep.subr.bf16.mxu1 %v6260_v20  ;;  %v6350_v20 = vld [vmem:[%s7087_s18 + $0x48c] ss:$24 sps:$4 sm:$0xff]  }
 0x10c   : > { %5761 = vmatmul.mubr.msk.bf16.vlgmr.msra.gmra.mxu0 %vm3939_vm0, %v6257_v24  ;;  %v6348_v24 = vld [vmem:[%s7087_s18 + $0x488] ss:$24 sps:$4 sm:$0xff]  }
 0x10d   : > { %4288 = vmatpush1.bf16.msra.mxu0 %v6261_v26  ;;  %4319 = vmatprep.mubr.bf16.mxu0 %v6841_v33  ;;  %v6356_v26 = vld [vmem:[%s7087_s18 + $0x6fc] ss:$24 sps:$4 sm:$0xff]  }
 0x10e   : > { %4249 = vmatpush1.bf16.msra.mxu1 %v6258_v25  ;;  %4289 = vmatprep.subr.bf16.mxu0 %v6269_v28  ;;  %v6351_v25 = vld [vmem:[%s7087_s18 + $0x728] ss:$24 sps:$4 sm:$0xff]  }
 0x10f   : > { %4250 = vmatprep.subr.bf16.mxu1 %v6266_v27  ;;  %v6359_v27 = vld [vmem:[%s7087_s18 + $0xa5c] ss:$24 sps:$4 sm:$0xff]  }
 0x110   : > { %v6843_v28 = vld [vmem:[#allocation4 + $0x14] ss:$52 sps:$4 sm:$0xff]  }
 0x111   : > { %4290 = vmatpush1.bf16.msra.mxu0 %v6267_v30  ;;  %v6357_v30 = vld [vmem:[%s7087_s18 + $0xa58] ss:$24 sps:$4 sm:$0xff]   ;;  %v6844_v33 = vld [vmem:[#allocation4 + $0x8] ss:$52 sps:$4 sm:$0xff]  }
 0x112   : > { %4251 = vmatpush1.bf16.msra.mxu1 %v6264_v29  ;;  %4291 = vmatprep.subr.bf16.mxu0 %v6275_v32  ;;  %v6354_v29 = vld [vmem:[%s7087_s18 + $0x6f8] ss:$24 sps:$4 sm:$0xff]   ;;  %v6365_v32 = vld [vmem:[%s7087_s18 + $0xa2c] ss:$24 sps:$4 sm:$0xff]  }
 0x113   : > { %4252 = vmatprep.subr.bf16.mxu1 %v6272_v31  ;;  %v6362_v31 = vld [vmem:[%s7087_s18 + $0x6cc] ss:$24 sps:$4 sm:$0xff]  }
 0x115   : > { %4292 = vmatpush1.bf16.msra.mxu0 %v6273_v35  ;;  %v6363_v35 = vld [vmem:[%s7087_s18 + $0xa28] ss:$24 sps:$4 sm:$0xff]  }
 0x116   : > { %4253 = vmatpush1.bf16.msra.mxu1 %v6270_v34  ;;  %4293 = vmatprep.subr.bf16.mxu0 %v6281_v37  ;;  %v6360_v34 = vld [vmem:[%s7087_s18 + $0x6c8] ss:$24 sps:$4 sm:$0xff]   ;;  %v6371_v37 = vld [vmem:[%s7087_s18 + $0x9fc] ss:$24 sps:$4 sm:$0xff]  }
 0x117   : > { %4254 = vmatprep.subr.bf16.mxu1 %v6278_v36  ;;  %v6368_v36 = vld [vmem:[%s7087_s18 + $0x69c] ss:$24 sps:$4 sm:$0xff]  }
 0x119   : > { %4294 = vmatpush1.bf16.msra.mxu0 %v6279_v39  ;;  %v6366_v39 = vld [vmem:[%s7087_s18 + $0x698] ss:$24 sps:$4 sm:$0xff]  }
 0x11a   : > { %4255 = vmatpush1.bf16.msra.mxu1 %v6276_v38  ;;  %4295 = vmatprep.subr.bf16.mxu0 %v6287_v41  ;;  %v6845_v38 = vld [vmem:[#allocation4 + $0x1c] ss:$52 sps:$4 sm:$0xff]   ;;  %v6374_v41 = vld [vmem:[%s7087_s18 + $0x66c] ss:$24 sps:$4 sm:$0xff]  }
 0x11b   : > { %4256 = vmatprep.subr.bf16.mxu1 %v6284_v40  ;;  %v6369_v40 = vld [vmem:[%s7087_s18 + $0x9f8] ss:$24 sps:$4 sm:$0xff]  }
 0x11d   : > { %4296 = vmatpush1.bf16.msra.mxu0 %v6285_v43  ;;  %v6372_v43 = vld [vmem:[%s7087_s18 + $0x668] ss:$24 sps:$4 sm:$0xff]  }
 0x11e   : > { %4257 = vmatpush1.bf16.msra.mxu1 %v6282_v42  ;;  %4297 = vmatprep.subr.bf16.mxu0 %v6293_v45  ;;  %v6377_v42 = vld [vmem:[%s7087_s18 + $0x9cc] ss:$24 sps:$4 sm:$0xff]   ;;  %v6380_v45 = vld [vmem:[%s7087_s18 + $0x63c] ss:$24 sps:$4 sm:$0xff]  }
 0x11f   : > { %4258 = vmatprep.subr.bf16.mxu1 %v6290_v44  ;;  %v6375_v44 = vld [vmem:[%s7087_s18 + $0x9c8] ss:$24 sps:$4 sm:$0xff]  }
 0x121   : > { %4298 = vmatpush1.bf16.msra.mxu0 %v6291_v47  ;;  %v6378_v47 = vld [vmem:[%s7087_s18 + $0x638] ss:$24 sps:$4 sm:$0xff]  }
 0x122   : > { %4259 = vmatpush1.bf16.msra.mxu1 %v6288_v46  ;;  %4299 = vmatprep.subr.bf16.mxu0 %v6299_v49  ;;  %v6383_v46 = vld [vmem:[%s7087_s18 + $0x99c] ss:$24 sps:$4 sm:$0xff]   ;;  %v6386_v49 = vld [vmem:[%s7087_s18 + $0x60c] ss:$24 sps:$4 sm:$0xff]  }
 0x123   : > { %4260 = vmatprep.subr.bf16.mxu1 %v6296_v48  ;;  %v6381_v48 = vld [vmem:[%s7087_s18 + $0x998] ss:$24 sps:$4 sm:$0xff]  }
 0x125   : > { %4300 = vmatpush1.bf16.msra.mxu0 %v6297_v51  ;;  %v6384_v51 = vld [vmem:[%s7087_s18 + $0x608] ss:$24 sps:$4 sm:$0xff]  }
 0x126   : > { %4261 = vmatpush2.bf16.msra.mxu1 %v6294_v50  ;;  %4301 = vmatprep.subr.bf16.mxu0 %v6305_v53  ;;  %v6389_v50 = vld [vmem:[%s7087_s18 + $0x96c] ss:$24 sps:$4 sm:$0xff]   ;;  %v6392_v53 = vld [vmem:[%s7087_s18 + $0x8dc] ss:$24 sps:$4 sm:$0xff]  }
 0x127   : > { %4262 = vmatprep.subr.bf16.mxu1 %v6302_v52  ;;  %v6387_v52 = vld [vmem:[%s7087_s18 + $0x968] ss:$24 sps:$4 sm:$0xff]  }
 0x129   : > { %4302 = vmatpush1.bf16.msra.mxu0 %v6303_v55  ;;  %v6390_v55 = vld [vmem:[%s7087_s18 + $0x8d8] ss:$24 sps:$4 sm:$0xff]  }
 0x12a   : > { %4263 = vmatpush2.bf16.msra.mxu1 %v6300_v54  ;;  %4303 = vmatprep.subr.bf16.mxu0 %v6311_v57  ;;  %v6395_v54 = vld [vmem:[%s7087_s18 + $0x93c] ss:$24 sps:$4 sm:$0xff]   ;;  %v6398_v57 = vld [vmem:[%s7087_s18 + $0x8ac] ss:$24 sps:$4 sm:$0xff]  }
 0x12b   : > { %4264 = vmatprep.subr.bf16.mxu1 %v6308_v56  ;;  %v6393_v56 = vld [vmem:[%s7087_s18 + $0x938] ss:$24 sps:$4 sm:$0xff]  }
 0x12d   : > { %4304 = vmatpush2.bf16.msra.mxu0 %v6309_v59  ;;  %v6396_v59 = vld [vmem:[%s7087_s18 + $0x8a8] ss:$24 sps:$4 sm:$0xff]  }
 0x12e   : > { %4265 = vmatpush2.bf16.msra.mxu1 %v6306_v58  ;;  %4305 = vmatprep.subr.bf16.mxu0 %v6317_v61  ;;  %v6401_v58 = vld [vmem:[%s7087_s18 + $0x90c] ss:$24 sps:$4 sm:$0xff]   ;;  %v6404_v61 = vld [vmem:[%s7087_s18 + $0x87c] ss:$24 sps:$4 sm:$0xff]  }
 0x12f   : > { %4266 = vmatprep.subr.bf16.mxu1 %v6314_v60  ;;  %v6399_v60 = vld [vmem:[%s7087_s18 + $0x908] ss:$24 sps:$4 sm:$0xff]  }
 0x131   : > { %4306 = vmatpush2.bf16.msra.mxu0 %v6315_v63  ;;  %v6402_v63 = vld [vmem:[%s7087_s18 + $0x878] ss:$24 sps:$4 sm:$0xff]  }
 0x132   : > { %4267 = vmatpush2.bf16.msra.mxu1 %v6312_v62  ;;  %4307 = vmatprep.subr.bf16.mxu0 %v6323_v1  ;;  %v6407_v62 = vld [vmem:[%s7087_s18 + $0xbdc] ss:$24 sps:$4 sm:$0xff]   ;;  %v6410_v1 = vld [vmem:[%s7087_s18 + $0x84c] ss:$24 sps:$4 sm:$0xff]  }
 0x133   : > { %4268 = vmatprep.subr.bf16.mxu1 %v6320_v0  ;;  %v6405_v0 = vld [vmem:[%s7087_s18 + $0xbd8] ss:$24 sps:$4 sm:$0xff]  }
 0x135   : > { %4308 = vmatpush2.bf16.msra.mxu0 %v6321_v3  ;;  %v6408_v3 = vld [vmem:[%s7087_s18 + $0x848] ss:$24 sps:$4 sm:$0xff]  }
 0x136   : > { %4269 = vmatpush2.bf16.msra.mxu1 %v6318_v2  ;;  %4309 = vmatprep.subr.bf16.mxu0 %v6329_v5  ;;  %v6413_v2 = vld [vmem:[%s7087_s18 + $0xbac] ss:$24 sps:$4 sm:$0xff]   ;;  %v6416_v5 = vld [vmem:[%s7087_s18 + $0x81c] ss:$24 sps:$4 sm:$0xff]  }
 0x137   : > { %4270 = vmatprep.subr.bf16.mxu1 %v6326_v4  ;;  %v6411_v4 = vld [vmem:[%s7087_s18 + $0xba8] ss:$24 sps:$4 sm:$0xff]  }
 0x139   : > { %4310 = vmatpush2.bf16.msra.mxu0 %v6327_v7  ;;  %v6414_v7 = vld [vmem:[%s7087_s18 + $0x818] ss:$24 sps:$4 sm:$0xff]  }
 0x13a   : > { %4271 = vmatpush2.bf16.msra.mxu1 %v6324_v6  ;;  %4311 = vmatprep.subr.bf16.mxu0 %v6335_v9  ;;  %v6419_v6 = vld [vmem:[%s7087_s18 + $0xb7c] ss:$24 sps:$4 sm:$0xff]   ;;  %v6422_v9 = vld [vmem:[%s7087_s18 + $0x7ec] ss:$24 sps:$4 sm:$0xff]  }
 0x13b   : > { %4272 = vmatprep.subr.bf16.mxu1 %v6332_v8  ;;  %v6417_v8 = vld [vmem:[%s7087_s18 + $0xb78] ss:$24 sps:$4 sm:$0xff]  }
 0x13d   : > { %4312 = vmatpush2.bf16.msra.mxu0 %v6333_v11  ;;  %v6420_v11 = vld [vmem:[%s7087_s18 + $0x7e8] ss:$24 sps:$4 sm:$0xff]  }
 0x13e   : > { %4273 = vmatpush2.bf16.msra.mxu1 %v6330_v10  ;;  %4313 = vmatprep.subr.bf16.mxu0 %v6341_v13  ;;  %v6425_v10 = vld [vmem:[%s7087_s18 + $0xb4c] ss:$24 sps:$4 sm:$0xff]   ;;  %v6428_v13 = vld [vmem:[%s7087_s18 + $0x7bc] ss:$24 sps:$4 sm:$0xff]  }
 0x13f   : > { %4274 = vmatprep.subr.bf16.mxu1 %v6338_v12  ;;  %v6423_v12 = vld [vmem:[%s7087_s18 + $0xb48] ss:$24 sps:$4 sm:$0xff]  }
 0x141   : > { %4314 = vmatpush2.bf16.msra.mxu0 %v6339_v15  ;;  %v6426_v15 = vld [vmem:[%s7087_s18 + $0x7b8] ss:$24 sps:$4 sm:$0xff]  }
 0x142   : > { %4275 = vmatpush2.bf16.msra.mxu1 %v6336_v14  ;;  %4315 = vmatprep.subr.bf16.mxu0 %v6344_v16  ;;  %v6431_v14 = vld [vmem:[%s7087_s18 + $0xb1c] ss:$24 sps:$4 sm:$0xff]   ;;  %v6429_v16 = vld [vmem:[%s7087_s18 + $0xb18] ss:$24 sps:$4 sm:$0xff]  }
 0x143   : > { %4330 = vmatprep.subr.bf16.mxu1 %v6347_v17  ;;  %v6434_v17 = vld [vmem:[%s7087_s18 + $0x78c] ss:$24 sps:$4 sm:$0xff]  }
 0x145   : > { %4277 = vmatmul.mubr.bf16.vlgmr.msra.gmra.mxu1 %v6842_v23  ;;  %4316 = vmatpush2.bf16.msra.mxu0 %v6342_v18  ;;  %v6437_v18 = vld [vmem:[%s7087_s18 + $0xaec] ss:$24 sps:$4 sm:$0xff]   ;;  %v6443_v23 = vld [vmem:[%s7087_s18 + $0xd5c] ss:$24 sps:$4 sm:$0xff]  }
 0x146   : > { %4331 = vmatpush1.bf16.msra.mxu1 %v6345_v19  ;;  %4317 = vmatprep.subr.bf16.mxu0 %v6350_v20  ;;  %v6432_v19 = vld [vmem:[%s7087_s18 + $0x788] ss:$24 sps:$4 sm:$0xff]  }
 0x147   : > { %4332 = vmatprep.subr.bf16.mxu1 %v6353_v21  ;;  %4362 = vmatprep.mubr.bf16.mxu1 %v6843_v28  ;;  %v6435_v20 = vld [vmem:[%s7087_s18 + $0xae8] ss:$24 sps:$4 sm:$0xff]   ;;  %v6440_v21 = vld [vmem:[%s7087_s18 + $0xabc] ss:$24 sps:$4 sm:$0xff]   ;;  %v6846_v28 = vld [vmem:[#allocation4 + $0x10] ss:$52 sps:$4 sm:$0xff]  }
 0x149   : > { %4318 = vmatpush2.bf16.msra.mxu0 %v6348_v24  ;;  %v6438_v24 = vld [vmem:[%s7087_s18 + $0xab8] ss:$24 sps:$4 sm:$0xff]  }
 0x14a   : > { %4333 = vmatpush1.bf16.msra.mxu1 %v6351_v25  ;;  %4373 = vmatprep.subr.bf16.mxu0 %v6359_v27  ;;  %v6441_v25 = vld [vmem:[%s7087_s18 + $0xd58] ss:$24 sps:$4 sm:$0xff]   ;;  %v6449_v27 = vld [vmem:[%s7087_s18 + $0xd2c] ss:$24 sps:$4 sm:$0xff]  }
 0x14b   : > { %4334 = vmatprep.subr.bf16.mxu1 %v6356_v26  ;;  %v6446_v26 = vld [vmem:[%s7087_s18 + $0xa8c] ss:$24 sps:$4 sm:$0xff]  }
 0x14c   : > { %4320 = vmatmul.mubr.bf16.vlgmr.msra.gmra.mxu0 %v6844_v33  ;;  %v6450_v33 = vld [vmem:[%s7087_s18 + $0xcf8] ss:$24 sps:$4 sm:$0xff]  }
 0x14d   : > { %4374 = vmatpush1.bf16.msra.mxu0 %v6357_v30  ;;  %4405 = vmatprep.mubr.bf16.mxu0 %v6845_v38  ;;  %v6447_v30 = vld [vmem:[%s7087_s18 + $0xd28] ss:$24 sps:$4 sm:$0xff]  }
 0x14e   : > { %4335 = vmatpush1.bf16.msra.mxu1 %v6354_v29  ;;  %4375 = vmatprep.subr.bf16.mxu0 %v6365_v32  ;;  %v6444_v29 = vld [vmem:[%s7087_s18 + $0xa88] ss:$24 sps:$4 sm:$0xff]   ;;  %v6455_v32 = vld [vmem:[%s7087_s18 + $0x105c] ss:$24 sps:$4 sm:$0xff]  }
 0x14f   : > { %4336 = vmatprep.subr.bf16.mxu1 %v6362_v31  ;;  %v6452_v31 = vld [vmem:[%s7087_s18 + $0xcfc] ss:$24 sps:$4 sm:$0xff]   ;;  %v6456_v38 = vld [vmem:[%s7087_s18 + $0xcc8] ss:$24 sps:$4 sm:$0xff]  }
 0x151   : > { %4376 = vmatpush1.bf16.msra.mxu0 %v6363_v35  ;;  %v6847_v35 = vld [vmem:[#allocation4 + $0x24] ss:$52 sps:$4 sm:$0xff]  }
 0x152   : > { %4337 = vmatpush1.bf16.msra.mxu1 %v6360_v34  ;;  %4377 = vmatprep.subr.bf16.mxu0 %v6371_v37  ;;  %v6453_v34 = vld [vmem:[%s7087_s18 + $0x1058] ss:$24 sps:$4 sm:$0xff]   ;;  %v6461_v37 = vld [vmem:[%s7087_s18 + $0x102c] ss:$24 sps:$4 sm:$0xff]  }
 0x153   : > { %4338 = vmatprep.subr.bf16.mxu1 %v6368_v36  ;;  %v6458_v36 = vld [vmem:[%s7087_s18 + $0xccc] ss:$24 sps:$4 sm:$0xff]  }
 0x155   : > { %4378 = vmatpush1.bf16.msra.mxu0 %v6369_v40  ;;  %v7435_v40 = vld [vmem:[#allocation4 + $0x18] ss:$52 sps:$4 sm:$0xff]  }
 0x156   : > { %4339 = vmatpush1.bf16.msra.mxu1 %v6366_v39  ;;  %4379 = vmatprep.subr.bf16.mxu0 %v6377_v42  ;;  %v6459_v39 = vld [vmem:[%s7087_s18 + $0x1028] ss:$24 sps:$4 sm:$0xff]   ;;  %v6467_v42 = vld [vmem:[%s7087_s18 + $0xffc] ss:$24 sps:$4 sm:$0xff]  }
 0x157   : > { %4340 = vmatprep.subr.bf16.mxu1 %v6374_v41  ;;  %v6464_v41 = vld [vmem:[%s7087_s18 + $0xc9c] ss:$24 sps:$4 sm:$0xff]  }
 0x159   : > { %4380 = vmatpush1.bf16.msra.mxu0 %v6375_v44  ;;  %v6465_v44 = vld [vmem:[%s7087_s18 + $0xff8] ss:$24 sps:$4 sm:$0xff]  }
 0x15a   : > { %4341 = vmatpush1.bf16.msra.mxu1 %v6372_v43  ;;  %4381 = vmatprep.subr.bf16.mxu0 %v6383_v46  ;;  %v6462_v43 = vld [vmem:[%s7087_s18 + $0xc98] ss:$24 sps:$4 sm:$0xff]   ;;  %v6470_v46 = vld [vmem:[%s7087_s18 + $0xc6c] ss:$24 sps:$4 sm:$0xff]  }
 0x15b   : > { %4342 = vmatprep.subr.bf16.mxu1 %v6380_v45  ;;  %v7442_v45 = vld [vmem:[#allocation4 + $0x2c] ss:$52 sps:$4 sm:$0xff]  }
 0x15d   : > { %4382 = vmatpush1.bf16.msra.mxu0 %v6381_v48  ;;  %v6468_v48 = vld [vmem:[%s7087_s18 + $0xc68] ss:$24 sps:$4 sm:$0xff]  }
 0x15e   : > { %4343 = vmatpush1.bf16.msra.mxu1 %v6378_v47  ;;  %4383 = vmatprep.subr.bf16.mxu0 %v6389_v50  ;;  %v6473_v47 = vld [vmem:[%s7087_s18 + $0xfcc] ss:$24 sps:$4 sm:$0xff]   ;;  %v6476_v50 = vld [vmem:[%s7087_s18 + $0xc3c] ss:$24 sps:$4 sm:$0xff]  }
 0x15f   : > { %4344 = vmatprep.subr.bf16.mxu1 %v6386_v49  ;;  %v6471_v49 = vld [vmem:[%s7087_s18 + $0xfc8] ss:$24 sps:$4 sm:$0xff]  }
 0x161   : > { %4384 = vmatpush1.bf16.msra.mxu0 %v6387_v52  ;;  %v6474_v52 = vld [vmem:[%s7087_s18 + $0xc38] ss:$24 sps:$4 sm:$0xff]  }
 0x162   : > { %4345 = vmatpush1.bf16.msra.mxu1 %v6384_v51  ;;  %4385 = vmatprep.subr.bf16.mxu0 %v6395_v54  ;;  %v6479_v51 = vld [vmem:[%s7087_s18 + $0xf9c] ss:$24 sps:$4 sm:$0xff]   ;;  %v6482_v54 = vld [vmem:[%s7087_s18 + $0xc0c] ss:$24 sps:$4 sm:$0xff]  }
 0x163   : > { %4346 = vmatprep.subr.bf16.mxu1 %v6392_v53  ;;  %v6477_v53 = vld [vmem:[%s7087_s18 + $0xf98] ss:$24 sps:$4 sm:$0xff]  }
 0x165   : > { %4386 = vmatpush1.bf16.msra.mxu0 %v6393_v56  ;;  %v6480_v56 = vld [vmem:[%s7087_s18 + $0xc08] ss:$24 sps:$4 sm:$0xff]  }
 0x166   : > { %4347 = vmatpush2.bf16.msra.mxu1 %v6390_v55  ;;  %4387 = vmatprep.subr.bf16.mxu0 %v6401_v58  ;;  %v6485_v55 = vld [vmem:[%s7087_s18 + $0xf6c] ss:$24 sps:$4 sm:$0xff]   ;;  %v6488_v58 = vld [vmem:[%s7087_s18 + $0xedc] ss:$24 sps:$4 sm:$0xff]  }
 0x167   : > { %4348 = vmatprep.subr.bf16.mxu1 %v6398_v57  ;;  %v6483_v57 = vld [vmem:[%s7087_s18 + $0xf68] ss:$24 sps:$4 sm:$0xff]  }
 0x169   : > { %4388 = vmatpush1.bf16.msra.mxu0 %v6399_v60  ;;  %v6486_v60 = vld [vmem:[%s7087_s18 + $0xed8] ss:$24 sps:$4 sm:$0xff]  }
 0x16a   : > { %4349 = vmatpush2.bf16.msra.mxu1 %v6396_v59  ;;  %4389 = vmatprep.subr.bf16.mxu0 %v6407_v62  ;;  %v6491_v59 = vld [vmem:[%s7087_s18 + $0xf3c] ss:$24 sps:$4 sm:$0xff]   ;;  %v6494_v62 = vld [vmem:[%s7087_s18 + $0xeac] ss:$24 sps:$4 sm:$0xff]  }
 0x16b   : > { %4350 = vmatprep.subr.bf16.mxu1 %v6404_v61  ;;  %v6489_v61 = vld [vmem:[%s7087_s18 + $0xf38] ss:$24 sps:$4 sm:$0xff]  }
 0x16d   : > { %4390 = vmatpush2.bf16.msra.mxu0 %v6405_v0  ;;  %v6492_v0 = vld [vmem:[%s7087_s18 + $0xea8] ss:$24 sps:$4 sm:$0xff]  }
 0x16e   : > { %4351 = vmatpush2.bf16.msra.mxu1 %v6402_v63  ;;  %4391 = vmatprep.subr.bf16.mxu0 %v6413_v2  ;;  %v6497_v63 = vld [vmem:[%s7087_s18 + $0xf0c] ss:$24 sps:$4 sm:$0xff]   ;;  %v6500_v2 = vld [vmem:[%s7087_s18 + $0xe7c] ss:$24 sps:$4 sm:$0xff]  }
 0x16f   : > { %4352 = vmatprep.subr.bf16.mxu1 %v6410_v1  ;;  %v6495_v1 = vld [vmem:[%s7087_s18 + $0xf08] ss:$24 sps:$4 sm:$0xff]  }
 0x171   : > { %4392 = vmatpush2.bf16.msra.mxu0 %v6411_v4  ;;  %v6498_v4 = vld [vmem:[%s7087_s18 + $0xe78] ss:$24 sps:$4 sm:$0xff]  }
 0x172   : > { %4353 = vmatpush2.bf16.msra.mxu1 %v6408_v3  ;;  %4393 = vmatprep.subr.bf16.mxu0 %v6419_v6  ;;  %v6503_v3 = vld [vmem:[%s7087_s18 + $0x11dc] ss:$24 sps:$4 sm:$0xff]   ;;  %v6506_v6 = vld [vmem:[%s7087_s18 + $0xe4c] ss:$24 sps:$4 sm:$0xff]  }
 0x173   : > { %4354 = vmatprep.subr.bf16.mxu1 %v6416_v5  ;;  %v6501_v5 = vld [vmem:[%s7087_s18 + $0x11d8] ss:$24 sps:$4 sm:$0xff]  }
 0x175   : > { %4394 = vmatpush2.bf16.msra.mxu0 %v6417_v8  ;;  %v6504_v8 = vld [vmem:[%s7087_s18 + $0xe48] ss:$24 sps:$4 sm:$0xff]  }
 0x176   : > { %4355 = vmatpush2.bf16.msra.mxu1 %v6414_v7  ;;  %4395 = vmatprep.subr.bf16.mxu0 %v6425_v10  ;;  %v6509_v7 = vld [vmem:[%s7087_s18 + $0x11ac] ss:$24 sps:$4 sm:$0xff]   ;;  %v6512_v10 = vld [vmem:[%s7087_s18 + $0xe1c] ss:$24 sps:$4 sm:$0xff]  }
 0x177   : > { %4356 = vmatprep.subr.bf16.mxu1 %v6422_v9  ;;  %v6507_v9 = vld [vmem:[%s7087_s18 + $0x11a8] ss:$24 sps:$4 sm:$0xff]  }
 0x179   : > { %4396 = vmatpush2.bf16.msra.mxu0 %v6423_v12  ;;  %v6510_v12 = vld [vmem:[%s7087_s18 + $0xe18] ss:$24 sps:$4 sm:$0xff]  }
 0x17a   : > { %4357 = vmatpush2.bf16.msra.mxu1 %v6420_v11  ;;  %4397 = vmatprep.subr.bf16.mxu0 %v6431_v14  ;;  %v6515_v11 = vld [vmem:[%s7087_s18 + $0x117c] ss:$24 sps:$4 sm:$0xff]   ;;  %v6518_v14 = vld [vmem:[%s7087_s18 + $0xdec] ss:$24 sps:$4 sm:$0xff]  }
 0x17b   : > { %4358 = vmatprep.subr.bf16.mxu1 %v6428_v13  ;;  %v6513_v13 = vld [vmem:[%s7087_s18 + $0x1178] ss:$24 sps:$4 sm:$0xff]  }
 0x17d   : > { %4398 = vmatpush2.bf16.msra.mxu0 %v6429_v16  ;;  %v6516_v16 = vld [vmem:[%s7087_s18 + $0xde8] ss:$24 sps:$4 sm:$0xff]  }
 0x17e   : > { %4359 = vmatpush2.bf16.msra.mxu1 %v6426_v15  ;;  %4399 = vmatprep.subr.bf16.mxu0 %v6437_v18  ;;  %v6521_v15 = vld [vmem:[%s7087_s18 + $0x114c] ss:$24 sps:$4 sm:$0xff]   ;;  %v6524_v18 = vld [vmem:[%s7087_s18 + $0xdbc] ss:$24 sps:$4 sm:$0xff]  }
 0x17f   : > { %4360 = vmatprep.subr.bf16.mxu1 %v6434_v17  ;;  %v6519_v17 = vld [vmem:[%s7087_s18 + $0x1148] ss:$24 sps:$4 sm:$0xff]  }
 0x181   : > { %4400 = vmatpush2.bf16.msra.mxu0 %v6435_v20  ;;  %v6522_v20 = vld [vmem:[%s7087_s18 + $0xdb8] ss:$24 sps:$4 sm:$0xff]  }
 0x182   : > { %4361 = vmatpush2.bf16.msra.mxu1 %v6432_v19  ;;  %4401 = vmatprep.subr.bf16.mxu0 %v6440_v21  ;;  %v6527_v19 = vld [vmem:[%s7087_s18 + $0x111c] ss:$24 sps:$4 sm:$0xff]   ;;  %v6525_v21 = vld [vmem:[%s7087_s18 + $0x1118] ss:$24 sps:$4 sm:$0xff]  }
 0x183   : > { %4416 = vmatprep.subr.bf16.mxu1 %v6443_v23  ;;  %v6530_v23 = vld [vmem:[%s7087_s18 + $0xd8c] ss:$24 sps:$4 sm:$0xff]  }
 0x185   : > { %4363 = vmatmul.mubr.bf16.vlgmr.msra.gmra.mxu1 %v6846_v28  ;;  %4402 = vmatpush2.bf16.msra.mxu0 %v6438_v24  ;;  %v6533_v24 = vld [vmem:[%s7087_s18 + $0x10ec] ss:$24 sps:$4 sm:$0xff]  }
 0x186   : > { %4417 = vmatpush1.bf16.msra.mxu1 %v6441_v25  ;;  %4403 = vmatprep.subr.bf16.mxu0 %v6446_v26  ;;  %v6528_v25 = vld [vmem:[%s7087_s18 + $0xd88] ss:$24 sps:$4 sm:$0xff]   ;;  %v6539_v28 = vld [vmem:[%s7087_s18 + $0x464] ss:$24 sps:$4 sm:$0xff]  }
 0x187   : > { %4418 = vmatprep.subr.bf16.mxu1 %v6449_v27  ;;  %4448 = vmatprep.mubr.bf16.mxu1 %v6847_v35  ;;  %v6531_v26 = vld [vmem:[%s7087_s18 + $0x10e8] ss:$24 sps:$4 sm:$0xff]   ;;  %v6536_v27 = vld [vmem:[%s7087_s18 + $0x10bc] ss:$24 sps:$4 sm:$0xff]  }
 0x188   : > { %v6543_v35 = vld [vmem:[%s7087_s18 + $0x430] ss:$24 sps:$4 sm:$0xff]  }
 0x189   : > { %4404 = vmatpush2.bf16.msra.mxu0 %v6444_v29  ;;  %v6534_v29 = vld [vmem:[%s7087_s18 + $0x10b8] ss:$24 sps:$4 sm:$0xff]  }
 0x18a   : > { %4419 = vmatpush1.bf16.msra.mxu1 %v6447_v30  ;;  %4459 = vmatprep.subr.bf16.mxu0 %v6455_v32  ;;  %v6537_v30 = vld [vmem:[%s7087_s18 + $0x460] ss:$24 sps:$4 sm:$0xff]   ;;  %v6545_v32 = vld [vmem:[%s7087_s18 + $0x434] ss:$24 sps:$4 sm:$0xff]  }
 0x18b   : > { %4420 = vmatprep.subr.bf16.mxu1 %v6452_v31  ;;  %v6542_v31 = vld [vmem:[%s7087_s18 + $0x108c] ss:$24 sps:$4 sm:$0xff]  }
 0x18c   : > { %4406 = vmatmul.mubr.bf16.vlgmr.msra.gmra.mxu0 %v7435_v40 }
 0x18d   : > { %4460 = vmatpush1.bf16.msra.mxu0 %v6453_v34  ;;  %4491 = vmatprep.mubr.bf16.mxu0 %v7442_v45  ;;  %v6540_v34 = vld [vmem:[%s7087_s18 + $0x1088] ss:$24 sps:$4 sm:$0xff]  }
 0x18e   : > { %4421 = vmatpush1.bf16.msra.mxu1 %v6450_v33  ;;  %4461 = vmatprep.subr.bf16.mxu0 %v6461_v37  ;;  %v7495_v33 = vld [vmem:[#allocation4 + $0x20] ss:$52 sps:$4 sm:$0xff]   ;;  %v6551_v37 = vld [vmem:[%s7087_s18 + $0x404] ss:$24 sps:$4 sm:$0xff]  }
 0x18f   : > { %4422 = vmatprep.subr.bf16.mxu1 %v6458_v36  ;;  %v6548_v36 = vld [vmem:[%s7087_s18 + $0x123c] ss:$24 sps:$4 sm:$0xff]  }
 0x191   : > { %4462 = vmatpush1.bf16.msra.mxu0 %v6459_v39  ;;  %v6546_v39 = vld [vmem:[%s7087_s18 + $0x1238] ss:$24 sps:$4 sm:$0xff]  }
 0x192   : > { %4423 = vmatpush1.bf16.msra.mxu1 %v6456_v38  ;;  %4463 = vmatprep.subr.bf16.mxu0 %v6467_v42  ;;  %v6851_v38 = vld [vmem:[#allocation4 + $0xc] ss:$52 sps:$4 sm:$0xff]  }
 0x193   : > { %4424 = vmatprep.subr.bf16.mxu1 %v6464_v41  ;;  %v6549_v41 = vld [vmem:[%s7087_s18 + $0x400] ss:$24 sps:$4 sm:$0xff]   ;;  %v6554_v42 = vld [vmem:[%s7087_s18 + $0x120c] ss:$24 sps:$4 sm:$0xff]  }
 0x195   : > { %4464 = vmatpush1.bf16.msra.mxu0 %v6465_v44  ;;  %v7506_v44 = vld [vmem:[#allocation4 + $0x28] ss:$52 sps:$4 sm:$0xff]  }
 0x196   : > { %4425 = vmatpush1.bf16.msra.mxu1 %v6462_v43  ;;  %4465 = vmatprep.subr.bf16.mxu0 %v6473_v47  ;;  %v6557_v43 = vld [vmem:[%s7087_s18 + $0x3d4] ss:$24 sps:$4 sm:$0xff]   ;;  %v6555_v47 = vld [vmem:[%s7087_s18 + $0x3d0] ss:$24 sps:$4 sm:$0xff]  }
 0x197   : > { %4426 = vmatprep.subr.bf16.mxu1 %v6470_v46  ;;  %v6552_v46 = vld [vmem:[%s7087_s18 + $0x1208] ss:$24 sps:$4 sm:$0xff]  }
 0x199   : > { %4466 = vmatpush1.bf16.msra.mxu0 %v6471_v49  ;;  %v6563_v49 = vld [vmem:[%s7087_s18 + $0x3a4] ss:$24 sps:$4 sm:$0xff]  }
 0x19a   : > { %4427 = vmatpush1.bf16.msra.mxu1 %v6468_v48  ;;  %4467 = vmatprep.subr.bf16.mxu0 %v6479_v51  ;;  %v6560_v48 = vld [vmem:[%s7087_s18 + $0x164] ss:$24 sps:$4 sm:$0xff]   ;;  %v6561_v51 = vld [vmem:[%s7087_s18 + $0x3a0] ss:$24 sps:$4 sm:$0xff]  }
 0x19b   : > { %4428 = vmatprep.subr.bf16.mxu1 %v6476_v50  ;;  %v6558_v50 = vld [vmem:[%s7087_s18 + $0x160] ss:$24 sps:$4 sm:$0xff]  }
 0x19d   : > { %4468 = vmatpush1.bf16.msra.mxu0 %v6477_v53  ;;  %v6569_v53 = vld [vmem:[%s7087_s18 + $0x374] ss:$24 sps:$4 sm:$0xff]  }
 0x19e   : > { %4429 = vmatpush1.bf16.msra.mxu1 %v6474_v52  ;;  %4469 = vmatprep.subr.bf16.mxu0 %v6485_v55  ;;  %v6566_v52 = vld [vmem:[%s7087_s18 + $0x134] ss:$24 sps:$4 sm:$0xff]   ;;  %v6564_v55 = vld [vmem:[%s7087_s18 + $0x130] ss:$24 sps:$4 sm:$0xff]  }
 0x19f   : > { %4430 = vmatprep.subr.bf16.mxu1 %v6482_v54  ;;  %v7518_v54 = vld [vmem:[#allocation4 + $0x30] ss:$52 sps:$4 sm:$0xff]  }
 0x1a1   : > { %4470 = vmatpush1.bf16.msra.mxu0 %v6483_v57  ;;  %v6572_v57 = vld [vmem:[%s7087_s18 + $0x104] ss:$24 sps:$4 sm:$0xff]  }
 0x1a2   : > { %4431 = vmatpush1.bf16.msra.mxu1 %v6480_v56  ;;  %4471 = vmatprep.subr.bf16.mxu0 %v6491_v59  ;;  %v6567_v56 = vld [vmem:[%s7087_s18 + $0x370] ss:$24 sps:$4 sm:$0xff]   ;;  %v6854_v59 = vld [vmem:[#allocation4 + $0x4] ss:$52 sps:$4 sm:$0xff]  }
 0x1a3   : > { %4432 = vmatprep.subr.bf16.mxu1 %v6488_v58  ;;  %v6575_v58 = vld [vmem:[%s7087_s18 + $0x344] ss:$24 sps:$4 sm:$0xff]  }
 0x1a5   : > { %4472 = vmatpush1.bf16.msra.mxu0 %v6489_v61  ;;  %v6573_v61 = vld [vmem:[%s7087_s18 + $0x340] ss:$24 sps:$4 sm:$0xff]  }
 0x1a6   : > { %4433 = vmatpush2.bf16.msra.mxu1 %v6486_v60  ;;  %4473 = vmatprep.subr.bf16.mxu0 %v6497_v63  ;;  %v6570_v60 = vld [vmem:[%s7087_s18 + $0x100] ss:$24 sps:$4 sm:$0xff]   ;;  %v6581_v63 = vld [vmem:[%s7087_s18 + $0x314] ss:$24 sps:$4 sm:$0xff]  }
 0x1a7   : > { %4434 = vmatprep.subr.bf16.mxu1 %v6494_v62  ;;  %v6578_v62 = vld [vmem:[%s7087_s18 + $0xd4] ss:$24 sps:$4 sm:$0xff]  }
 0x1a9   : > { %4474 = vmatpush1.bf16.msra.mxu0 %v6495_v1  ;;  %v6579_v1 = vld [vmem:[%s7087_s18 + $0x310] ss:$24 sps:$4 sm:$0xff]  }
 0x1aa   : > { %4435 = vmatpush2.bf16.msra.mxu1 %v6492_v0  ;;  %4475 = vmatprep.subr.bf16.mxu0 %v6503_v3  ;;  %v6576_v0 = vld [vmem:[%s7087_s18 + $0xd0] ss:$24 sps:$4 sm:$0xff]   ;;  %v6587_v3 = vld [vmem:[%s7087_s18 + $0x5e4] ss:$24 sps:$4 sm:$0xff]  }
 0x1ab   : > { %4436 = vmatprep.subr.bf16.mxu1 %v6500_v2  ;;  %v6584_v2 = vld [vmem:[%s7087_s18 + $0xa4] ss:$24 sps:$4 sm:$0xff]  }
 0x1ad   : > { %4476 = vmatpush2.bf16.msra.mxu0 %v6501_v5  ;;  %v6585_v5 = vld [vmem:[%s7087_s18 + $0x5e0] ss:$24 sps:$4 sm:$0xff]  }
 0x1ae   : > { %4437 = vmatpush2.bf16.msra.mxu1 %v6498_v4  ;;  %4477 = vmatprep.subr.bf16.mxu0 %v6509_v7  ;;  %v6582_v4 = vld [vmem:[%s7087_s18 + $0xa0] ss:$24 sps:$4 sm:$0xff]   ;;  %v6593_v7 = vld [vmem:[%s7087_s18 + $0x5b4] ss:$24 sps:$4 sm:$0xff]  }
 0x1af   : > { %4438 = vmatprep.subr.bf16.mxu1 %v6506_v6  ;;  %v6590_v6 = vld [vmem:[%s7087_s18 + $0x74] ss:$24 sps:$4 sm:$0xff]  }
 0x1b1   : > { %4478 = vmatpush2.bf16.msra.mxu0 %v6507_v9  ;;  %v6591_v9 = vld [vmem:[%s7087_s18 + $0x5b0] ss:$24 sps:$4 sm:$0xff]  }
 0x1b2   : > { %4439 = vmatpush2.bf16.msra.mxu1 %v6504_v8  ;;  %4479 = vmatprep.subr.bf16.mxu0 %v6515_v11  ;;  %v6588_v8 = vld [vmem:[%s7087_s18 + $0x70] ss:$24 sps:$4 sm:$0xff]   ;;  %v6599_v11 = vld [vmem:[%s7087_s18 + $0x584] ss:$24 sps:$4 sm:$0xff]  }
 0x1b3   : > { %4440 = vmatprep.subr.bf16.mxu1 %v6512_v10  ;;  %v6596_v10 = vld [vmem:[%s7087_s18 + $0x44] ss:$24 sps:$4 sm:$0xff]  }
 0x1b5   : > { %4480 = vmatpush2.bf16.msra.mxu0 %v6513_v13  ;;  %v6597_v13 = vld [vmem:[%s7087_s18 + $0x580] ss:$24 sps:$4 sm:$0xff]  }
 0x1b6   : > { %4441 = vmatpush2.bf16.msra.mxu1 %v6510_v12  ;;  %4481 = vmatprep.subr.bf16.mxu0 %v6521_v15  ;;  %v6594_v12 = vld [vmem:[%s7087_s18 + $0x40] ss:$24 sps:$4 sm:$0xff]   ;;  %v6605_v15 = vld [vmem:[%s7087_s18 + $0x554] ss:$24 sps:$4 sm:$0xff]  }
 0x1b7   : > { %4442 = vmatprep.subr.bf16.mxu1 %v6518_v14  ;;  %v6602_v14 = vld [vmem:[%s7087_s18 + $0x14] ss:$24 sps:$4 sm:$0xff]  }
 0x1b9   : > { %4482 = vmatpush2.bf16.msra.mxu0 %v6519_v17  ;;  %v6603_v17 = vld [vmem:[%s7087_s18 + $0x550] ss:$24 sps:$4 sm:$0xff]  }
 0x1ba   : > { %4443 = vmatpush2.bf16.msra.mxu1 %v6516_v16  ;;  %4483 = vmatprep.subr.bf16.mxu0 %v6527_v19  ;;  %v6600_v16 = vld [vmem:[%s7087_s18 + $0x10] ss:$24 sps:$4 sm:$0xff]   ;;  %v6611_v19 = vld [vmem:[%s7087_s18 + $0x524] ss:$24 sps:$4 sm:$0xff]  }
 0x1bb   : > { %4444 = vmatprep.subr.bf16.mxu1 %v6524_v18  ;;  %v6608_v18 = vld [vmem:[%s7087_s18 + $0x2e4] ss:$24 sps:$4 sm:$0xff]  }
 0x1bd   : > { %4484 = vmatpush2.bf16.msra.mxu0 %v6525_v21  ;;  %v6609_v21 = vld [vmem:[%s7087_s18 + $0x520] ss:$24 sps:$4 sm:$0xff]  }
 0x1be   : > { %4445 = vmatpush2.bf16.msra.mxu1 %v6522_v20  ;;  %4485 = vmatprep.subr.bf16.mxu0 %v6533_v24  ;;  %v6606_v20 = vld [vmem:[%s7087_s18 + $0x2e0] ss:$24 sps:$4 sm:$0xff]   ;;  %v6617_v24 = vld [vmem:[%s7087_s18 + $0x4f4] ss:$24 sps:$4 sm:$0xff]  }
 0x1bf   : > { %4446 = vmatprep.subr.bf16.mxu1 %v6530_v23  ;;  %v6614_v23 = vld [vmem:[%s7087_s18 + $0x2b4] ss:$24 sps:$4 sm:$0xff]  }
 0x1c1   : > { %4486 = vmatpush2.bf16.msra.mxu0 %v6531_v26  ;;  %v6615_v26 = vld [vmem:[%s7087_s18 + $0x4f0] ss:$24 sps:$4 sm:$0xff]  }
 0x1c2   : > { %4447 = vmatpush2.bf16.msra.mxu1 %v6528_v25  ;;  %4487 = vmatprep.subr.bf16.mxu0 %v6536_v27  ;;  %v6612_v25 = vld [vmem:[%s7087_s18 + $0x2b0] ss:$24 sps:$4 sm:$0xff]   ;;  %v6620_v27 = vld [vmem:[%s7087_s18 + $0x284] ss:$24 sps:$4 sm:$0xff]  }
 0x1c3   : > { %4588 = vmatprep.subr.bf16.mxu1 %v6539_v28  ;;  %v6623_v28 = vld [vmem:[%s7087_s18 + $0x4c4] ss:$24 sps:$4 sm:$0xff]  }
 0x1c5   : > { %4449 = vmatmul.mubr.bf16.vlgmr.msra.gmra.mxu1 %v7495_v33  ;;  %4488 = vmatpush2.bf16.msra.mxu0 %v6534_v29  ;;  %v6618_v29 = vld [vmem:[%s7087_s18 + $0x280] ss:$24 sps:$4 sm:$0xff]  }
 0x1c6   : > { %4589 = vmatpush1.bf16.msra.mxu1 %v6537_v30  ;;  %4489 = vmatprep.subr.bf16.mxu0 %v6542_v31  ;;  %v6621_v30 = vld [vmem:[%s7087_s18 + $0x4c0] ss:$24 sps:$4 sm:$0xff]   ;;  %v6626_v31 = vld [vmem:[%s7087_s18 + $0x254] ss:$24 sps:$4 sm:$0xff]  }
 0x1c7   : > { %4590 = vmatprep.subr.bf16.mxu1 %v6545_v32  ;;  %4620 = vmatprep.mubr.bf16.mxu1 %v6851_v38  ;;  %v6629_v32 = vld [vmem:[%s7087_s18 + $0x494] ss:$24 sps:$4 sm:$0xff]   ;;  %v6630_v38 = vld [vmem:[%s7087_s18 + $0x220] ss:$24 sps:$4 sm:$0xff]  }
 0x1c9   : > { %4490 = vmatpush2.bf16.msra.mxu0 %v6540_v34  ;;  %v6624_v34 = vld [vmem:[%s7087_s18 + $0x250] ss:$24 sps:$4 sm:$0xff]  }
 0x1ca   : > { %4591 = vmatpush1.bf16.msra.mxu1 %v6543_v35  ;;  %4514 = vmatprep.subr.bf16.mxu0 %v6548_v36  ;;  %v6627_v35 = vld [vmem:[%s7087_s18 + $0x490] ss:$24 sps:$4 sm:$0xff]   ;;  %v6632_v36 = vld [vmem:[%s7087_s18 + $0x224] ss:$24 sps:$4 sm:$0xff]  }
 0x1cb   : > { %4592 = vmatprep.subr.bf16.mxu1 %v6551_v37  ;;  %v6635_v37 = vld [vmem:[%s7087_s18 + $0xa64] ss:$24 sps:$4 sm:$0xff]  }
 0x1cc   : > { %4492 = vmatmul.mubr.bf16.vlgmr.msra.gmra.mxu0 %v7506_v44 }
 0x1cd   : > { %4515 = vmatpush1.bf16.msra.mxu0 %v6546_v39  ;;  %4534 = vmatprep.mubr.bf16.mxu0 %v6961_v22  ;;  %v6633_v39 = vld [vmem:[%s7087_s18 + $0xa60] ss:$24 sps:$4 sm:$0xff]  }
 0x1ce   : > { %4593 = vmatpush1.bf16.msra.mxu1 %v6549_v41  ;;  %4516 = vmatprep.subr.bf16.mxu0 %v6554_v42  ;;  %v6638_v41 = vld [vmem:[%s7087_s18 + $0x1f4] ss:$24 sps:$4 sm:$0xff]  }
 0x1cf   : > { %4594 = vmatprep.subr.bf16.mxu1 %v6557_v43  ;;  %v6641_v42 = vld [vmem:[%s7087_s18 + $0xa34] ss:$24 sps:$4 sm:$0xff]   ;;  %v6855_v43 = vld [vmem:[#allocation4 + $0x8] ss:$52 sps:$4 sm:$0xff]  }
 0x1d1   : > { %4517 = vmatpush1.bf16.msra.mxu0 %v6552_v46  ;;  %v6636_v46 = vld [vmem:[%s7087_s18 + $0x1f0] ss:$24 sps:$4 sm:$0xff]  }
 0x1d2   : > { %4595 = vmatpush1.bf16.msra.mxu1 %v6555_v47  ;;  %4545 = vmatprep.subr.bf16.mxu0 %v6560_v48  ;;  %v6639_v47 = vld [vmem:[%s7087_s18 + $0xa30] ss:$24 sps:$4 sm:$0xff]   ;;  %v6644_v48 = vld [vmem:[%s7087_s18 + $0x1c4] ss:$24 sps:$4 sm:$0xff]  }
 0x1d3   : > { %4596 = vmatprep.subr.bf16.mxu1 %v6563_v49  ;;  %v6647_v49 = vld [vmem:[%s7087_s18 + $0xa04] ss:$24 sps:$4 sm:$0xff]  }
 0x1d4   : > { %5762 = vmatmul.mubr.msk.bf16.vlgmr.msra.gmra.mxu0 %vm3939_vm0, %v7518_v54 }
 0x1d5   : > { %4546 = vmatpush1.bf16.msra.mxu0 %v6558_v50  ;;  %4577 = vmatprep.mubr.bf16.mxu0 %v6854_v59  ;;  %v6856_v50 = vld [vmem:[#allocation4 + $0x1c] ss:$52 sps:$4 sm:$0xff]  }
 0x1d6   : > { %4597 = vmatpush1.bf16.msra.mxu1 %v6561_v51  ;;  %4547 = vmatprep.subr.bf16.mxu0 %v6566_v52  ;;  %v6642_v51 = vld [vmem:[%s7087_s18 + $0x1c0] ss:$24 sps:$4 sm:$0xff]   ;;  %v6659_v59 = vld [vmem:[%s7087_s18 + $0x9a4] ss:$24 sps:$4 sm:$0xff]  }
 0x1d7   : > { %4598 = vmatprep.subr.bf16.mxu1 %v6569_v53  ;;  %v6645_v52 = vld [vmem:[%s7087_s18 + $0xa00] ss:$24 sps:$4 sm:$0xff]   ;;  %v6650_v53 = vld [vmem:[%s7087_s18 + $0x194] ss:$24 sps:$4 sm:$0xff]  }
 0x1d9   : > { %4548 = vmatpush1.bf16.msra.mxu0 %v6564_v55  ;;  %v6653_v55 = vld [vmem:[%s7087_s18 + $0x9d4] ss:$24 sps:$4 sm:$0xff]  }
 0x1da   : > { %4599 = vmatpush1.bf16.msra.mxu1 %v6567_v56  ;;  %4549 = vmatprep.subr.bf16.mxu0 %v6572_v57  ;;  %v6648_v56 = vld [vmem:[%s7087_s18 + $0x190] ss:$24 sps:$4 sm:$0xff]  }
 0x1db   : > { %4600 = vmatprep.subr.bf16.mxu1 %v6575_v58  ;;  %v6651_v57 = vld [vmem:[%s7087_s18 + $0x9d0] ss:$24 sps:$4 sm:$0xff]   ;;  %v6656_v58 = vld [vmem:[%s7087_s18 + $0x764] ss:$24 sps:$4 sm:$0xff]  }
 0x1dd   : > { %4550 = vmatpush1.bf16.msra.mxu0 %v6570_v60  ;;  %v6654_v60 = vld [vmem:[%s7087_s18 + $0x760] ss:$24 sps:$4 sm:$0xff]  }
 0x1de   : > { %4601 = vmatpush1.bf16.msra.mxu1 %v6573_v61  ;;  %4551 = vmatprep.subr.bf16.mxu0 %v6578_v62  ;;  %v6657_v61 = vld [vmem:[%s7087_s18 + $0x9a0] ss:$24 sps:$4 sm:$0xff]   ;;  %v6662_v62 = vld [vmem:[%s7087_s18 + $0x734] ss:$24 sps:$4 sm:$0xff]  }
 0x1df   : > { %4602 = vmatprep.subr.bf16.mxu1 %v6581_v63  ;;  %v6665_v63 = vld [vmem:[%s7087_s18 + $0x974] ss:$24 sps:$4 sm:$0xff]  }
 0x1e1   : > { %4552 = vmatpush1.bf16.msra.mxu0 %v6576_v0  ;;  %v6857_v0 = vld [vmem:[#allocation4] ss:$52 sps:$4 sm:$0xff]  }
 0x1e2   : > { %4603 = vmatpush1.bf16.msra.mxu1 %v6579_v1  ;;  %4553 = vmatprep.subr.bf16.mxu0 %v6584_v2  ;;  %v6660_v1 = vld [vmem:[%s7087_s18 + $0x730] ss:$24 sps:$4 sm:$0xff]  }
 0x1e3   : > { %4604 = vmatprep.subr.bf16.mxu1 %v6587_v3  ;;  %v6663_v2 = vld [vmem:[%s7087_s18 + $0x970] ss:$24 sps:$4 sm:$0xff]   ;;  %v6668_v3 = vld [vmem:[%s7087_s18 + $0x704] ss:$24 sps:$4 sm:$0xff]  }
 0x1e5   : > { %4554 = vmatpush1.bf16.msra.mxu0 %v6582_v4  ;;  %v6671_v4 = vld [vmem:[%s7087_s18 + $0x944] ss:$24 sps:$4 sm:$0xff]  }
 0x1e6   : > { %4605 = vmatpush2.bf16.msra.mxu1 %v6585_v5  ;;  %4555 = vmatprep.subr.bf16.mxu0 %v6590_v6  ;;  %v6858_v5 = vld [vmem:[#allocation4 + $0x14] ss:$52 sps:$4 sm:$0xff]   ;;  %v6666_v6 = vld [vmem:[%s7087_s18 + $0x700] ss:$24 sps:$4 sm:$0xff]  }
 0x1e7   : > { %4606 = vmatprep.subr.bf16.mxu1 %v6593_v7  ;;  %v6669_v7 = vld [vmem:[%s7087_s18 + $0x940] ss:$24 sps:$4 sm:$0xff]  }
 0x1e9   : > { %4556 = vmatpush1.bf16.msra.mxu0 %v6588_v8  ;;  %v6674_v8 = vld [vmem:[%s7087_s18 + $0x6d4] ss:$24 sps:$4 sm:$0xff]  }
 0x1ea   : > { %4607 = vmatpush2.bf16.msra.mxu1 %v6591_v9  ;;  %4557 = vmatprep.subr.bf16.mxu0 %v6596_v10  ;;  %v6677_v9 = vld [vmem:[%s7087_s18 + $0x914] ss:$24 sps:$4 sm:$0xff]   ;;  %v6672_v10 = vld [vmem:[%s7087_s18 + $0x6d0] ss:$24 sps:$4 sm:$0xff]  }
 0x1eb   : > { %4608 = vmatprep.subr.bf16.mxu1 %v6599_v11  ;;  %v6675_v11 = vld [vmem:[%s7087_s18 + $0x910] ss:$24 sps:$4 sm:$0xff]  }
 0x1ed   : > { %4558 = vmatpush1.bf16.msra.mxu0 %v6594_v12  ;;  %v6680_v12 = vld [vmem:[%s7087_s18 + $0x6a4] ss:$24 sps:$4 sm:$0xff]  }
 0x1ee   : > { %4609 = vmatpush2.bf16.msra.mxu1 %v6597_v13  ;;  %4559 = vmatprep.subr.bf16.mxu0 %v6602_v14  ;;  %v6683_v13 = vld [vmem:[%s7087_s18 + $0xbe4] ss:$24 sps:$4 sm:$0xff]   ;;  %v6678_v14 = vld [vmem:[%s7087_s18 + $0x6a0] ss:$24 sps:$4 sm:$0xff]  }
 0x1ef   : > { %4610 = vmatprep.subr.bf16.mxu1 %v6605_v15  ;;  %v6681_v15 = vld [vmem:[%s7087_s18 + $0xbe0] ss:$24 sps:$4 sm:$0xff]  }
 0x1f1   : > { %4560 = vmatpush1.bf16.msra.mxu0 %v6600_v16  ;;  %v6686_v16 = vld [vmem:[%s7087_s18 + $0x674] ss:$24 sps:$4 sm:$0xff]  }
 0x1f2   : > { %4611 = vmatpush2.bf16.msra.mxu1 %v6603_v17  ;;  %4561 = vmatprep.subr.bf16.mxu0 %v6608_v18  ;;  %v6689_v17 = vld [vmem:[%s7087_s18 + $0xbb4] ss:$24 sps:$4 sm:$0xff]   ;;  %v6684_v18 = vld [vmem:[%s7087_s18 + $0x670] ss:$24 sps:$4 sm:$0xff]  }
 0x1f3   : > { %4612 = vmatprep.subr.bf16.mxu1 %v6611_v19  ;;  %v6687_v19 = vld [vmem:[%s7087_s18 + $0xbb0] ss:$24 sps:$4 sm:$0xff]  }
 0x1f5   : > { %4562 = vmatpush2.bf16.msra.mxu0 %v6606_v20  ;;  %v6692_v20 = vld [vmem:[%s7087_s18 + $0x644] ss:$24 sps:$4 sm:$0xff]  }
 0x1f6   : > { %4613 = vmatpush2.bf16.msra.mxu1 %v6609_v21  ;;  %4563 = vmatprep.subr.bf16.mxu0 %v6614_v23  ;;  %v6695_v21 = vld [vmem:[%s7087_s18 + $0xb84] ss:$24 sps:$4 sm:$0xff]   ;;  %v6690_v23 = vld [vmem:[%s7087_s18 + $0x640] ss:$24 sps:$4 sm:$0xff]  }
 0x1f7   : > { %4614 = vmatprep.subr.bf16.mxu1 %v6617_v24  ;;  %v6693_v24 = vld [vmem:[%s7087_s18 + $0xb80] ss:$24 sps:$4 sm:$0xff]  }
 0x1f9   : > { %4564 = vmatpush2.bf16.msra.mxu0 %v6612_v25  ;;  %v6698_v25 = vld [vmem:[%s7087_s18 + $0x614] ss:$24 sps:$4 sm:$0xff]  }
 0x1fa   : > { %4615 = vmatpush2.bf16.msra.mxu1 %v6615_v26  ;;  %4565 = vmatprep.subr.bf16.mxu0 %v6620_v27  ;;  %v6701_v26 = vld [vmem:[%s7087_s18 + $0xb54] ss:$24 sps:$4 sm:$0xff]   ;;  %v6696_v27 = vld [vmem:[%s7087_s18 + $0x610] ss:$24 sps:$4 sm:$0xff]  }
 0x1fb   : > { %4616 = vmatprep.subr.bf16.mxu1 %v6623_v28  ;;  %v6699_v28 = vld [vmem:[%s7087_s18 + $0xb50] ss:$24 sps:$4 sm:$0xff]  }
 0x1fd   : > { %4566 = vmatpush2.bf16.msra.mxu0 %v6618_v29  ;;  %v6704_v29 = vld [vmem:[%s7087_s18 + $0x8e4] ss:$24 sps:$4 sm:$0xff]  }
 0x1fe   : > { %4617 = vmatpush2.bf16.msra.mxu1 %v6621_v30  ;;  %4567 = vmatprep.subr.bf16.mxu0 %v6626_v31  ;;  %v6707_v30 = vld [vmem:[%s7087_s18 + $0xb24] ss:$24 sps:$4 sm:$0xff]   ;;  %v6702_v31 = vld [vmem:[%s7087_s18 + $0x8e0] ss:$24 sps:$4 sm:$0xff]  }
 0x1ff   : > { %4618 = vmatprep.subr.bf16.mxu1 %v6629_v32  ;;  %v6705_v32 = vld [vmem:[%s7087_s18 + $0xb20] ss:$24 sps:$4 sm:$0xff]  }
 0x201   : > { %4568 = vmatpush2.bf16.msra.mxu0 %v6624_v34  ;;  %v6710_v34 = vld [vmem:[%s7087_s18 + $0x8b4] ss:$24 sps:$4 sm:$0xff]  }
 0x202   : > { %4619 = vmatpush2.bf16.msra.mxu1 %v6627_v35  ;;  %4569 = vmatprep.subr.bf16.mxu0 %v6632_v36  ;;  %v6713_v35 = vld [vmem:[%s7087_s18 + $0xaf4] ss:$24 sps:$4 sm:$0xff]   ;;  %v6708_v36 = vld [vmem:[%s7087_s18 + $0x8b0] ss:$24 sps:$4 sm:$0xff]  }
 0x203   : > { %4674 = vmatprep.subr.bf16.mxu1 %v6635_v37  ;;  %v6711_v37 = vld [vmem:[%s7087_s18 + $0xaf0] ss:$24 sps:$4 sm:$0xff]  }
 0x205   : > { %4621 = vmatmul.mubr.bf16.vlgmr.msra.gmra.mxu1 %v6855_v43  ;;  %4570 = vmatpush2.bf16.msra.mxu0 %v6630_v38  ;;  %v7620_v38 = vpop.f32.mrf.mxu0  ;;  %v6717_v43 = vld [vmem:[%s7087_s18 + $0xac0] ss:$24 sps:$4 sm:$0xff]  }
 0x206   : > { %4675 = vmatpush1.bf16.msra.mxu1 %v6633_v39  ;;  %4571 = vmatprep.subr.bf16.mxu0 %v6638_v41  ;;  %v6716_v39 = vld [vmem:[%s7087_s18 + $0x884] ss:$24 sps:$4 sm:$0xff]  }
 0x207   : > { %4676 = vmatprep.subr.bf16.mxu1 %v6641_v42  ;;  %4706 = vmatprep.mubr.bf16.mxu1 %v6856_v50  ;;  %v6719_v41 = vld [vmem:[%s7087_s18 + $0xac4] ss:$24 sps:$4 sm:$0xff]   ;;  %v6714_v42 = vld [vmem:[%s7087_s18 + $0x880] ss:$24 sps:$4 sm:$0xff]   ;;  %v6723_v50 = vld [vmem:[%s7087_s18 + $0xa90] ss:$24 sps:$4 sm:$0xff]  }
 0x209   : > { %4572 = vmatpush2.bf16.msra.mxu0 %v6636_v46  ;;  %v7626_v46 = vpop.f32.mrf.mxu0 }
 0x20a   : > { %4677 = vmatpush1.bf16.msra.mxu1 %v6639_v47  ;;  %4573 = vmatprep.subr.bf16.mxu0 %v6644_v48  ;;  %v6722_v47 = vld [vmem:[%s7087_s18 + $0x854] ss:$24 sps:$4 sm:$0xff]  }
 0x20b   : > { %4678 = vmatprep.subr.bf16.mxu1 %v6647_v49  ;;  %v6725_v48 = vld [vmem:[%s7087_s18 + $0xa94] ss:$24 sps:$4 sm:$0xff]   ;;  %v6720_v49 = vld [vmem:[%s7087_s18 + $0x850] ss:$24 sps:$4 sm:$0xff]  }
 0x20d   : > { %4574 = vmatpush2.bf16.msra.mxu0 %v6642_v51  ;;  %v7632_v51 = vpop.f32.mrf.mxu0 }
 0x20e   : > { %4679 = vmatpush1.bf16.msra.mxu1 %v6645_v52  ;;  %4575 = vmatprep.subr.bf16.mxu0 %v6650_v53  ;;  %v6728_v52 = vld [vmem:[%s7087_s18 + $0x824] ss:$24 sps:$4 sm:$0xff]  }
 0x20f   : > { %4680 = vmatprep.subr.bf16.mxu1 %v6653_v55  ;;  %v6731_v53 = vld [vmem:[%s7087_s18 + $0x1064] ss:$24 sps:$4 sm:$0xff]   ;;  %v6726_v55 = vld [vmem:[%s7087_s18 + $0x820] ss:$24 sps:$4 sm:$0xff]  }
 0x211   : > { %4576 = vmatpush2.bf16.msra.mxu0 %v6648_v56  ;;  %v6729_v56 = vld [vmem:[%s7087_s18 + $0x1060] ss:$24 sps:$4 sm:$0xff]  }
 0x212   : > { %4681 = vmatpush1.bf16.msra.mxu1 %v6651_v57  ;;  %4631 = vmatprep.subr.bf16.mxu0 %v6656_v58  ;;  %v7638_v57 = vpop.f32.mrf.mxu0  ;;  %v6734_v58 = vld [vmem:[%s7087_s18 + $0x7f4] ss:$24 sps:$4 sm:$0xff]  }
 0x213   : > { %4682 = vmatprep.subr.bf16.mxu1 %v6659_v59  ;;  %v6737_v59 = vld [vmem:[%s7087_s18 + $0x1034] ss:$24 sps:$4 sm:$0xff]  }
 0x214   : > { %4578 = vmatmul.mubr.bf16.vlgmr.msra.gmra.mxu0 %v6857_v0  ;;  %v6743_v0 = vld [vmem:[%s7087_s18 + $0x1004] ss:$24 sps:$4 sm:$0xff]  }
 0x215   : > { %4632 = vmatpush1.bf16.msra.mxu0 %v6654_v60  ;;  %4663 = vmatprep.mubr.bf16.mxu0 %v6858_v5  ;;  %v7642_v60 = vpop.f32.mrf.mxu0  ;;  %v7656_v5 = vpop.f32.mrf.mxu1 }
 0x216   : > { %4683 = vmatpush1.bf16.msra.mxu1 %v6657_v61  ;;  %4633 = vmatprep.subr.bf16.mxu0 %v6662_v62  ;;  %v6732_v61 = vld [vmem:[%s7087_s18 + $0x7f0] ss:$24 sps:$4 sm:$0xff]  }
 0x217   : > { %4684 = vmatprep.subr.bf16.mxu1 %v6665_v63  ;;  %v6735_v62 = vld [vmem:[%s7087_s18 + $0x1030] ss:$24 sps:$4 sm:$0xff]   ;;  %v6740_v63 = vld [vmem:[%s7087_s18 + $0x7c4] ss:$24 sps:$4 sm:$0xff]  }
 0x219   : > { %4634 = vmatpush1.bf16.msra.mxu0 %v6660_v1  ;;  %v7650_v1 = vpop.f32.mrf.mxu0 }
 0x21a   : > { %4685 = vmatpush1.bf16.msra.mxu1 %v6663_v2  ;;  %4635 = vmatprep.subr.bf16.mxu0 %v6668_v3  ;;  %v6741_v2 = vld [vmem:[%s7087_s18 + $0x1000] ss:$24 sps:$4 sm:$0xff]   ;;  %v6746_v3 = vld [vmem:[%s7087_s18 + $0x794] ss:$24 sps:$4 sm:$0xff]  }
 0x21b   : > { %4686 = vmatprep.subr.bf16.mxu1 %v6671_v4  ;;  %v6749_v4 = vld [vmem:[%s7087_s18 + $0xfd4] ss:$24 sps:$4 sm:$0xff]  }
 0x21d   : > { %4636 = vmatpush1.bf16.msra.mxu0 %v6666_v6  ;;  %v7658_v6 = vpop.f32.mrf.mxu0 }
 0x21e   : > { %4687 = vmatpush1.bf16.msra.mxu1 %v6669_v7  ;;  %4637 = vmatprep.subr.bf16.mxu0 %v6674_v8  ;;  %v6747_v7 = vld [vmem:[%s7087_s18 + $0xfd0] ss:$24 sps:$4 sm:$0xff]   ;;  %v6752_v8 = vld [vmem:[%s7087_s18 + $0xd64] ss:$24 sps:$4 sm:$0xff]  }
 0x21f   : > { %4688 = vmatprep.subr.bf16.mxu1 %v6677_v9  ;;  %v6755_v9 = vld [vmem:[%s7087_s18 + $0xfa4] ss:$24 sps:$4 sm:$0xff]  }
 0x221   : > { %4638 = vmatpush1.bf16.msra.mxu0 %v6672_v10  ;;  %v7664_v10 = vpop.f32.mrf.mxu1 }
 0x222   : > { %4689 = vmatpush1.bf16.msra.mxu1 %v6675_v11  ;;  %4639 = vmatprep.subr.bf16.mxu0 %v6680_v12  ;;  %v7666_v11 = vpop.f32.mrf.mxu0  ;;  %v6750_v12 = vld [vmem:[%s7087_s18 + $0xd60] ss:$24 sps:$4 sm:$0xff]  }
 0x223   : > { %4690 = vmatprep.subr.bf16.mxu1 %v6683_v13  ;;  %v6753_v13 = vld [vmem:[%s7087_s18 + $0xfa0] ss:$24 sps:$4 sm:$0xff]  }
 0x225   : > { %4640 = vmatpush1.bf16.msra.mxu0 %v6678_v14  ;;  %v7670_v14 = vpop.f32.mrf.mxu0 }
 0x226   : > { %4691 = vmatpush2.bf16.msra.mxu1 %v6681_v15  ;;  %4641 = vmatprep.subr.bf16.mxu0 %v6686_v16  ;;  %v6758_v15 = vld [vmem:[%s7087_s18 + $0xd34] ss:$24 sps:$4 sm:$0xff]  }
 0x227   : > { %4692 = vmatprep.subr.bf16.mxu1 %v6689_v17  ;;  %v6761_v16 = vld [vmem:[%s7087_s18 + $0xf74] ss:$24 sps:$4 sm:$0xff]   ;;  %v7674_v17 = vpop.f32.mrf.mxu1 }
 0x229   : > { %4642 = vmatpush1.bf16.msra.mxu0 %v6684_v18  ;;  %v6859_v18 = vld [vmem:[#allocation4 + $0x10] ss:$52 sps:$4 sm:$0xff]  }
 0x22a   : > { %4693 = vmatpush2.bf16.msra.mxu1 %v6687_v19  ;;  %4643 = vmatprep.subr.bf16.mxu0 %v6692_v20  ;;  %v6756_v19 = vld [vmem:[%s7087_s18 + $0xd30] ss:$24 sps:$4 sm:$0xff]  }
 0x22b   : > { %4694 = vmatprep.subr.bf16.mxu1 %v6695_v21  ;;  %v6759_v20 = vld [vmem:[%s7087_s18 + $0xf70] ss:$24 sps:$4 sm:$0xff]   ;;  %v7678_v21 = vpop.f32.mrf.mxu0 }
 0x22d   : > { %4644 = vmatpush1.bf16.msra.mxu0 %v6690_v23  ;;  %v6764_v23 = vld [vmem:[%s7087_s18 + $0xd04] ss:$24 sps:$4 sm:$0xff]  }
 0x22e   : > { %4695 = vmatpush2.bf16.msra.mxu1 %v6693_v24  ;;  %4645 = vmatprep.subr.bf16.mxu0 %v6698_v25  ;;  %v6767_v24 = vld [vmem:[%s7087_s18 + $0xf44] ss:$24 sps:$4 sm:$0xff]   ;;  %v7682_v25 = vpop.f32.mrf.mxu1 }
 0x22f   : > { %4696 = vmatprep.subr.bf16.mxu1 %v6701_v26  ;;  %v6860_v26 = vld [vmem:[#allocation4 + $0x24] ss:$52 sps:$4 sm:$0xff]  }
 0x231   : > { %4646 = vmatpush1.bf16.msra.mxu0 %v6696_v27  ;;  %v7684_v27 = vpop.f32.mrf.mxu1 }
 0x232   : > { %4697 = vmatpush2.bf16.msra.mxu1 %v6699_v28  ;;  %4647 = vmatprep.subr.bf16.mxu0 %v6704_v29  ;;  %v6762_v28 = vld [vmem:[%s7087_s18 + $0xd00] ss:$24 sps:$4 sm:$0xff]  }
 0x233   : > { %4698 = vmatprep.subr.bf16.mxu1 %v6707_v30  ;;  %v6765_v29 = vld [vmem:[%s7087_s18 + $0xf40] ss:$24 sps:$4 sm:$0xff]   ;;  %v7688_v30 = vpop.f32.mrf.mxu0 }
 0x235   : > { %4648 = vmatpush2.bf16.msra.mxu0 %v6702_v31  ;;  %v6770_v31 = vld [vmem:[%s7087_s18 + $0xcd4] ss:$24 sps:$4 sm:$0xff]  }
 0x236   : > { %4699 = vmatpush2.bf16.msra.mxu1 %v6705_v32  ;;  %4649 = vmatprep.subr.bf16.mxu0 %v6710_v34  ;;  %v6773_v32 = vld [vmem:[%s7087_s18 + $0xf14] ss:$24 sps:$4 sm:$0xff]   ;;  %v7692_v34 = vpop.f32.mrf.mxu1 }
 0x237   : > { %4700 = vmatprep.subr.bf16.mxu1 %v6713_v35  ;;  %v6768_v35 = vld [vmem:[%s7087_s18 + $0xcd0] ss:$24 sps:$4 sm:$0xff]  }
 0x239   : > { %4650 = vmatpush2.bf16.msra.mxu0 %v6708_v36  ;;  %v6771_v36 = vld [vmem:[%s7087_s18 + $0xf10] ss:$24 sps:$4 sm:$0xff]  }
 0x23a   : > { %4701 = vmatpush2.bf16.msra.mxu1 %v6711_v37  ;;  %4651 = vmatprep.subr.bf16.mxu0 %v6716_v39  ;;  %v7696_v37 = vpop.f32.mrf.mxu0  ;;  %v6776_v39 = vld [vmem:[%s7087_s18 + $0xca4] ss:$24 sps:$4 sm:$0xff]  }
 0x23b   : > { %4702 = vmatprep.subr.bf16.mxu1 %v6719_v41  ;;  %v6779_v41 = vld [vmem:[%s7087_s18 + $0x11e4] ss:$24 sps:$4 sm:$0xff]  }
 0x23d   : > { %4652 = vmatpush2.bf16.msra.mxu0 %v6714_v42  ;;  %v7700_v42 = vpop.f32.mrf.mxu1 }
 0x23e   : > { %4703 = vmatpush2.bf16.msra.mxu1 %v6717_v43  ;;  %4653 = vmatprep.subr.bf16.mxu0 %v6722_v47  ;;  %v6774_v43 = vld [vmem:[%s7087_s18 + $0xca0] ss:$24 sps:$4 sm:$0xff]  }
 0x23f   : > { %4704 = vmatprep.subr.bf16.mxu1 %v6725_v48  ;;  %v6777_v47 = vld [vmem:[%s7087_s18 + $0x11e0] ss:$24 sps:$4 sm:$0xff]   ;;  %v7704_v48 = vpop.f32.mrf.mxu0 }
 0x241   : > { %4654 = vmatpush2.bf16.msra.mxu0 %v6720_v49  ;;  %v6782_v49 = vld [vmem:[%s7087_s18 + $0xc74] ss:$24 sps:$4 sm:$0xff]  }
 0x242   : > { %4705 = vmatpush2.bf16.msra.mxu1 %v6723_v50  ;;  %4655 = vmatprep.subr.bf16.mxu0 %v6728_v52  ;;  %v6785_v50 = vld [vmem:[%s7087_s18 + $0x11b4] ss:$24 sps:$4 sm:$0xff]   ;;  %v7708_v52 = vpop.f32.mrf.mxu1 }
 0x243   : > { %4760 = vmatprep.subr.bf16.mxu1 %v6731_v53  ;;  %v6780_v53 = vld [vmem:[%s7087_s18 + $0xc70] ss:$24 sps:$4 sm:$0xff]  }
 0x245   : > { %4707 = vmatmul.mubr.bf16.vlgmr.msra.gmra.mxu1 %v7435_v40  ;;  %4656 = vmatpush2.bf16.msra.mxu0 %v6726_v55  ;;  %v6738_v40 = vld [vmem:[%s7087_s18 + $0x7c0] ss:$24 sps:$4 sm:$0xff]   ;;  %v6783_v55 = vld [vmem:[%s7087_s18 + $0x11b0] ss:$24 sps:$4 sm:$0xff]  }
 0x246   : > { %4761 = vmatpush1.bf16.msra.mxu1 %v6729_v56  ;;  %4657 = vmatprep.subr.bf16.mxu0 %v6734_v58  ;;  %v7712_v56 = vpop.f32.mrf.mxu0  ;;  %v6788_v58 = vld [vmem:[%s7087_s18 + $0xc44] ss:$24 sps:$4 sm:$0xff]  }
 0x247   : > { %4762 = vmatprep.subr.bf16.mxu1 %v6737_v59  ;;  %4792 = vmatprep.mubr.bf16.mxu1 %v7442_v45  ;;  %v6744_v45 = vld [vmem:[%s7087_s18 + $0x790] ss:$24 sps:$4 sm:$0xff]   ;;  %v6791_v59 = vld [vmem:[%s7087_s18 + $0x1184] ss:$24 sps:$4 sm:$0xff]  }
 0x249   : > { %4658 = vmatpush2.bf16.msra.mxu0 %v6732_v61  ;;  %v7716_v61 = vpop.f32.mrf.mxu1 }
 0x24a   : > { %4763 = vmatpush1.bf16.msra.mxu1 %v6735_v62  ;;  %4659 = vmatprep.subr.bf16.mxu0 %v6740_v63  ;;  %v6786_v62 = vld [vmem:[%s7087_s18 + $0xc40] ss:$24 sps:$4 sm:$0xff]  }
 0x24b   : > { %4764 = vmatprep.subr.bf16.mxu1 %v6743_v0  ;;  %v6789_v63 = vld [vmem:[%s7087_s18 + $0x1180] ss:$24 sps:$4 sm:$0xff]   ;;  %v7720_v0 = vpop.f32.mrf.mxu0 }
 0x24d   : > { %4660 = vmatpush2.bf16.msra.mxu0 %v6738_v40  ;;  %v6794_v40 = vld [vmem:[%s7087_s18 + $0xc14] ss:$24 sps:$4 sm:$0xff]  }
 0x24e   : > { %4765 = vmatpush1.bf16.msra.mxu1 %v6741_v2  ;;  %4661 = vmatprep.subr.bf16.mxu0 %v6746_v3  ;;  %v6797_v2 = vld [vmem:[%s7087_s18 + $0x1154] ss:$24 sps:$4 sm:$0xff]   ;;  %v4194_v3 = vpop.f32.mrf.mxu1 }
 0x24f   : > { %4766 = vmatprep.subr.bf16.mxu1 %v6749_v4  ;;  %v6792_v4 = vld [vmem:[%s7087_s18 + $0xc10] ss:$24 sps:$4 sm:$0xff]  }
 0x251   : > { %4662 = vmatpush2.bf16.msra.mxu0 %v6744_v45  ;;  %v6795_v45 = vld [vmem:[%s7087_s18 + $0x1150] ss:$24 sps:$4 sm:$0xff]  }
 0x252   : > { %4767 = vmatpush1.bf16.msra.mxu1 %v6747_v7  ;;  %4717 = vmatprep.subr.bf16.mxu0 %v6752_v8  ;;  %v7726_v7 = vpop.f32.mrf.mxu0  ;;  %v6800_v8 = vld [vmem:[%s7087_s18 + $0xee4] ss:$24 sps:$4 sm:$0xff]  }
 0x253   : > { %4768 = vmatprep.subr.bf16.mxu1 %v6755_v9  ;;  %v6803_v9 = vld [vmem:[%s7087_s18 + $0x1124] ss:$24 sps:$4 sm:$0xff]  }
 0x254   : > { %4664 = vmatmul.mubr.bf16.vlgmr.msra.gmra.mxu0 %v6859_v18  ;;  %v6806_v18 = vld [vmem:[%s7087_s18 + $0xeb4] ss:$24 sps:$4 sm:$0xff]  }
 0x255   : > { %4718 = vmatpush1.bf16.msra.mxu0 %v6750_v12  ;;  %4749 = vmatprep.mubr.bf16.mxu0 %v6860_v26  ;;  %v7730_v12 = vpop.f32.mrf.mxu1  ;;  %v6804_v26 = vld [vmem:[%s7087_s18 + $0xeb0] ss:$24 sps:$4 sm:$0xff]  }
 0x256   : > { %4769 = vmatpush1.bf16.msra.mxu1 %v6753_v13  ;;  %4719 = vmatprep.subr.bf16.mxu0 %v6758_v15  ;;  %v7732_v13 = vpop.f32.mrf.mxu0  ;;  %v6798_v15 = vld [vmem:[%s7087_s18 + $0xee0] ss:$24 sps:$4 sm:$0xff]  }
 0x257   : > { %4770 = vmatprep.subr.bf16.mxu1 %v6761_v16  ;;  %v6801_v16 = vld [vmem:[%s7087_s18 + $0x1120] ss:$24 sps:$4 sm:$0xff]  }
 0x259   : > { %4720 = vmatpush1.bf16.msra.mxu0 %v6756_v19  ;;  %v6809_v19 = vld [vmem:[%s7087_s18 + $0x10f4] ss:$24 sps:$4 sm:$0xff]  }
 0x25a   : > { %4771 = vmatpush1.bf16.msra.mxu1 %v6759_v20  ;;  %4721 = vmatprep.subr.bf16.mxu0 %v6764_v23  ;;  %v7738_v20 = vpop.f32.mrf.mxu1  ;;  %v7740_v23 = vpop.f32.mrf.mxu0 }
 0x25b   : > { %4772 = vmatprep.subr.bf16.mxu1 %v6767_v24 }
 0x25c   : > { %v7742_v24 = vpop.f32.mrf.mxu1 }
 0x25d   : > { %4722 = vmatpush1.bf16.msra.mxu0 %v6762_v28  ;;  %v6807_v28 = vld [vmem:[%s7087_s18 + $0x10f0] ss:$24 sps:$4 sm:$0xff]  }
 0x25e   : > { %4773 = vmatpush1.bf16.msra.mxu1 %v6765_v29  ;;  %4723 = vmatprep.subr.bf16.mxu0 %v6770_v31  ;;  %v4023_v29 = vadd.f32 %v7664_v10, %v7626_v46  ;;  %v6812_v31 = vld [vmem:[%s7087_s18 + $0xe84] ss:$24 sps:$4 sm:$0xff]   ;;  %v6818_v46 = vld [vmem:[%s7087_s18 + $0xe54] ss:$24 sps:$4 sm:$0xff]  }
 0x25f   : > { %4774 = vmatprep.subr.bf16.mxu1 %v6773_v32  ;;  %v6815_v32 = vld [vmem:[%s7087_s18 + $0x10c4] ss:$24 sps:$4 sm:$0xff]   ;;  %v6821_v10 = vld [vmem:[%s7087_s18 + $0x1094] ss:$24 sps:$4 sm:$0xff]  }
 0x261   : > { %4724 = vmatpush1.bf16.msra.mxu0 %v6768_v35  ;;  %v4066_v35 = vadd.f32 %v7650_v1, %v4023_v29  ;;  %v6828_v29 = vld [vmem:[%s7087_s18 + $0xdc0] ss:$24 sps:$4 sm:$0xff]  }
 0x262   : > { %4775 = vmatpush1.bf16.msra.mxu1 %v6771_v36  ;;  %4725 = vmatprep.subr.bf16.mxu0 %v6776_v39  ;;  %v7751_v36 = vpop.f32.mrf.mxu0  ;;  %v7753_v39 = vpop.f32.mrf.mxu1 }
 0x263   : > { %4776 = vmatprep.subr.bf16.mxu1 %v6779_v41  ;;  %v6810_v41 = vld [vmem:[%s7087_s18 + $0xe80] ss:$24 sps:$4 sm:$0xff]  }
 0x264   : > { %v7762_v1 = vpop.f32.mrf.mxu1 }
 0x265   : > { %4726 = vmatpush1.bf16.msra.mxu0 %v6774_v43  ;;  %v6813_v43 = vld [vmem:[%s7087_s18 + $0x10c0] ss:$24 sps:$4 sm:$0xff]  }
 0x266   : > { %4777 = vmatpush2.bf16.msra.mxu1 %v6777_v47  ;;  %4727 = vmatprep.subr.bf16.mxu0 %v6782_v49  ;;  %v4109_v47 = vadd.f32 %v7692_v34, %v4066_v35  ;;  %v7760_v49 = vpop.f32.mrf.mxu0  ;;  %v279_v34 = vld [vmem:[%s8166_s2 + $0xf8] sm:$0xff] }
 0x267   : > { %4778 = vmatprep.subr.bf16.mxu1 %v6785_v50  ;;  %v6816_v50 = vld [vmem:[%s7087_s18 + $0xe50] ss:$24 sps:$4 sm:$0xff]   ;;  %v259_v35 = vld [vmem:[%s8166_s2 + $0x58] sm:$0xff] }
 0x269   : > { %4728 = vmatpush1.bf16.msra.mxu0 %v6780_v53  ;;  %v6819_v53 = vld [vmem:[%s7087_s18 + $0x1090] ss:$24 sps:$4 sm:$0xff]  }
 0x26a   : > { %4779 = vmatpush2.bf16.msra.mxu1 %v6783_v55  ;;  %4729 = vmatprep.subr.bf16.mxu0 %v6788_v58  ;;  %v4152_v55 = vadd.f32 %v7678_v21, %v4109_v47  ;;  %v7767_v58 = vpop.f32.mrf.mxu0  ;;  %v263_v21 = vld [vmem:[%s8166_s2 + $0x78] sm:$0xff]  ;;  %v258_v47 = vld [vmem:[%s8166_s2 + $0x50] sm:$0xff] }
 0x26b   : > { %4780 = vmatprep.subr.bf16.mxu1 %v6791_v59  ;;  %v6824_v59 = vld [vmem:[%s7087_s18 + $0xe24] ss:$24 sps:$4 sm:$0xff]  }
 0x26d   : > { %4730 = vmatpush1.bf16.msra.mxu0 %v6786_v62  ;;  %v7773_v62 = vpop.f32.mrf.mxu1 }
 0x26e   : > { %4781 = vmatpush2.bf16.msra.mxu1 %v6789_v63  ;;  %4731 = vmatprep.subr.bf16.mxu0 %v6794_v40  ;;  %v6822_v63 = vld [vmem:[%s7087_s18 + $0xe20] ss:$24 sps:$4 sm:$0xff]   ;;  %v4195_v40 = vadd.f32 %v4194_v3, %v4152_v55  ;;  %v262_v3 = vld [vmem:[%s8166_s2 + $0x70] sm:$0xff] }
 0x26f   : > { %4782 = vmatprep.subr.bf16.mxu1 %v6797_v2  ;;  %v7776_v2 = vpop.f32.mrf.mxu0 }
 0x271   : > { %4732 = vmatpush1.bf16.msra.mxu0 %v6792_v4  ;;  %v7781_v4 = vpop.f32.mrf.mxu1 }
 0x272   : > { %4783 = vmatpush2.bf16.msra.mxu1 %v6795_v45  ;;  %4733 = vmatprep.subr.bf16.mxu0 %v6800_v8  ;;  %v278_v45 = vld [vmem:[%s8166_s2 + $0xf0] sm:$0xff] }
 0x273   : > { %4784 = vmatprep.subr.bf16.mxu1 %v6803_v9  ;;  %v6827_v8 = vld [vmem:[%s7087_s18 + $0xdf4] ss:$24 sps:$4 sm:$0xff]   ;;  %v4238_v9 = vadd.f32 %v7712_v56, %v4195_v40  ;;  %v6830_v56 = vld [vmem:[%s7087_s18 + $0xdc4] ss:$24 sps:$4 sm:$0xff]  }
 0x274   : > { %v272_v40 = vld [vmem:[%s8166_s2 + $0xc0] sm:$0xff] }
 0x275   : > { %4734 = vmatpush2.bf16.msra.mxu0 %v6798_v15  ;;  %v6825_v15 = vld [vmem:[%s7087_s18 + $0xdf0] ss:$24 sps:$4 sm:$0xff]  }
 0x276   : > { %4785 = vmatpush2.bf16.msra.mxu1 %v6801_v16  ;;  %4735 = vmatprep.subr.bf16.mxu0 %v6806_v18  ;;  %v277_v16 = vld [vmem:[%s8166_s2 + $0xe8] sm:$0xff]  ;;  %v7796_v18 = vpop.f32.mrf.mxu0 }
 0x277   : > { %4786 = vmatprep.subr.bf16.mxu1 %v6809_v19  ;;  %v4366_v19 = vpop.f32.mrf.mxu1 }
 0x279   : > { %4736 = vmatpush2.bf16.msra.mxu0 %v6804_v26  ;;  %v276_v26 = vld [vmem:[%s8166_s2 + $0xe0] sm:$0xff] }
 0x27a   : > { %4787 = vmatpush2.bf16.msra.mxu1 %v6807_v28  ;;  %4737 = vmatprep.subr.bf16.mxu0 %v6812_v31  ;;  %v260_v28 = vld [vmem:[%s8166_s2 + $0x60] sm:$0xff]  ;;  %v275_v31 = vld [vmem:[%s8166_s2 + $0xd8] sm:$0xff] }
 0x27b   : > { %4788 = vmatprep.subr.bf16.mxu1 %v6815_v32  ;;  %v7812_v32 = vpop.f32.mrf.mxu0 }
 0x27d   : > { %4738 = vmatpush2.bf16.msra.mxu0 %v6810_v41  ;;  %v6833_v41 = vld [vmem:[%s7087_s18 + $0xd94] ss:$24 sps:$4 sm:$0xff]  }
 0x27e   : > { %4789 = vmatpush2.bf16.msra.mxu1 %v6813_v43  ;;  %4739 = vmatprep.subr.bf16.mxu0 %v6818_v46  ;;  %v7818_v43 = vpop.f32.mrf.mxu1  ;;  %v274_v46 = vld [vmem:[%s8166_s2 + $0xd0] sm:$0xff] }
 0x27f   : > { %4790 = vmatprep.subr.bf16.mxu1 %v6821_v10 }
 0x281   : > { %4740 = vmatpush2.bf16.msra.mxu0 %v6816_v50  ;;  %v6831_v50 = vld [vmem:[%s7087_s18 + $0xd90] ss:$24 sps:$4 sm:$0xff]  }
 0x282   : > { %4791 = vmatpush2.bf16.msra.mxu1 %v6819_v53  ;;  %4741 = vmatprep.subr.bf16.mxu0 %v6824_v59  ;;  %v273_v53 = vld [vmem:[%s8166_s2 + $0xc8] sm:$0xff] }
 0x283   : > { %5767 = vmatprep.subr.mxu1 %v279_v34  ;;  %v257_v59 = vld [vmem:[%s8166_s2 + $0x48] sm:$0xff]  ;;  %v6836_v34 = vld [vmem:[%s7087_s18 + $0x1244] ss:$24 sps:$4 sm:$0xff]  }
 0x285   : > { %4793 = vmatmul.mubr.bf16.vlgmr.msra.gmra.mxu1 %v7506_v44  ;;  %4742 = vmatpush2.bf16.msra.mxu0 %v6822_v63  ;;  %v261_v44 = vld [vmem:[%s8166_s2 + $0x68] sm:$0xff]  ;;  %v7836_v63 = vpop.f32.mrf.mxu1 }
 0x286   : > { %5768 = vmatpush3.msra.mxu1 %v263_v21  ;;  %4910 = vmatprep.mubr.f32.mxu1 %v4238_v9  ;;  %v6834_v9 = vld [vmem:[%s7087_s18 + $0x1240] ss:$24 sps:$4 sm:$0xff]  }
 0x287   : > { %5769 = vmatprep.subr.mxu1 %v278_v45  ;;  %4743 = vmatprep.subr.bf16.mxu0 %v6827_v8  ;;  %v256_v45 = vld [vmem:[%s8166_s2 + $0x40] sm:$0xff]  ;;  %v7846_v8 = vpop.f32.mrf.mxu1 }
 0x288   : > { %5770 = vmatpush3.msra.mxu1 %v262_v3  ;;  %v271_v3 = vld [vmem:[%s8166_s2 + $0xb8] sm:$0xff] }
 0x289   : > { %5771 = vmatprep.subr.mxu1 %v277_v16  ;;  %4744 = vmatpush2.bf16.msra.mxu0 %v6825_v15  ;;  %v4324_v15 = vadd.f32 %v7740_v23, %v7753_v39  ;;  %v254_v23 = vld [vmem:[%s8166_s2 + $0x30] sm:$0xff]  ;;  %v4027_v39 = vadd.f32 %v7682_v25, %v7638_v57  ;;  %v253_v57 = vld [vmem:[%s8166_s2 + $0x28] sm:$0xff] }
 0x28a   : > { %5772 = vmatpush3.msra.mxu1 %v261_v44  ;;  %4745 = vmatprep.subr.bf16.mxu0 %v6830_v56  ;;  %v255_v44 = vld [vmem:[%s8166_s2 + $0x38] sm:$0xff]  ;;  %v6839_v56 = vld [vmem:[%s7087_s18 + $0x1214] ss:$24 sps:$4 sm:$0xff]  }
 0x28b   : > { %5773 = vmatprep.subr.mxu1 %v276_v26  ;;  %v270_v26 = vld [vmem:[%s8166_s2 + $0xb0] sm:$0xff]  ;;  %v4070_v25 = vadd.f32 %v7666_v11, %v4027_v39  ;;  %v252_v11 = vld [vmem:[%s8166_s2 + $0x20] sm:$0xff] }
 0x28c   : > { %5774 = vmatpush3.msra.mxu1 %v260_v28  ;;  %v7823_v10 = vpop.f32.mrf.mxu0  ;;  %v4021_v28 = vadd.f32 %v7656_v5, %v7620_v38  ;;  %v269_v38 = vld [vmem:[%s8166_s2 + $0xa8] sm:$0xff] }
 0x28d   : > { %5775 = vmatprep.subr.mxu1 %v275_v31  ;;  %4746 = vmatpush2.bf16.msra.mxu0 %v6828_v29  ;;  %v4367_v29 = vadd.f32 %v4366_v19, %v4324_v15  ;;  %v4452_v31 = vpop.f32.mrf.mxu1  ;;  %v268_v19 = vld [vmem:[%s8166_s2 + $0xa0] sm:$0xff]  ;;  %v293_v15 = vld [vmem:[%s8166_s2 + $0x168] sm:$0xff] }
 0x28e   : > { %5776 = vmatpush3.msra.mxu1 %v259_v35  ;;  %v4495_v55 = vpop.f32.mrf.mxu0  ;;  %4747 = vmatprep.subr.bf16.mxu0 %v6833_v41  ;;  %v6837_v41 = vld [vmem:[%s7087_s18 + $0x1210] ss:$24 sps:$4 sm:$0xff]  }
 0x28f   : > { %5777 = vmatprep.subr.mxu1 %v274_v46  ;;  %v4410_v5 = vadd.f32 %v7776_v2, %v4367_v29  ;;  %v4025_v2 = vadd.f32 %v7674_v17, %v7632_v51  ;;  %v251_v51 = vld [vmem:[%s8166_s2 + $0x18] sm:$0xff] }
 0x290   : > { %5778 = vmatpush3.msra.mxu1 %v258_v47  ;;  %v7841_v21 = vpop.f32.mrf.mxu0  ;;  %v295_v17 = vld [vmem:[%s8166_s2 + $0x178] sm:$0xff] }
 0x291   : > { %5779 = vmatprep.subr.mxu1 %v273_v53  ;;  %4748 = vmatpush2.bf16.msra.mxu0 %v6831_v50  ;;  %v4453_v46 = vadd.f32 %v4452_v31, %v4410_v5  ;;  %v4068_v53 = vadd.f32 %v7658_v6, %v4025_v2  ;;  %v343_v31 = vld [vmem:[%s8166_s2 + $0x2f8] sm:$0xff]  ;;  %v342_v5 = vld [vmem:[%s8166_s2 + $0x2f0] sm:$0xff]  ;;  %v325_v2 = vld [vmem:[%s8166_s2 + $0x268] sm:$0xff] }
 0x292   : > { %5780 = vmatpush3.msra.mxu1 %v257_v59  ;;  %v7854_v16 = vpop.f32.mrf.mxu0  ;;  %4815 = vmatprep.subr.bf16.mxu0 %v6836_v34  ;;  %v4113_v34 = vadd.f32 %v7708_v52, %v4070_v25  ;;  %v250_v52 = vld [vmem:[%s8166_s2 + $0x10] sm:$0xff]  ;;  %v304_v25 = vld [vmem:[%s8166_s2 + $0x1c0] sm:$0xff] }
 0x293   : > { %5781 = vmatprep.subr.mxu1 %v272_v40  ;;  %v4496_v59 = vadd.f32 %v4495_v55, %v4453_v46  ;;  %v310_v40 = vld [vmem:[%s8166_s2 + $0x1f0] sm:$0xff]  ;;  %v303_v46 = vld [vmem:[%s8166_s2 + $0x1b8] sm:$0xff] }
 0x294   : > { %5782 = vmatpush3.msra.mxu1 %v256_v45  ;;  %4750 = vmatmul.mubr.bf16.vlgmr.msra.gmra.mxu0 %v7495_v33  ;;  %v7871_v35 = vpop.f32.mrf.mxu0  ;;  %v4064_v33 = vadd.f32 %v7642_v60, %v4021_v28  ;;  %v311_v60 = vld [vmem:[%s8166_s2 + $0x1f8] sm:$0xff]  ;;  %v4156_v45 = vadd.f32 %v7696_v37, %v4113_v34  ;;  %v249_v37 = vld [vmem:[%s8166_s2 + $0x8] sm:$0xff]  ;;  %v248_v28 = vld [vmem:[%s8166_s2] sm:$0xff] }
 0x295   : > { %5783 = vmatprep.subr.mxu1 %v271_v3  ;;  %4816 = vmatpush1.bf16.msra.mxu0 %v6834_v9  ;;  %v4111_v9 = vadd.f32 %v7700_v42, %v4068_v53  ;;  %v309_v3 = vld [vmem:[%s8166_s2 + $0x1e8] sm:$0xff]  ;;  %v264_v42 = vld [vmem:[%s8166_s2 + $0x80] sm:$0xff]  ;;  %v339_v53 = vld [vmem:[%s8166_s2 + $0x2d8] sm:$0xff] }
 0x296   : > { %5784 = vmatpush3.msra.mxu1 %v255_v44  ;;  %4817 = vmatprep.subr.bf16.mxu0 %v6839_v56  ;;  %v4538_v47 = vpop.f32.mrf.mxu0  ;;  %v4107_v50 = vadd.f32 %v7684_v27, %v4064_v33  ;;  %v266_v27 = vld [vmem:[%s8166_s2 + $0x90] sm:$0xff]  ;;  %v4199_v29 = vadd.f32 %v7738_v20, %v4156_v45  ;;  %v291_v20 = vld [vmem:[%s8166_s2 + $0x158] sm:$0xff]  ;;  %v4454_v45 = vpop.f32.mrf.mxu1 }
 0x297   : > { %5785 = vmatprep.subr.mxu1 %v270_v26  ;;  %4835 = vmatprep.mubr.bf16.mxu0 %v6961_v22  ;;  %v267_v22 = vld [vmem:[%s8166_s2 + $0x98] sm:$0xff]  ;;  %v4539_v55 = vadd.f32 %v4538_v47, %v4496_v59  ;;  %v4154_v56 = vadd.f32 %v7688_v30, %v4111_v9  ;;  %v308_v26 = vld [vmem:[%s8166_s2 + $0x1e0] sm:$0xff]  ;;  %v286_v59 = vld [vmem:[%s8166_s2 + $0x130] sm:$0xff]  ;;  %v4328_v9 = vadd.f32 %v7760_v49, %v7773_v62 }
 0x298   : > { %5786 = vmatpush3.msra.mxu1 %v254_v23  ;;  %v4150_v6 = vadd.f32 %v7670_v14, %v4107_v50  ;;  %v294_v14 = vld [vmem:[%s8166_s2 + $0x170] sm:$0xff]  ;;  %v307_v23 = vld [vmem:[%s8166_s2 + $0x1d8] sm:$0xff]  ;;  %v4242_v39 = vadd.f32 %v7726_v7, %v4199_v29  ;;  %v320_v49 = vld [vmem:[%s8166_s2 + $0x240] sm:$0xff] }
 0x299   : > { %5787 = vmatprep.subr.mxu1 %v269_v38  ;;  %4818 = vmatpush1.bf16.msra.mxu0 %v6837_v41  ;;  %v306_v41 = vld [vmem:[%s8166_s2 + $0x1d0] sm:$0xff]  ;;  %v327_v7 = vld [vmem:[%s8166_s2 + $0x278] sm:$0xff]  ;;  %v4371_v62 = vadd.f32 %v7836_v63, %v4328_v9 }
 0x29a   : > { %5788 = vmatpush3.msra.mxu1 %v253_v57  ;;  %5805 = vmatprep.subr.mxu0 %v311_v60  ;;  %v4193_v44 = vadd.f32 %v7716_v61, %v4150_v6  ;;  %v292_v61 = vld [vmem:[%s8166_s2 + $0x160] sm:$0xff]  ;;  %v290_v38 = vld [vmem:[%s8166_s2 + $0x150] sm:$0xff]  ;;  %v289_v57 = vld [vmem:[%s8166_s2 + $0x148] sm:$0xff] }
 0x29b   : > { %5789 = vmatprep.subr.mxu1 %v268_v19  ;;  %v341_v19 = vld [vmem:[%s8166_s2 + $0x2e8] sm:$0xff]  ;;  %v288_v60 = vld [vmem:[%s8166_s2 + $0x140] sm:$0xff]  ;;  %v287_v47 = vld [vmem:[%s8166_s2 + $0x138] sm:$0xff]  ;;  %v4414_v29 = vadd.f32 %v7812_v32, %v4371_v62 }
 0x29c   : > { %5790 = vmatpush3.msra.mxu1 %v252_v11  ;;  %5763 = vmatmul.mubr.msk.bf16.vlgmr.msra.gmra.mxu0 %vm3939_vm0, %v7518_v54  ;;  %v265_v54 = vld [vmem:[%s8166_s2 + $0x88] sm:$0xff]  ;;  %v4236_v30 = vadd.f32 %v7704_v48, %v4193_v44  ;;  %v4197_v48 = vadd.f32 %v7730_v12, %v4154_v56  ;;  %v340_v11 = vld [vmem:[%s8166_s2 + $0x2e0] sm:$0xff]  ;;  %v302_v50 = vld [vmem:[%s8166_s2 + $0x1b0] sm:$0xff]  ;;  %v4456_v56 = vpop.f32.mrf.mxu1 }
 0x29d   : > { %5791 = vmatprep.subr.mxu1 %v267_v22  ;;  %5806 = vmatpush3.msra.mxu0 %v295_v17  ;;  %v305_v12 = vld [vmem:[%s8166_s2 + $0x1c8] sm:$0xff]  ;;  %v324_v22 = vld [vmem:[%s8166_s2 + $0x260] sm:$0xff]  ;;  %v338_v34 = vld [vmem:[%s8166_s2 + $0x2d0] sm:$0xff] }
 0x29e   : > { %5792 = vmatpush3.msra.mxu1 %v251_v51  ;;  %4985 = vmatprep.mubr.f32.mxu0 %v4539_v55  ;;  %v4240_v33 = vadd.f32 %v7720_v0, %v4197_v48  ;;  %v326_v0 = vld [vmem:[%s8166_s2 + $0x270] sm:$0xff]  ;;  %v323_v51 = vld [vmem:[%s8166_s2 + $0x258] sm:$0xff]  ;;  %v301_v17 = vld [vmem:[%s8166_s2 + $0x1a8] sm:$0xff] }
 0x29f   : > { %5793 = vmatprep.subr.mxu1 %v266_v27  ;;  %5807 = vmatprep.subr.mxu0 %v310_v40  ;;  %v285_v27 = vld [vmem:[%s8166_s2 + $0x128] sm:$0xff]  ;;  %v322_v6 = vld [vmem:[%s8166_s2 + $0x250] sm:$0xff]  ;;  %v300_v55 = vld [vmem:[%s8166_s2 + $0x1a0] sm:$0xff] }
 0x2a0   : > { %5794 = vmatpush3.msra.mxu1 %v250_v52  ;;  %5808 = vmatpush3.msra.mxu0 %v294_v14  ;;  %v337_v40 = vld [vmem:[%s8166_s2 + $0x2c8] sm:$0xff]  ;;  %v4322_v52 = vadd.f32 %v7732_v13, %v7742_v24  ;;  %v284_v14 = vld [vmem:[%s8166_s2 + $0x120] sm:$0xff]  ;;  %v282_v63 = vld [vmem:[%s8166_s2 + $0x110] sm:$0xff] }
 0x2a1   : > { %5795 = vmatprep.subr.mxu1 %v265_v54  ;;  %5809 = vmatprep.subr.mxu0 %v309_v3  ;;  %v321_v54 = vld [vmem:[%s8166_s2 + $0x248] sm:$0xff]  ;;  %v299_v3 = vld [vmem:[%s8166_s2 + $0x198] sm:$0xff]  ;;  %v336_v13 = vld [vmem:[%s8166_s2 + $0x2c0] sm:$0xff] }
 0x2a2   : > { %5796 = vmatpush3.msra.mxu1 %v249_v37  ;;  %5810 = vmatpush3.msra.mxu0 %v293_v15  ;;  %v4365_v24 = vadd.f32 %v7781_v4, %v4322_v52  ;;  %v283_v37 = vld [vmem:[%s8166_s2 + $0x118] sm:$0xff]  ;;  %v298_v15 = vld [vmem:[%s8166_s2 + $0x190] sm:$0xff]  ;;  %v296_v32 = vld [vmem:[%s8166_s2 + $0x180] sm:$0xff] }
 0x2a3   : > { %5797 = vmatprep.subr.mxu1 %v264_v42  ;;  %5811 = vmatprep.subr.mxu0 %v308_v26  ;;  %v335_v4 = vld [vmem:[%s8166_s2 + $0x2b8] sm:$0xff]  ;;  %v4326_v42 = vadd.f32 %v7751_v36, %v7762_v1  ;;  %v4540_v26 = vpop.f32.mrf.mxu0  ;;  %v297_v36 = vld [vmem:[%s8166_s2 + $0x188] sm:$0xff] }
 0x2a4   : > { %5798 = vmatpush3.msra.mxu1 %v248_v28  ;;  %5812 = vmatpush3.msra.mxu0 %v292_v61  ;;  %v4408_v44 = vadd.f32 %v7767_v58, %v4365_v24  ;;  %v319_v28 = vld [vmem:[%s8166_s2 + $0x238] sm:$0xff]  ;;  %v281_v61 = vld [vmem:[%s8166_s2 + $0x108] sm:$0xff] }
 0x2a5   : > { %4911 = vmatmul.mubr.f32.vlgmr.msra.gmra.mxu1 %v4236_v30  ;;  %5813 = vmatprep.subr.mxu0 %v307_v23  ;;  %v4369_v1 = vadd.f32 %v7818_v43, %v4326_v42  ;;  %v4457_v30 = vadd.f32 %v4456_v56, %v4414_v29  ;;  %v4542_v43 = vpop.f32.mrf.mxu0 }
 0x2a6   : > { %4915 = vmatprep.mubr.f32.mxu1 %v4242_v39  ;;  %5814 = vmatpush3.msra.mxu0 %v291_v20  ;;  %v4451_v58 = vadd.f32 %v7846_v8, %v4408_v44  ;;  %v280_v8 = vld [vmem:[%s8166_s2 + $0x100] sm:$0xff] }
 0x2a7   : > { %5843 = vmatprep.subr.mxu1 %v343_v31  ;;  %5815 = vmatprep.subr.mxu0 %v306_v41  ;;  %v4412_v23 = vadd.f32 %v7796_v18, %v4369_v1  ;;  %v4500_v20 = vadd.f32 %v7854_v16, %v4457_v30  ;;  %v318_v16 = vld [vmem:[%s8166_s2 + $0x230] sm:$0xff] }
 0x2a8   : > { %5844 = vmatpush3.msra.mxu1 %v327_v7  ;;  %5816 = vmatpush3.msra.mxu0 %v290_v38  ;;  %v4494_v39 = vadd.f32 %v7823_v10, %v4451_v58  ;;  %v334_v10 = vld [vmem:[%s8166_s2 + $0x2b0] sm:$0xff]  ;;  %v332_v38 = vld [vmem:[%s8166_s2 + $0x2a0] sm:$0xff] }
 0x2a9   : > { %4916 = vmatmul.mubr.f32.gmra.mxu1 %v4240_v33  ;;  %5817 = vmatprep.subr.mxu0 %v305_v12  ;;  %v4455_v31 = vadd.f32 %v4454_v45, %v4412_v23  ;;  %v4543_v41 = vadd.f32 %v4542_v43, %v4500_v20  ;;  %v316_v33 = vld [vmem:[%s8166_s2 + $0x220] sm:$0xff]  ;;  %v331_v12 = vld [vmem:[%s8166_s2 + $0x298] sm:$0xff] }
 0x2aa   : > { %5845 = vmatprep.subr.mxu1 %v342_v5  ;;  %5818 = vmatpush3.msra.mxu0 %v289_v57  ;;  %v4537_v48 = vadd.f32 %v7871_v35, %v4494_v39  ;;  %v333_v35 = vld [vmem:[%s8166_s2 + $0x2a8] sm:$0xff]  ;;  %v315_v5 = vld [vmem:[%s8166_s2 + $0x218] sm:$0xff]  ;;  %v330_v57 = vld [vmem:[%s8166_s2 + $0x290] sm:$0xff] }
 0x2ab   : > { %5846 = vmatpush3.msra.mxu1 %v326_v0  ;;  %5819 = vmatprep.subr.mxu0 %v304_v25  ;;  %v4498_v7 = vadd.f32 %v7841_v21, %v4455_v31  ;;  %v317_v21 = vld [vmem:[%s8166_s2 + $0x228] sm:$0xff]  ;;  %v314_v0 = vld [vmem:[%s8166_s2 + $0x210] sm:$0xff] }
 0x2ac   : > { %5847 = vmatprep.subr.mxu1 %v341_v19  ;;  %5820 = vmatpush3.msra.mxu0 %v288_v60  ;;  %v329_v25 = vld [vmem:[%s8166_s2 + $0x288] sm:$0xff]  ;;  %v328_v60 = vld [vmem:[%s8166_s2 + $0x280] sm:$0xff] }
 0x2ad   : > { %5848 = vmatpush3.msra.mxu1 %v325_v2  ;;  %5821 = vmatprep.subr.mxu0 %v303_v46  ;;  %v4541_v18 = vadd.f32 %v4540_v26, %v4498_v7  ;;  %v313_v19 = vld [vmem:[%s8166_s2 + $0x208] sm:$0xff]  ;;  %v312_v2 = vld [vmem:[%s8166_s2 + $0x200] sm:$0xff] }
 0x2ae   : > { %5849 = vmatprep.subr.mxu1 %v340_v11  ;;  %5822 = vmatpush3.msra.mxu0 %v287_v47 }
 0x2af   : > { %5850 = vmatpush3.msra.mxu1 %v324_v22  ;;  %5823 = vmatprep.subr.mxu0 %v302_v50 }
 0x2b0   : > { %5851 = vmatprep.subr.mxu1 %v339_v53  ;;  %5824 = vmatpush3.msra.mxu0 %v286_v59 }
 0x2b1   : > { %5852 = vmatpush3.msra.mxu1 %v323_v51  ;;  %5825 = vmatprep.subr.mxu0 %v301_v17 }
 0x2b2   : > { %5853 = vmatprep.subr.mxu1 %v338_v34  ;;  %5826 = vmatpush3.msra.mxu0 %v285_v27 }
 0x2b3   : > { %5854 = vmatpush3.msra.mxu1 %v322_v6  ;;  %5827 = vmatprep.subr.mxu0 %v300_v55 }
 0x2b4   : > { %5855 = vmatprep.subr.mxu1 %v337_v40  ;;  %5828 = vmatpush3.msra.mxu0 %v284_v14 }
 0x2b5   : > { %5856 = vmatpush3.msra.mxu1 %v321_v54  ;;  %5829 = vmatprep.subr.mxu0 %v299_v3 }
 0x2b6   : > { %5857 = vmatprep.subr.mxu1 %v336_v13  ;;  %5830 = vmatpush3.msra.mxu0 %v283_v37 }
 0x2b7   : > { %5858 = vmatpush3.msra.mxu1 %v320_v49  ;;  %5831 = vmatprep.subr.mxu0 %v298_v15 }
 0x2b8   : > { %5859 = vmatprep.subr.mxu1 %v335_v4  ;;  %5832 = vmatpush3.msra.mxu0 %v282_v63 }
 0x2b9   : > { %5860 = vmatpush3.msra.mxu1 %v319_v28  ;;  %5833 = vmatprep.subr.mxu0 %v297_v36 }
 0x2ba   : > { %5834 = vmatpush3.msra.mxu0 %v281_v61  ;;  %5861 = vmatprep.subr.mxu1 %v334_v10 }
 0x2bb   : > { %5835 = vmatprep.subr.mxu0 %v296_v32  ;;  %5862 = vmatpush3.msra.mxu1 %v318_v16 }
 0x2bc   : > { %5836 = vmatpush3.msra.mxu0 %v280_v8  ;;  %5863 = vmatprep.subr.mxu1 %v333_v35 }
 0x2bd   : > { %4986 = vmatmul.mubr.f32.vlgmr.msra.gmra.mxu0 %v4537_v48  ;;  %5864 = vmatpush3.msra.mxu1 %v317_v21 }
 0x2be   : > { %4990 = vmatprep.mubr.f32.mxu0 %v4543_v41  ;;  %5865 = vmatprep.subr.mxu1 %v332_v38 }
 0x2bf   : > { %5866 = vmatpush3.msra.mxu1 %v316_v33 }
 0x2c0   : > { %5867 = vmatprep.subr.mxu1 %v331_v12 }
 0x2c1   : > { %4991 = vmatmul.mubr.f32.gmra.mxu0 %v4541_v18  ;;  %5868 = vmatpush3.msra.mxu1 %v315_v5 }
 0x2c2   : > { %5869 = vmatprep.subr.mxu1 %v330_v57 }
 0x2c3   : > { %5870 = vmatpush3.msra.mxu1 %v314_v0  ;;  %v344_v0 = vld [vmem:[%s8167_s3] sm:$0xff] }
 0x2c4   : > { %5871 = vmatprep.subr.mxu1 %v329_v25 }
 0x2c5   : > { %5872 = vmatpush3.msra.mxu1 %v313_v19  ;;  %v4622_v11 = vpop.f32.mrf.mxu1 }
 0x2c6   : > { %5873 = vmatprep.subr.mxu1 %v328_v60 }
 0x2c7   : > { %5874 = vmatpush3.msra.mxu1 %v312_v2  ;;  %v4624_v22 = vpop.f32.mrf.mxu1 }
 0x2c9   : > { %v4626_v53 = vpop.f32.mrf.mxu1 }
 0x2cb   : > { %v4628_v51 = vpop.f32.mrf.mxu1 }
 0x2d4   : > { %v4579_v46 = vpop.f32.mrf.mxu0 }
 0x2d5   : > { %v4623_v45 = vadd.f32 %v4622_v11, %v4579_v46 }
 0x2d6   : > { %v4581_v47 = vpop.f32.mrf.mxu0 }
 0x2d7   : > { %v4625_v52 = vadd.f32 %v4624_v22, %v4581_v47  ;;  %v345_v47 = vld [vmem:[%s8167_s3 + $0x8] sm:$0xff] }
 0x2d8   : > { %v4583_v50 = vpop.f32.mrf.mxu0 }
 0x2d9   : > { %v4627_v49 = vadd.f32 %v4626_v53, %v4583_v50 }
 0x2da   : > { %v4585_v59 = vpop.f32.mrf.mxu0 }
 0x2db   : > { %v4629_v37 = vadd.f32 %v4628_v51, %v4585_v59 }
 0x305   : > { %v4708_v34 = vpop.f32.mrf.mxu1 }
 0x307   : > { %v4710_v6 = vpop.f32.mrf.mxu1 }
 0x309   : > { %v4712_v40 = vpop.f32.mrf.mxu1 }
 0x30b   : > { %v4714_v54 = vpop.f32.mrf.mxu1 }
 0x314   : > { %v4665_v17 = vpop.f32.mrf.mxu0 }
 0x315   : > { %v4666_v3 = vadd.f32 %v4665_v17, %v4623_v45 }
 0x316   : > { %v4667_v27 = vpop.f32.mrf.mxu0 }
 0x317   : > { %v4668_v9 = vadd.f32 %v4667_v27, %v4625_v52  ;;  %v4709_v42 = vadd.f32 %v4708_v34, %v4666_v3 }
 0x318   : > { %v4669_v55 = vpop.f32.mrf.mxu0 }
 0x319   : > { %v4711_v15 = vadd.f32 %v4710_v6, %v4668_v9  ;;  %v4670_v44 = vadd.f32 %v4669_v55, %v4627_v49 }
 0x31a   : > { %v4671_v14 = vpop.f32.mrf.mxu0 }
 0x31b   : > { %v4672_v4 = vadd.f32 %v4671_v14, %v4629_v37  ;;  %v4713_v1 = vadd.f32 %v4712_v40, %v4670_v44 }
 0x31d   : > { %v4715_v36 = vadd.f32 %v4714_v54, %v4672_v4 }
 0x345   : > { %v4794_v24 = vpop.f32.mrf.mxu1 }
 0x347   : > { %v4796_v56 = vpop.f32.mrf.mxu1 }
 0x349   : > { %v4798_v58 = vpop.f32.mrf.mxu1 }
 0x34b   : > { %v4800_v20 = vpop.f32.mrf.mxu1 }
 0x354   : > { %v4751_v13 = vpop.f32.mrf.mxu0 }
 0x355   : > { %v4752_v28 = vadd.f32 %v4751_v13, %v4709_v42 }
 0x356   : > { %v4753_v62 = vpop.f32.mrf.mxu0 }
 0x357   : > { %v4754_v63 = vadd.f32 %v4753_v62, %v4711_v15  ;;  %v4795_v23 = vadd.f32 %v4794_v24, %v4752_v28 }
 0x358   : > { %v4755_v26 = vpop.f32.mrf.mxu0 }
 0x359   : > { %v4797_v30 = vadd.f32 %v4796_v56, %v4754_v63  ;;  %v4756_v39 = vadd.f32 %v4755_v26, %v4713_v1 }
 0x35a   : > { %v4757_v29 = vpop.f32.mrf.mxu0 }
 0x35b   : > { %v4758_v32 = vadd.f32 %v4757_v29, %v4715_v36  ;;  %v4799_v7 = vadd.f32 %v4798_v58, %v4756_v39 }
 0x35c   : > { %v4837_v61 = vpop.f32.mrf.mxu0 }
 0x35d   : > { %v4838_v31 = vadd.f32 %v4837_v61, %v4795_v23  ;;  %v4801_v41 = vadd.f32 %v4800_v20, %v4758_v32 }
 0x35e   : > { %v4839_v43 = vpop.f32.mrf.mxu0 }
 0x35f   : > { %v4840_v8 = vadd.f32 %v4839_v43, %v4797_v30 }
 0x360   : > { %v4841_v48 = vpop.f32.mrf.mxu0 }
 0x361   : > { %5060 = vmatprep.mubr.f32.mxu1 %v4840_v8  ;;  %v4842_v16 = vadd.f32 %v4841_v48, %v4799_v7 }
 0x362   : > { %v4843_v18 = vpop.f32.mrf.mxu0  ;;  %5061 = vmatmul.mubr.f32.vlgmr.msra.gmra.mxu1 %v4838_v31 }
 0x363   : > { %v4844_v10 = vadd.f32 %v4843_v18, %v4801_v41 }
 0x365   : > { %5065 = vmatprep.mubr.f32.mxu1 %v4844_v10  ;;  %v5799_v35 = vpop.f32.mrf.mxu1 }
 0x366   : > { %5066 = vmatmul.mubr.f32.gmra.mxu1 %v4842_v16 }
 0x367   : > { %v5800_v38 = vpop.f32.mrf.mxu1 }
 0x368   : > { %v5801_v57 = vadd.f32 %v5800_v38, %v5799_v35 }
 0x369   : > { %v5802_v12 = vpop.f32.mrf.mxu1 }
 0x36a   : > { %v4913_v46 = vadd.f32 %v5801_v57, %v344_v0 }
 0x36b   : > { %v5803_v25 = vpop.f32.mrf.mxu1 }
 0x36c   : > { %v5804_v11 = vadd.f32 %v5803_v25, %v5802_v12 }
 0x36e   : > { %v4918_v17 = vadd.f32 %v5804_v11, %v345_v47 }
 0x37d   : > { %v5837_v21 = vpop.f32.mrf.mxu0 }
 0x37f   : > { %v5838_v33 = vpop.f32.mrf.mxu0 }
 0x380   : > { %v5839_v19 = vadd.f32 %v5838_v33, %v5837_v21 }
 0x381   : > { %v5840_v5 = vpop.f32.mrf.mxu0 }
 0x382   : > { %v4988_v50 = vadd.f32 %v5839_v19, %v4913_v46 }
 0x383   : > { %v5841_v60 = vpop.f32.mrf.mxu0 }
 0x384   : > { %v5842_v53 = vadd.f32 %v5841_v60, %v5840_v5 }
 0x386   : > { %v4993_v6 = vadd.f32 %v5842_v53, %v4918_v17 }
 0x422   : > { %v5875_v2 = vpop.f32.mrf.mxu1 }
 0x424   : > { %v5876_v22 = vpop.f32.mrf.mxu1 }
 0x425   : > { %v5877_v59 = vadd.f32 %v5876_v22, %v5875_v2 }
 0x426   : > { %v5878_v51 = vpop.f32.mrf.mxu1 }
 0x427   : > { %v5063_v34 = vadd.f32 %v5877_v59, %v4988_v50 }
 0x428   : > { %v5879_v27 = vpop.f32.mrf.mxu1 }
 0x429   : > { %5072 = vst.msk [vmem:[%s232_s30] sm:$0xff] %vm5071_vm1, %v5063_v34  ;;  %v5880_v55 = vadd.f32 %v5879_v27, %v5878_v51 }
 0x42b   : > { %v5068_v40 = vadd.f32 %v5880_v55, %v4993_v6 }
 0x42d   : > { %5073 = vst.msk [vmem:[%s232_s30 + $0x8] sm:$0xff] %vm5071_vm1, %v5068_v40 }
 0x42e PF: > { %p15_p0 = scmp.ge.s32.totalorder %s7031_s25, 4   ;;  %s8180_s15 = smov %s6945_s16 }
 0x42f   : > { %s8181_s16 = smov %s6949_s17  ;;  %s8182_s17 = smov %s7048_s7 }
 0x430   : > { %s8183_s18 = smov %s7031_s25  ;;  %17 = sbr.rel (!%p15_p0) target bundleno = 4 (0x4), region = 80 }
 0x435   :  { %5095 = vsyncpa [#allocation3], 1 }
 0x436   :  { %5097 = vsyncpa [#allocation3 + $0x1], 1 }
 0x437   :  { %5098 = vsyncpa [#allocation5], 1 }

</bundles_post_ra>
